<compile_context>
chip_gen: v5e
topology: v5e:2x2
jax: 0.10.0
libtpu: 0.0.40
codegen_flags: <defaults>
</compile_context>

<pallas_src>
import functools

import jax
import jax.numpy as jnp
from jax import lax
from jax.experimental import pallas as pl
from jax.experimental.pallas import tpu as pltpu

# Small compat shim (newer jax: CompilerParams, older: TPUCompilerParams).
_CompilerParamsCls = getattr(pltpu, "CompilerParams", None) or getattr(
    pltpu, "TPUCompilerParams", None)


def _compiler_params(**kwargs):
    return _CompilerParamsCls(**kwargs) if _CompilerParamsCls is not None else None


# ------------------------- fused UnetBlock kernel -------------------------

def _unet_block_kernel(x_ref, w1_ref, b1_ref, w2_ref, b2_ref, y_ref, p_ref, mid_ref,
                       *, H1, W1, H2, W2, Hp, Wp):
    """Fused UnetBlock (conv3x3 -> ReLU -> conv3x3) + 2x2 maxpool for ONE image.

    x_ref  : (1, H, W, Cin)      NHWC input image
    w1_ref : (9*Cin,  Cmid)      conv1 weights, taps folded into K (order: kx, ky, ci)
    b1_ref : (1, Cmid)
    w2_ref : (9*Cmid, Cout)      conv2 weights, same folding
    b2_ref : (1, Cout)
    y_ref  : (1, H2, W2, Cout)   block output (pre-pool)  -> returned to the caller
    p_ref  : (1, Hp, Wp, Cout)   maxpooled output         -> feeds the next block
    mid_ref: (H1, W1, Cmid) VMEM conv1+ReLU activation (never leaves VMEM)
    """
    w1 = w1_ref[...]
    b1 = b1_ref[...]
    w2 = w2_ref[...]
    b2 = b2_ref[...]

    # ---- conv1 + ReLU: one K = 9*Cin matmul per output row ----
    def conv1_row(i, carry):
        # (W, 3*Cin): lanes ordered (ky, ci)
        wide = jnp.concatenate(
            [x_ref[0, i], x_ref[0, i + 1], x_ref[0, i + 2]], axis=1)
        # (W1, 9*Cin): lanes ordered (kx, ky, ci) -- matches _fold_conv_weight below
        patch = jnp.concatenate([wide[kx:kx + W1, :] for kx in range(3)], axis=1)
        acc = jnp.dot(patch, w1, preferred_element_type=jnp.float32) + b1
        mid_ref[i] = jnp.maximum(acc, 0.0)
        return carry

    lax.fori_loop(0, H1, conv1_row, 0)

    # ---- conv2 (no ReLU), reading the VMEM-resident conv1 activation ----
    def conv2_row(i, carry):
        wide = jnp.concatenate(
            [mid_ref[i], mid_ref[i + 1], mid_ref[i + 2]], axis=1)
        patch = jnp.concatenate([wide[kx:kx + W2, :] for kx in range(3)], axis=1)
        acc = jnp.dot(patch, w2, preferred_element_type=jnp.float32) + b2
        y_ref[0, i] = acc.astype(y_ref.dtype)
        return carry

    lax.fori_loop(0, H2, conv2_row, 0)

    # ---- fused MaxPool2d(2), floor mode ----
    # Stride-2 column selection via 0/1 selection matmuls (exact: one 1.0 per row),
    # which keeps everything on well-supported ops (no strided sublane slicing).
    col = lax.broadcasted_iota(jnp.int32, (Wp, W2), 1)
    two_row = 2 * lax.broadcasted_iota(jnp.int32, (Wp, W2), 0)
    sel_even = (col == two_row).astype(jnp.float32)
    sel_odd = (col == two_row + 1).astype(jnp.float32)

    def pool_row(ip, carry):
        r0 = y_ref[0, 2 * ip].astype(jnp.float32)
        r1 = y_ref[0, 2 * ip + 1].astype(jnp.float32)
        vmax = jnp.maximum(r0, r1)                                   # (W2, Cout)
        even = jnp.dot(sel_even, vmax, preferred_element_type=jnp.float32)
        odd = jnp.dot(sel_odd, vmax, preferred_element_type=jnp.float32)
        p_ref[0, ip] = jnp.maximum(even, odd).astype(p_ref.dtype)
        return carry

    lax.fori_loop(0, Hp, pool_row, 0)


# ------------------------- wrappers (pallas_call glue) -------------------------

def _fold_conv_weight(w):
    """(Cout, Cin, 3, 3) PyTorch layout -> (9*Cin, Cout) with K ordered (kx, ky, ci),
    matching the kernel's lane-concatenated patch layout."""
    cout, cin = w.shape[0], w.shape[1]
    return jnp.transpose(w, (3, 2, 1, 0)).reshape(9 * cin, cout)


def unet_block(x_nhwc, w1, b1, w2, b2):
    """One UnetBlock + MaxPool2d(2) fused in a single pallas_call.

    Returns (block_output_nhwc, pooled_output_nhwc)."""
    N, H, W, Cin = x_nhwc.shape
    Cmid = w1.shape[0]
    Cout = w2.shape[0]
    H1, W1 = H - 2, W - 2            # after conv1
    H2, W2 = H1 - 2, W1 - 2          # after conv2 (block output)
    Hp, Wp = H2 // 2, W2 // 2        # after maxpool (floor mode)

    w1f = _fold_conv_weight(w1)
    w2f = _fold_conv_weight(w2)
    b1r = b1.reshape(1, Cmid).astype(jnp.float32)
    b2r = b2.reshape(1, Cout).astype(jnp.float32)

    kernel = functools.partial(
        _unet_block_kernel, H1=H1, W1=W1, H2=H2, W2=W2, Hp=Hp, Wp=Wp)

    y, p = pl.pallas_call(
        kernel,
        grid=(N,),
        in_specs=[
            # one image per grid step
            pl.BlockSpec((1, H, W, Cin), lambda n: (n, 0, 0, 0)),
            # weights / bias: constant index_map -> resident across grid steps
            pl.BlockSpec((9 * Cin, Cmid), lambda n: (0, 0)),
            pl.BlockSpec((1, Cmid), lambda n: (0, 0)),
            pl.BlockSpec((9 * Cmid, Cout), lambda n: (0, 0)),
            pl.BlockSpec((1, Cout), lambda n: (0, 0)),
        ],
        out_specs=[
            pl.BlockSpec((1, H2, W2, Cout), lambda n: (n, 0, 0, 0)),
            pl.BlockSpec((1, Hp, Wp, Cout), lambda n: (n, 0, 0, 0)),
        ],
        out_shape=[
            jax.ShapeDtypeStruct((N, H2, W2, Cout), x_nhwc.dtype),
            jax.ShapeDtypeStruct((N, Hp, Wp, Cout), x_nhwc.dtype),
        ],
        scratch_shapes=[pltpu.VMEM((H1, W1, Cmid), jnp.float32)],
        compiler_params=_compiler_params(dimension_semantics=("parallel",)),
    )(x_nhwc, w1f, b1r, w2f, b2r)
    return y, p


# ------------------------- UnetEncoder -------------------------

def init_unet_encoder_params(key, channels=(3, 16, 32, 64)):
    """Deterministic init mirroring nn.Conv2d default (uniform +/- 1/sqrt(fan_in))."""
    params = []
    for i in range(len(channels) - 1):
        cin, cout = channels[i], channels[i + 1]
        key, k1, k2, k3, k4 = jax.random.split(key, 5)
        bound1 = 1.0 / float(jnp.sqrt(cin * 9.0))
        w1 = jax.random.uniform(k1, (cout, cin, 3, 3), jnp.float32, -bound1, bound1)
        b1 = jax.random.uniform(k2, (cout,), jnp.float32, -bound1, bound1)
        bound2 = 1.0 / float(jnp.sqrt(cout * 9.0))
        w2 = jax.random.uniform(k3, (cout, cout, 3, 3), jnp.float32, -bound2, bound2)
        b2 = jax.random.uniform(k4, (cout,), jnp.float32, -bound2, bound2)
        params.append((w1, b1, w2, b2))
    return params


def unet_encoder_forward(x_nchw, params):
    """Returns the list of per-block outputs (NCHW), matching UnetEncoder.forward."""
    x = jnp.transpose(x_nchw, (0, 2, 3, 1))  # NCHW -> NHWC, once
    block_outputs_nhwc = []
    for (w1, b1, w2, b2) in params:
        y, x = unet_block(x, w1, b1, w2, b2)  # pooled output feeds the next block
        block_outputs_nhwc.append(y)
    # Only the stored block outputs are transposed back to NCHW (the final pooled
    # activation is discarded, exactly as in the PyTorch module).
    return [jnp.transpose(y, (0, 3, 1, 2)) for y in block_outputs_nhwc]


# ------------------------- pure-JAX reference (for verification) -------------------------

def _ref_forward(x_nchw, params):
    x = jnp.transpose(x_nchw, (0, 2, 3, 1))
    outs = []
    for (w1, b1, w2, b2) in params:
        def conv(xx, w, b):
            w_hwio = jnp.transpose(w, (2, 3, 1, 0))
            y = lax.conv_general_dilated(xx, w_hwio, (1, 1), 'VALID',
                                         dimension_numbers=('NHWC', 'HWIO', 'NHWC'))
            return y + b[None, None, None, :]
        x = jnp.maximum(conv(x, w1, b1), 0.0)
        x = conv(x, w2, b2)
        outs.append(jnp.transpose(x, (0, 3, 1, 2)))
        x = lax.reduce_window(x, -jnp.inf, lax.max, (1, 2, 2, 1), (1, 2, 2, 1), 'VALID')
    return outs


if __name__ == "__main__":
    key = jax.random.PRNGKey(0)
    kx, kp = jax.random.split(key)

    # 44x44 keeps every MaxPool2d(2) exact: 44 -> 40 -> 20 -> 16 -> 8 -> 4 (-> 2 discarded).
    x = jax.random.normal(kx, (2, 3, 44, 44), jnp.float32)
    params = init_unet_encoder_params(kp)

    fwd = jax.jit(unet_encoder_forward)
    outs = fwd(x, params)
    outs = [jax.block_until_ready(o) for o in outs]

    expected_shapes = [(2, 16, 40, 40), (2, 32, 16, 16), (2, 64, 4, 4)]
    assert [tuple(o.shape) for o in outs] == expected_shapes, \
        [tuple(o.shape) for o in outs]

    refs = _ref_forward(x, params)
    for o, r in zip(outs, refs):
        assert jnp.allclose(o, r, atol=1e-3, rtol=1e-3), float(jnp.max(jnp.abs(o - r)))

    print("KERNEL_OK")
</pallas_src>

<mosaic_0001>
module attributes {stable_mosaic.version = 11 : i64} {
  func.func @_unet_block_kernel(%arg0: i32, %arg1: memref<1x44x44x3xf32, #tpu.memory_space<vmem>>, %arg2: memref<27x16xf32, #tpu.memory_space<vmem>>, %arg3: memref<1x16xf32, #tpu.memory_space<vmem>>, %arg4: memref<144x16xf32, #tpu.memory_space<vmem>>, %arg5: memref<1x16xf32, #tpu.memory_space<vmem>>, %arg6: memref<1x40x40x16xf32, #tpu.memory_space<vmem>>, %arg7: memref<1x20x20x16xf32, #tpu.memory_space<vmem>>, %arg8: memref<42x42x16xf32, #tpu.memory_space<vmem>>) attributes {dimension_semantics = [#tpu.dimension_semantics<parallel>], iteration_bounds = array<i64: 2>, scalar_prefetch = 0 : i64, scratch_operands = 1 : i64, tpu.core_type = #tpu.core_type<tc>, window_params = [{transform_indices = @transform_0, window_bounds = array<i64: 1, 44, 44, 3>}, {pipeline_mode = #tpu.pipeline_mode<synchronous>, transform_indices = @transform_1, window_bounds = array<i64: 27, 16>}, {pipeline_mode = #tpu.pipeline_mode<synchronous>, transform_indices = @transform_2, window_bounds = array<i64: 1, 16>}, {pipeline_mode = #tpu.pipeline_mode<synchronous>, transform_indices = @transform_3, window_bounds = array<i64: 144, 16>}, {pipeline_mode = #tpu.pipeline_mode<synchronous>, transform_indices = @transform_4, window_bounds = array<i64: 1, 16>}, {transform_indices = @transform_5, window_bounds = array<i64: 1, 40, 40, 16>}, {transform_indices = @transform_6, window_bounds = array<i64: 1, 20, 20, 16>}]} {
    %c0 = arith.constant 0 : index
    %c0_0 = arith.constant 0 : index
    %0 = vector.load %arg2[%c0, %c0_0] : memref<27x16xf32, #tpu.memory_space<vmem>>, vector<27x16xf32>
    %c0_1 = arith.constant 0 : index
    %c0_2 = arith.constant 0 : index
    %1 = vector.load %arg3[%c0_1, %c0_2] : memref<1x16xf32, #tpu.memory_space<vmem>>, vector<1x16xf32>
    %c0_3 = arith.constant 0 : index
    %c0_4 = arith.constant 0 : index
    %2 = vector.load %arg4[%c0_3, %c0_4] : memref<144x16xf32, #tpu.memory_space<vmem>>, vector<144x16xf32>
    %c0_5 = arith.constant 0 : index
    %c0_6 = arith.constant 0 : index
    %3 = vector.load %arg5[%c0_5, %c0_6] : memref<1x16xf32, #tpu.memory_space<vmem>>, vector<1x16xf32>
    %c0_i32 = arith.constant 0 : i32
    %c42_i32 = arith.constant 42 : i32
    %4 = arith.addi %c0_i32, %c42_i32 : i32
    %c1_i32 = arith.constant 1 : i32
    scf.for %arg9 = %c0_i32 to %4 step %c1_i32  : i32 {
      %c0_15 = arith.constant 0 : index
      %19 = arith.index_cast %arg9 : i32 to index
      %c0_16 = arith.constant 0 : index
      %c0_17 = arith.constant 0 : index
      %20 = vector.load %arg1[%c0_15, %19, %c0_16, %c0_17] : memref<1x44x44x3xf32, #tpu.memory_space<vmem>>, vector<1x1x44x3xf32>
      %21 = vector.shape_cast %20 : vector<1x1x44x3xf32> to vector<44x3xf32>
      %c1_i32_18 = arith.constant 1 : i32
      %22 = arith.addi %arg9, %c1_i32_18 : i32
      %c0_19 = arith.constant 0 : index
      %23 = arith.index_cast %22 : i32 to index
      %c0_20 = arith.constant 0 : index
      %c0_21 = arith.constant 0 : index
      %24 = vector.load %arg1[%c0_19, %23, %c0_20, %c0_21] : memref<1x44x44x3xf32, #tpu.memory_space<vmem>>, vector<1x1x44x3xf32>
      %25 = vector.shape_cast %24 : vector<1x1x44x3xf32> to vector<44x3xf32>
      %c2_i32_22 = arith.constant 2 : i32
      %26 = arith.addi %arg9, %c2_i32_22 : i32
      %c0_23 = arith.constant 0 : index
      %27 = arith.index_cast %26 : i32 to index
      %c0_24 = arith.constant 0 : index
      %c0_25 = arith.constant 0 : index
      %28 = vector.load %arg1[%c0_23, %27, %c0_24, %c0_25] : memref<1x44x44x3xf32, #tpu.memory_space<vmem>>, vector<1x1x44x3xf32>
      %29 = vector.shape_cast %28 : vector<1x1x44x3xf32> to vector<44x3xf32>
      %30 = tpu.concatenate %21, %25, %29 in 1 : vector<44x3xf32>, vector<44x3xf32>, vector<44x3xf32> -> vector<44x9xf32>
      %31 = vector.extract_strided_slice %30 {offsets = [0, 0], sizes = [42, 9], strides = [1, 1]} : vector<44x9xf32> to vector<42x9xf32>
      %32 = vector.extract_strided_slice %30 {offsets = [1, 0], sizes = [42, 9], strides = [1, 1]} : vector<44x9xf32> to vector<42x9xf32>
      %33 = vector.extract_strided_slice %30 {offsets = [2, 0], sizes = [42, 9], strides = [1, 1]} : vector<44x9xf32> to vector<42x9xf32>
      %34 = tpu.concatenate %31, %32, %33 in 1 : vector<42x9xf32>, vector<42x9xf32>, vector<42x9xf32> -> vector<42x27xf32>
      %cst = arith.constant dense<0.000000e+00> : vector<42x16xf32>
      %35 = tpu.matmul %34, %0, %cst {dimension_numbers = #tpu.dot_dimension_numbers<[1], [0], [0], [1], [0, 0, 1, 1], [], []>} : vector<42x27xf32>, vector<27x16xf32>, vector<42x16xf32> -> vector<42x16xf32>
      %36 = vector.broadcast %1 : vector<1x16xf32> to vector<42x16xf32>
      %37 = arith.addf %35, %36 : vector<42x16xf32>
      %cst_26 = arith.constant 0.000000e+00 : f32
      %38 = vector.broadcast %cst_26 : f32 to vector<42x16xf32>
      %39 = arith.maximumf %37, %38 : vector<42x16xf32>
      %40 = arith.index_cast %arg9 : i32 to index
      %c0_27 = arith.constant 0 : index
      %c0_28 = arith.constant 0 : index
      %41 = vector.load %arg8[%40, %c0_27, %c0_28] : memref<42x42x16xf32, #tpu.memory_space<vmem>>, vector<1x42x16xf32>
      %42 = vector.shape_cast %41 : vector<1x42x16xf32> to vector<42x16xf32>
      %43 = vector.shape_cast %39 : vector<42x16xf32> to vector<1x42x16xf32>
      tpu.vector_store %arg8[%40, %c0_27, %c0_28], %43 {strides = array<i32>} : memref<42x42x16xf32, #tpu.memory_space<vmem>>, vector<1x42x16xf32>,
    }
    %c42_i32_7 = arith.constant 42 : i32
    %c0_i32_8 = arith.constant 0 : i32
    %c40_i32 = arith.constant 40 : i32
    %5 = arith.addi %c0_i32_8, %c40_i32 : i32
    %c1_i32_9 = arith.constant 1 : i32
    scf.for %arg9 = %c0_i32_8 to %5 step %c1_i32_9  : i32 {
      %19 = arith.index_cast %arg9 : i32 to index
      %c0_15 = arith.constant 0 : index
      %c0_16 = arith.constant 0 : index
      %20 = vector.load %arg8[%19, %c0_15, %c0_16] : memref<42x42x16xf32, #tpu.memory_space<vmem>>, vector<1x42x16xf32>
      %21 = vector.shape_cast %20 : vector<1x42x16xf32> to vector<42x16xf32>
      %c1_i32_17 = arith.constant 1 : i32
      %22 = arith.addi %arg9, %c1_i32_17 : i32
      %23 = arith.index_cast %22 : i32 to index
      %c0_18 = arith.constant 0 : index
      %c0_19 = arith.constant 0 : index
      %24 = vector.load %arg8[%23, %c0_18, %c0_19] : memref<42x42x16xf32, #tpu.memory_space<vmem>>, vector<1x42x16xf32>
      %25 = vector.shape_cast %24 : vector<1x42x16xf32> to vector<42x16xf32>
      %c2_i32_20 = arith.constant 2 : i32
      %26 = arith.addi %arg9, %c2_i32_20 : i32
      %27 = arith.index_cast %26 : i32 to index
      %c0_21 = arith.constant 0 : index
      %c0_22 = arith.constant 0 : index
      %28 = vector.load %arg8[%27, %c0_21, %c0_22] : memref<42x42x16xf32, #tpu.memory_space<vmem>>, vector<1x42x16xf32>
      %29 = vector.shape_cast %28 : vector<1x42x16xf32> to vector<42x16xf32>
      %30 = tpu.concatenate %21, %25, %29 in 1 : vector<42x16xf32>, vector<42x16xf32>, vector<42x16xf32> -> vector<42x48xf32>
      %31 = vector.extract_strided_slice %30 {offsets = [0, 0], sizes = [40, 48], strides = [1, 1]} : vector<42x48xf32> to vector<40x48xf32>
      %32 = vector.extract_strided_slice %30 {offsets = [1, 0], sizes = [40, 48], strides = [1, 1]} : vector<42x48xf32> to vector<40x48xf32>
      %33 = vector.extract_strided_slice %30 {offsets = [2, 0], sizes = [40, 48], strides = [1, 1]} : vector<42x48xf32> to vector<40x48xf32>
      %34 = tpu.concatenate %31, %32, %33 in 1 : vector<40x48xf32>, vector<40x48xf32>, vector<40x48xf32> -> vector<40x144xf32>
      %cst = arith.constant dense<0.000000e+00> : vector<40x16xf32>
      %35 = tpu.matmul %34, %2, %cst {dimension_numbers = #tpu.dot_dimension_numbers<[1], [0], [0], [1], [0, 0, 1, 1], [], []>} : vector<40x144xf32>, vector<144x16xf32>, vector<40x16xf32> -> vector<40x16xf32>
      %36 = vector.broadcast %3 : vector<1x16xf32> to vector<40x16xf32>
      %37 = arith.addf %35, %36 : vector<40x16xf32>
      %c0_23 = arith.constant 0 : index
      %38 = arith.index_cast %arg9 : i32 to index
      %c0_24 = arith.constant 0 : index
      %c0_25 = arith.constant 0 : index
      %39 = vector.load %arg6[%c0_23, %38, %c0_24, %c0_25] : memref<1x40x40x16xf32, #tpu.memory_space<vmem>>, vector<1x1x40x16xf32>
      %40 = vector.shape_cast %39 : vector<1x1x40x16xf32> to vector<40x16xf32>
      %41 = vector.shape_cast %37 : vector<40x16xf32> to vector<1x1x40x16xf32>
      tpu.vector_store %arg6[%c0_23, %38, %c0_24, %c0_25], %41 {strides = array<i32>} : memref<1x40x40x16xf32, #tpu.memory_space<vmem>>, vector<1x1x40x16xf32>,
    }
    %c40_i32_10 = arith.constant 40 : i32
    %6 = tpu.iota {dimensions = array<i32: 1>} : vector<20x40xi32>
    %7 = tpu.iota {dimensions = array<i32: 0>} : vector<20x40xi32>
    %c2_i32 = arith.constant 2 : i32
    %8 = vector.broadcast %c2_i32 : i32 to vector<20x40xi32>
    %9 = arith.muli %8, %7 : vector<20x40xi32>
    %10 = arith.cmpi eq, %6, %9 : vector<20x40xi32>
    %11 = arith.extui %10 : vector<20x40xi1> to vector<20x40xi32>
    %12 = arith.sitofp %11 : vector<20x40xi32> to vector<20x40xf32>
    %c1_i32_11 = arith.constant 1 : i32
    %13 = vector.broadcast %c1_i32_11 : i32 to vector<20x40xi32>
    %14 = arith.addi %9, %13 : vector<20x40xi32>
    %15 = arith.cmpi eq, %6, %14 : vector<20x40xi32>
    %16 = arith.extui %15 : vector<20x40xi1> to vector<20x40xi32>
    %17 = arith.sitofp %16 : vector<20x40xi32> to vector<20x40xf32>
    %c0_i32_12 = arith.constant 0 : i32
    %c20_i32 = arith.constant 20 : i32
    %18 = arith.addi %c0_i32_12, %c20_i32 : i32
    %c1_i32_13 = arith.constant 1 : i32
    scf.for %arg9 = %c0_i32_12 to %18 step %c1_i32_13  : i32 {
      %c2_i32_15 = arith.constant 2 : i32
      %19 = arith.muli %c2_i32_15, %arg9 : i32
      %c0_16 = arith.constant 0 : index
      %20 = arith.index_cast %19 : i32 to index
      %c0_17 = arith.constant 0 : index
      %c0_18 = arith.constant 0 : index
      %21 = vector.load %arg6[%c0_16, %20, %c0_17, %c0_18] : memref<1x40x40x16xf32, #tpu.memory_space<vmem>>, vector<1x1x40x16xf32>
      %22 = vector.shape_cast %21 : vector<1x1x40x16xf32> to vector<40x16xf32>
      %c2_i32_19 = arith.constant 2 : i32
      %23 = arith.muli %c2_i32_19, %arg9 : i32
      %c1_i32_20 = arith.constant 1 : i32
      %24 = arith.addi %23, %c1_i32_20 : i32
      %c0_21 = arith.constant 0 : index
      %25 = arith.index_cast %24 : i32 to index
      %c0_22 = arith.constant 0 : index
      %c0_23 = arith.constant 0 : index
      %26 = vector.load %arg6[%c0_21, %25, %c0_22, %c0_23] : memref<1x40x40x16xf32, #tpu.memory_space<vmem>>, vector<1x1x40x16xf32>
      %27 = vector.shape_cast %26 : vector<1x1x40x16xf32> to vector<40x16xf32>
      %28 = arith.maximumf %22, %27 : vector<40x16xf32>
      %cst = arith.constant dense<0.000000e+00> : vector<20x16xf32>
      %29 = tpu.matmul %12, %28, %cst {dimension_numbers = #tpu.dot_dimension_numbers<[1], [0], [0], [1], [0, 0, 1, 1], [], []>} : vector<20x40xf32>, vector<40x16xf32>, vector<20x16xf32> -> vector<20x16xf32>
      %cst_24 = arith.constant dense<0.000000e+00> : vector<20x16xf32>
      %30 = tpu.matmul %17, %28, %cst_24 {dimension_numbers = #tpu.dot_dimension_numbers<[1], [0], [0], [1], [0, 0, 1, 1], [], []>} : vector<20x40xf32>, vector<40x16xf32>, vector<20x16xf32> -> vector<20x16xf32>
      %31 = arith.maximumf %29, %30 : vector<20x16xf32>
      %c0_25 = arith.constant 0 : index
      %32 = arith.index_cast %arg9 : i32 to index
      %c0_26 = arith.constant 0 : index
      %c0_27 = arith.constant 0 : index
      %33 = vector.load %arg7[%c0_25, %32, %c0_26, %c0_27] : memref<1x20x20x16xf32, #tpu.memory_space<vmem>>, vector<1x1x20x16xf32>
      %34 = vector.shape_cast %33 : vector<1x1x20x16xf32> to vector<20x16xf32>
      %35 = vector.shape_cast %31 : vector<20x16xf32> to vector<1x1x20x16xf32>
      tpu.vector_store %arg7[%c0_25, %32, %c0_26, %c0_27], %35 {strides = array<i32>} : memref<1x20x20x16xf32, #tpu.memory_space<vmem>>, vector<1x1x20x16xf32>,
    }
    %c20_i32_14 = arith.constant 20 : i32
    return
  }
  func.func @transform_0(%arg0: i32) -> (i32, i32, i32, i32) {
    %c0_i32 = arith.constant 0 : i32
    %c0_i32_0 = arith.constant 0 : i32
    %c0_i32_1 = arith.constant 0 : i32
    %c0_i32_2 = arith.constant 0 : i32
    return %arg0, %c0_i32, %c0_i32_0, %c0_i32_1 : i32, i32, i32, i32
  }
  func.func @transform_1(%arg0: i32) -> (i32, i32) {
    %c0_i32 = arith.constant 0 : i32
    %c0_i32_0 = arith.constant 0 : i32
    %c0_i32_1 = arith.constant 0 : i32
    return %c0_i32, %c0_i32_0 : i32, i32
  }
  func.func @transform_2(%arg0: i32) -> (i32, i32) {
    %c0_i32 = arith.constant 0 : i32
    %c0_i32_0 = arith.constant 0 : i32
    %c0_i32_1 = arith.constant 0 : i32
    return %c0_i32, %c0_i32_0 : i32, i32
  }
  func.func @transform_3(%arg0: i32) -> (i32, i32) {
    %c0_i32 = arith.constant 0 : i32
    %c0_i32_0 = arith.constant 0 : i32
    %c0_i32_1 = arith.constant 0 : i32
    return %c0_i32, %c0_i32_0 : i32, i32
  }
  func.func @transform_4(%arg0: i32) -> (i32, i32) {
    %c0_i32 = arith.constant 0 : i32
    %c0_i32_0 = arith.constant 0 : i32
    %c0_i32_1 = arith.constant 0 : i32
    return %c0_i32, %c0_i32_0 : i32, i32
  }
  func.func @transform_5(%arg0: i32) -> (i32, i32, i32, i32) {
    %c0_i32 = arith.constant 0 : i32
    %c0_i32_0 = arith.constant 0 : i32
    %c0_i32_1 = arith.constant 0 : i32
    %c0_i32_2 = arith.constant 0 : i32
    return %arg0, %c0_i32, %c0_i32_0, %c0_i32_1 : i32, i32, i32, i32
  }
  func.func @transform_6(%arg0: i32) -> (i32, i32, i32, i32) {
    %c0_i32 = arith.constant 0 : i32
    %c0_i32_0 = arith.constant 0 : i32
    %c0_i32_1 = arith.constant 0 : i32
    %c0_i32_2 = arith.constant 0 : i32
    return %arg0, %c0_i32, %c0_i32_0, %c0_i32_1 : i32, i32, i32, i32
  }
}

module attributes {stable_mosaic.version = 11 : i64} {
  func.func @_unet_block_kernel(%arg0: i32, %arg1: memref<1x20x20x16xf32, #tpu.memory_space<vmem>>, %arg2: memref<144x32xf32, #tpu.memory_space<vmem>>, %arg3: memref<1x32xf32, #tpu.memory_space<vmem>>, %arg4: memref<288x32xf32, #tpu.memory_space<vmem>>, %arg5: memref<1x32xf32, #tpu.memory_space<vmem>>, %arg6: memref<1x16x16x32xf32, #tpu.memory_space<vmem>>, %arg7: memref<1x8x8x32xf32, #tpu.memory_space<vmem>>, %arg8: memref<18x18x32xf32, #tpu.memory_space<vmem>>) attributes {dimension_semantics = [#tpu.dimension_semantics<parallel>], iteration_bounds = array<i64: 2>, scalar_prefetch = 0 : i64, scratch_operands = 1 : i64, tpu.core_type = #tpu.core_type<tc>, window_params = [{transform_indices = @transform_0, window_bounds = array<i64: 1, 20, 20, 16>}, {pipeline_mode = #tpu.pipeline_mode<synchronous>, transform_indices = @transform_1, window_bounds = array<i64: 144, 32>}, {pipeline_mode = #tpu.pipeline_mode<synchronous>, transform_indices = @transform_2, window_bounds = array<i64: 1, 32>}, {pipeline_mode = #tpu.pipeline_mode<synchronous>, transform_indices = @transform_3, window_bounds = array<i64: 288, 32>}, {pipeline_mode = #tpu.pipeline_mode<synchronous>, transform_indices = @transform_4, window_bounds = array<i64: 1, 32>}, {transform_indices = @transform_5, window_bounds = array<i64: 1, 16, 16, 32>}, {transform_indices = @transform_6, window_bounds = array<i64: 1, 8, 8, 32>}]} {
    %c0 = arith.constant 0 : index
    %c0_0 = arith.constant 0 : index
    %0 = vector.load %arg2[%c0, %c0_0] : memref<144x32xf32, #tpu.memory_space<vmem>>, vector<144x32xf32>
    %c0_1 = arith.constant 0 : index
    %c0_2 = arith.constant 0 : index
    %1 = vector.load %arg3[%c0_1, %c0_2] : memref<1x32xf32, #tpu.memory_space<vmem>>, vector<1x32xf32>
    %c0_3 = arith.constant 0 : index
    %c0_4 = arith.constant 0 : index
    %2 = vector.load %arg4[%c0_3, %c0_4] : memref<288x32xf32, #tpu.memory_space<vmem>>, vector<288x32xf32>
    %c0_5 = arith.constant 0 : index
    %c0_6 = arith.constant 0 : index
    %3 = vector.load %arg5[%c0_5, %c0_6] : memref<1x32xf32, #tpu.memory_space<vmem>>, vector<1x32xf32>
    %c0_i32 = arith.constant 0 : i32
    %c18_i32 = arith.constant 18 : i32
    %4 = arith.addi %c0_i32, %c18_i32 : i32
    %c1_i32 = arith.constant 1 : i32
    scf.for %arg9 = %c0_i32 to %4 step %c1_i32  : i32 {
      %c0_15 = arith.constant 0 : index
      %19 = arith.index_cast %arg9 : i32 to index
      %c0_16 = arith.constant 0 : index
      %c0_17 = arith.constant 0 : index
      %20 = vector.load %arg1[%c0_15, %19, %c0_16, %c0_17] : memref<1x20x20x16xf32, #tpu.memory_space<vmem>>, vector<1x1x20x16xf32>
      %21 = vector.shape_cast %20 : vector<1x1x20x16xf32> to vector<20x16xf32>
      %c1_i32_18 = arith.constant 1 : i32
      %22 = arith.addi %arg9, %c1_i32_18 : i32
      %c0_19 = arith.constant 0 : index
      %23 = arith.index_cast %22 : i32 to index
      %c0_20 = arith.constant 0 : index
      %c0_21 = arith.constant 0 : index
      %24 = vector.load %arg1[%c0_19, %23, %c0_20, %c0_21] : memref<1x20x20x16xf32, #tpu.memory_space<vmem>>, vector<1x1x20x16xf32>
      %25 = vector.shape_cast %24 : vector<1x1x20x16xf32> to vector<20x16xf32>
      %c2_i32_22 = arith.constant 2 : i32
      %26 = arith.addi %arg9, %c2_i32_22 : i32
      %c0_23 = arith.constant 0 : index
      %27 = arith.index_cast %26 : i32 to index
      %c0_24 = arith.constant 0 : index
      %c0_25 = arith.constant 0 : index
      %28 = vector.load %arg1[%c0_23, %27, %c0_24, %c0_25] : memref<1x20x20x16xf32, #tpu.memory_space<vmem>>, vector<1x1x20x16xf32>
      %29 = vector.shape_cast %28 : vector<1x1x20x16xf32> to vector<20x16xf32>
      %30 = tpu.concatenate %21, %25, %29 in 1 : vector<20x16xf32>, vector<20x16xf32>, vector<20x16xf32> -> vector<20x48xf32>
      %31 = vector.extract_strided_slice %30 {offsets = [0, 0], sizes = [18, 48], strides = [1, 1]} : vector<20x48xf32> to vector<18x48xf32>
      %32 = vector.extract_strided_slice %30 {offsets = [1, 0], sizes = [18, 48], strides = [1, 1]} : vector<20x48xf32> to vector<18x48xf32>
      %33 = vector.extract_strided_slice %30 {offsets = [2, 0], sizes = [18, 48], strides = [1, 1]} : vector<20x48xf32> to vector<18x48xf32>
      %34 = tpu.concatenate %31, %32, %33 in 1 : vector<18x48xf32>, vector<18x48xf32>, vector<18x48xf32> -> vector<18x144xf32>
      %cst = arith.constant dense<0.000000e+00> : vector<18x32xf32>
      %35 = tpu.matmul %34, %0, %cst {dimension_numbers = #tpu.dot_dimension_numbers<[1], [0], [0], [1], [0, 0, 1, 1], [], []>} : vector<18x144xf32>, vector<144x32xf32>, vector<18x32xf32> -> vector<18x32xf32>
      %36 = vector.broadcast %1 : vector<1x32xf32> to vector<18x32xf32>
      %37 = arith.addf %35, %36 : vector<18x32xf32>
      %cst_26 = arith.constant 0.000000e+00 : f32
      %38 = vector.broadcast %cst_26 : f32 to vector<18x32xf32>
      %39 = arith.maximumf %37, %38 : vector<18x32xf32>
      %40 = arith.index_cast %arg9 : i32 to index
      %c0_27 = arith.constant 0 : index
      %c0_28 = arith.constant 0 : index
      %41 = vector.load %arg8[%40, %c0_27, %c0_28] : memref<18x18x32xf32, #tpu.memory_space<vmem>>, vector<1x18x32xf32>
      %42 = vector.shape_cast %41 : vector<1x18x32xf32> to vector<18x32xf32>
      %43 = vector.shape_cast %39 : vector<18x32xf32> to vector<1x18x32xf32>
      tpu.vector_store %arg8[%40, %c0_27, %c0_28], %43 {strides = array<i32>} : memref<18x18x32xf32, #tpu.memory_space<vmem>>, vector<1x18x32xf32>,
    }
    %c18_i32_7 = arith.constant 18 : i32
    %c0_i32_8 = arith.constant 0 : i32
    %c16_i32 = arith.constant 16 : i32
    %5 = arith.addi %c0_i32_8, %c16_i32 : i32
    %c1_i32_9 = arith.constant 1 : i32
    scf.for %arg9 = %c0_i32_8 to %5 step %c1_i32_9  : i32 {
      %19 = arith.index_cast %arg9 : i32 to index
      %c0_15 = arith.constant 0 : index
      %c0_16 = arith.constant 0 : index
      %20 = vector.load %arg8[%19, %c0_15, %c0_16] : memref<18x18x32xf32, #tpu.memory_space<vmem>>, vector<1x18x32xf32>
      %21 = vector.shape_cast %20 : vector<1x18x32xf32> to vector<18x32xf32>
      %c1_i32_17 = arith.constant 1 : i32
      %22 = arith.addi %arg9, %c1_i32_17 : i32
      %23 = arith.index_cast %22 : i32 to index
      %c0_18 = arith.constant 0 : index
      %c0_19 = arith.constant 0 : index
      %24 = vector.load %arg8[%23, %c0_18, %c0_19] : memref<18x18x32xf32, #tpu.memory_space<vmem>>, vector<1x18x32xf32>
      %25 = vector.shape_cast %24 : vector<1x18x32xf32> to vector<18x32xf32>
      %c2_i32_20 = arith.constant 2 : i32
      %26 = arith.addi %arg9, %c2_i32_20 : i32
      %27 = arith.index_cast %26 : i32 to index
      %c0_21 = arith.constant 0 : index
      %c0_22 = arith.constant 0 : index
      %28 = vector.load %arg8[%27, %c0_21, %c0_22] : memref<18x18x32xf32, #tpu.memory_space<vmem>>, vector<1x18x32xf32>
      %29 = vector.shape_cast %28 : vector<1x18x32xf32> to vector<18x32xf32>
      %30 = tpu.concatenate %21, %25, %29 in 1 : vector<18x32xf32>, vector<18x32xf32>, vector<18x32xf32> -> vector<18x96xf32>
      %31 = vector.extract_strided_slice %30 {offsets = [0, 0], sizes = [16, 96], strides = [1, 1]} : vector<18x96xf32> to vector<16x96xf32>
      %32 = vector.extract_strided_slice %30 {offsets = [1, 0], sizes = [16, 96], strides = [1, 1]} : vector<18x96xf32> to vector<16x96xf32>
      %33 = vector.extract_strided_slice %30 {offsets = [2, 0], sizes = [16, 96], strides = [1, 1]} : vector<18x96xf32> to vector<16x96xf32>
      %34 = tpu.concatenate %31, %32, %33 in 1 : vector<16x96xf32>, vector<16x96xf32>, vector<16x96xf32> -> vector<16x288xf32>
      %cst = arith.constant dense<0.000000e+00> : vector<16x32xf32>
      %35 = tpu.matmul %34, %2, %cst {dimension_numbers = #tpu.dot_dimension_numbers<[1], [0], [0], [1], [0, 0, 1, 1], [], []>} : vector<16x288xf32>, vector<288x32xf32>, vector<16x32xf32> -> vector<16x32xf32>
      %36 = vector.broadcast %3 : vector<1x32xf32> to vector<16x32xf32>
      %37 = arith.addf %35, %36 : vector<16x32xf32>
      %c0_23 = arith.constant 0 : index
      %38 = arith.index_cast %arg9 : i32 to index
      %c0_24 = arith.constant 0 : index
      %c0_25 = arith.constant 0 : index
      %39 = vector.load %arg6[%c0_23, %38, %c0_24, %c0_25] : memref<1x16x16x32xf32, #tpu.memory_space<vmem>>, vector<1x1x16x32xf32>
      %40 = vector.shape_cast %39 : vector<1x1x16x32xf32> to vector<16x32xf32>
      %41 = vector.shape_cast %37 : vector<16x32xf32> to vector<1x1x16x32xf32>
      tpu.vector_store %arg6[%c0_23, %38, %c0_24, %c0_25], %41 {strides = array<i32>} : memref<1x16x16x32xf32, #tpu.memory_space<vmem>>, vector<1x1x16x32xf32>,
    }
    %c16_i32_10 = arith.constant 16 : i32
    %6 = tpu.iota {dimensions = array<i32: 1>} : vector<8x16xi32>
    %7 = tpu.iota {dimensions = array<i32: 0>} : vector<8x16xi32>
    %c2_i32 = arith.constant 2 : i32
    %8 = vector.broadcast %c2_i32 : i32 to vector<8x16xi32>
    %9 = arith.muli %8, %7 : vector<8x16xi32>
    %10 = arith.cmpi eq, %6, %9 : vector<8x16xi32>
    %11 = arith.extui %10 : vector<8x16xi1> to vector<8x16xi32>
    %12 = arith.sitofp %11 : vector<8x16xi32> to vector<8x16xf32>
    %c1_i32_11 = arith.constant 1 : i32
    %13 = vector.broadcast %c1_i32_11 : i32 to vector<8x16xi32>
    %14 = arith.addi %9, %13 : vector<8x16xi32>
    %15 = arith.cmpi eq, %6, %14 : vector<8x16xi32>
    %16 = arith.extui %15 : vector<8x16xi1> to vector<8x16xi32>
    %17 = arith.sitofp %16 : vector<8x16xi32> to vector<8x16xf32>
    %c0_i32_12 = arith.constant 0 : i32
    %c8_i32 = arith.constant 8 : i32
    %18 = arith.addi %c0_i32_12, %c8_i32 : i32
    %c1_i32_13 = arith.constant 1 : i32
    scf.for %arg9 = %c0_i32_12 to %18 step %c1_i32_13  : i32 {
      %c2_i32_15 = arith.constant 2 : i32
      %19 = arith.muli %c2_i32_15, %arg9 : i32
      %c0_16 = arith.constant 0 : index
      %20 = arith.index_cast %19 : i32 to index
      %c0_17 = arith.constant 0 : index
      %c0_18 = arith.constant 0 : index
      %21 = vector.load %arg6[%c0_16, %20, %c0_17, %c0_18] : memref<1x16x16x32xf32, #tpu.memory_space<vmem>>, vector<1x1x16x32xf32>
      %22 = vector.shape_cast %21 : vector<1x1x16x32xf32> to vector<16x32xf32>
      %c2_i32_19 = arith.constant 2 : i32
      %23 = arith.muli %c2_i32_19, %arg9 : i32
      %c1_i32_20 = arith.constant 1 : i32
      %24 = arith.addi %23, %c1_i32_20 : i32
      %c0_21 = arith.constant 0 : index
      %25 = arith.index_cast %24 : i32 to index
      %c0_22 = arith.constant 0 : index
      %c0_23 = arith.constant 0 : index
      %26 = vector.load %arg6[%c0_21, %25, %c0_22, %c0_23] : memref<1x16x16x32xf32, #tpu.memory_space<vmem>>, vector<1x1x16x32xf32>
      %27 = vector.shape_cast %26 : vector<1x1x16x32xf32> to vector<16x32xf32>
      %28 = arith.maximumf %22, %27 : vector<16x32xf32>
      %cst = arith.constant dense<0.000000e+00> : vector<8x32xf32>
      %29 = tpu.matmul %12, %28, %cst {dimension_numbers = #tpu.dot_dimension_numbers<[1], [0], [0], [1], [0, 0, 1, 1], [], []>} : vector<8x16xf32>, vector<16x32xf32>, vector<8x32xf32> -> vector<8x32xf32>
      %cst_24 = arith.constant dense<0.000000e+00> : vector<8x32xf32>
      %30 = tpu.matmul %17, %28, %cst_24 {dimension_numbers = #tpu.dot_dimension_numbers<[1], [0], [0], [1], [0, 0, 1, 1], [], []>} : vector<8x16xf32>, vector<16x32xf32>, vector<8x32xf32> -> vector<8x32xf32>
      %31 = arith.maximumf %29, %30 : vector<8x32xf32>
      %c0_25 = arith.constant 0 : index
      %32 = arith.index_cast %arg9 : i32 to index
      %c0_26 = arith.constant 0 : index
      %c0_27 = arith.constant 0 : index
      %33 = vector.load %arg7[%c0_25, %32, %c0_26, %c0_27] : memref<1x8x8x32xf32, #tpu.memory_space<vmem>>, vector<1x1x8x32xf32>
      %34 = vector.shape_cast %33 : vector<1x1x8x32xf32> to vector<8x32xf32>
      %35 = vector.shape_cast %31 : vector<8x32xf32> to vector<1x1x8x32xf32>
      tpu.vector_store %arg7[%c0_25, %32, %c0_26, %c0_27], %35 {strides = array<i32>} : memref<1x8x8x32xf32, #tpu.memory_space<vmem>>, vector<1x1x8x32xf32>,
    }
    %c8_i32_14 = arith.constant 8 : i32
    return
  }
  func.func @transform_0(%arg0: i32) -> (i32, i32, i32, i32) {
    %c0_i32 = arith.constant 0 : i32
    %c0_i32_0 = arith.constant 0 : i32
    %c0_i32_1 = arith.constant 0 : i32
    %c0_i32_2 = arith.constant 0 : i32
    return %arg0, %c0_i32, %c0_i32_0, %c0_i32_1 : i32, i32, i32, i32
  }
  func.func @transform_1(%arg0: i32) -> (i32, i32) {
    %c0_i32 = arith.constant 0 : i32
    %c0_i32_0 = arith.constant 0 : i32
    %c0_i32_1 = arith.constant 0 : i32
    return %c0_i32, %c0_i32_0 : i32, i32
  }
  func.func @transform_2(%arg0: i32) -> (i32, i32) {
    %c0_i32 = arith.constant 0 : i32
    %c0_i32_0 = arith.constant 0 : i32
    %c0_i32_1 = arith.constant 0 : i32
    return %c0_i32, %c0_i32_0 : i32, i32
  }
  func.func @transform_3(%arg0: i32) -> (i32, i32) {
    %c0_i32 = arith.constant 0 : i32
    %c0_i32_0 = arith.constant 0 : i32
    %c0_i32_1 = arith.constant 0 : i32
    return %c0_i32, %c0_i32_0 : i32, i32
  }
  func.func @transform_4(%arg0: i32) -> (i32, i32) {
    %c0_i32 = arith.constant 0 : i32
    %c0_i32_0 = arith.constant 0 : i32
    %c0_i32_1 = arith.constant 0 : i32
    return %c0_i32, %c0_i32_0 : i32, i32
  }
  func.func @transform_5(%arg0: i32) -> (i32, i32, i32, i32) {
    %c0_i32 = arith.constant 0 : i32
    %c0_i32_0 = arith.constant 0 : i32
    %c0_i32_1 = arith.constant 0 : i32
    %c0_i32_2 = arith.constant 0 : i32
    return %arg0, %c0_i32, %c0_i32_0, %c0_i32_1 : i32, i32, i32, i32
  }
  func.func @transform_6(%arg0: i32) -> (i32, i32, i32, i32) {
    %c0_i32 = arith.constant 0 : i32
    %c0_i32_0 = arith.constant 0 : i32
    %c0_i32_1 = arith.constant 0 : i32
    %c0_i32_2 = arith.constant 0 : i32
    return %arg0, %c0_i32, %c0_i32_0, %c0_i32_1 : i32, i32, i32, i32
  }
}

module attributes {stable_mosaic.version = 11 : i64} {
  func.func @_unet_block_kernel(%arg0: i32, %arg1: memref<1x8x8x32xf32, #tpu.memory_space<vmem>>, %arg2: memref<288x64xf32, #tpu.memory_space<vmem>>, %arg3: memref<1x64xf32, #tpu.memory_space<vmem>>, %arg4: memref<576x64xf32, #tpu.memory_space<vmem>>, %arg5: memref<1x64xf32, #tpu.memory_space<vmem>>, %arg6: memref<1x4x4x64xf32, #tpu.memory_space<vmem>>, %arg7: memref<1x2x2x64xf32, #tpu.memory_space<vmem>>, %arg8: memref<6x6x64xf32, #tpu.memory_space<vmem>>) attributes {dimension_semantics = [#tpu.dimension_semantics<parallel>], iteration_bounds = array<i64: 2>, scalar_prefetch = 0 : i64, scratch_operands = 1 : i64, tpu.core_type = #tpu.core_type<tc>, window_params = [{transform_indices = @transform_0, window_bounds = array<i64: 1, 8, 8, 32>}, {pipeline_mode = #tpu.pipeline_mode<synchronous>, transform_indices = @transform_1, window_bounds = array<i64: 288, 64>}, {pipeline_mode = #tpu.pipeline_mode<synchronous>, transform_indices = @transform_2, window_bounds = array<i64: 1, 64>}, {pipeline_mode = #tpu.pipeline_mode<synchronous>, transform_indices = @transform_3, window_bounds = array<i64: 576, 64>}, {pipeline_mode = #tpu.pipeline_mode<synchronous>, transform_indices = @transform_4, window_bounds = array<i64: 1, 64>}, {transform_indices = @transform_5, window_bounds = array<i64: 1, 4, 4, 64>}, {transform_indices = @transform_6, window_bounds = array<i64: 1, 2, 2, 64>}]} {
    %c0 = arith.constant 0 : index
    %c0_0 = arith.constant 0 : index
    %0 = vector.load %arg2[%c0, %c0_0] : memref<288x64xf32, #tpu.memory_space<vmem>>, vector<288x64xf32>
    %c0_1 = arith.constant 0 : index
    %c0_2 = arith.constant 0 : index
    %1 = vector.load %arg3[%c0_1, %c0_2] : memref<1x64xf32, #tpu.memory_space<vmem>>, vector<1x64xf32>
    %c0_3 = arith.constant 0 : index
    %c0_4 = arith.constant 0 : index
    %2 = vector.load %arg4[%c0_3, %c0_4] : memref<576x64xf32, #tpu.memory_space<vmem>>, vector<576x64xf32>
    %c0_5 = arith.constant 0 : index
    %c0_6 = arith.constant 0 : index
    %3 = vector.load %arg5[%c0_5, %c0_6] : memref<1x64xf32, #tpu.memory_space<vmem>>, vector<1x64xf32>
    %c0_i32 = arith.constant 0 : i32
    %c6_i32 = arith.constant 6 : i32
    %4 = arith.addi %c0_i32, %c6_i32 : i32
    %c1_i32 = arith.constant 1 : i32
    scf.for %arg9 = %c0_i32 to %4 step %c1_i32  : i32 {
      %c0_16 = arith.constant 0 : index
      %19 = arith.index_cast %arg9 : i32 to index
      %c0_17 = arith.constant 0 : index
      %c0_18 = arith.constant 0 : index
      %20 = vector.load %arg1[%c0_16, %19, %c0_17, %c0_18] : memref<1x8x8x32xf32, #tpu.memory_space<vmem>>, vector<1x1x8x32xf32>
      %21 = vector.shape_cast %20 : vector<1x1x8x32xf32> to vector<8x32xf32>
      %c1_i32_19 = arith.constant 1 : i32
      %22 = arith.addi %arg9, %c1_i32_19 : i32
      %c0_20 = arith.constant 0 : index
      %23 = arith.index_cast %22 : i32 to index
      %c0_21 = arith.constant 0 : index
      %c0_22 = arith.constant 0 : index
      %24 = vector.load %arg1[%c0_20, %23, %c0_21, %c0_22] : memref<1x8x8x32xf32, #tpu.memory_space<vmem>>, vector<1x1x8x32xf32>
      %25 = vector.shape_cast %24 : vector<1x1x8x32xf32> to vector<8x32xf32>
      %c2_i32_23 = arith.constant 2 : i32
      %26 = arith.addi %arg9, %c2_i32_23 : i32
      %c0_24 = arith.constant 0 : index
      %27 = arith.index_cast %26 : i32 to index
      %c0_25 = arith.constant 0 : index
      %c0_26 = arith.constant 0 : index
      %28 = vector.load %arg1[%c0_24, %27, %c0_25, %c0_26] : memref<1x8x8x32xf32, #tpu.memory_space<vmem>>, vector<1x1x8x32xf32>
      %29 = vector.shape_cast %28 : vector<1x1x8x32xf32> to vector<8x32xf32>
      %30 = tpu.concatenate %21, %25, %29 in 1 : vector<8x32xf32>, vector<8x32xf32>, vector<8x32xf32> -> vector<8x96xf32>
      %31 = vector.extract_strided_slice %30 {offsets = [0, 0], sizes = [6, 96], strides = [1, 1]} : vector<8x96xf32> to vector<6x96xf32>
      %32 = vector.extract_strided_slice %30 {offsets = [1, 0], sizes = [6, 96], strides = [1, 1]} : vector<8x96xf32> to vector<6x96xf32>
      %33 = vector.extract_strided_slice %30 {offsets = [2, 0], sizes = [6, 96], strides = [1, 1]} : vector<8x96xf32> to vector<6x96xf32>
      %34 = tpu.concatenate %31, %32, %33 in 1 : vector<6x96xf32>, vector<6x96xf32>, vector<6x96xf32> -> vector<6x288xf32>
      %cst = arith.constant dense<0.000000e+00> : vector<6x64xf32>
      %35 = tpu.matmul %34, %0, %cst {dimension_numbers = #tpu.dot_dimension_numbers<[1], [0], [0], [1], [0, 0, 1, 1], [], []>} : vector<6x288xf32>, vector<288x64xf32>, vector<6x64xf32> -> vector<6x64xf32>
      %36 = vector.broadcast %1 : vector<1x64xf32> to vector<6x64xf32>
      %37 = arith.addf %35, %36 : vector<6x64xf32>
      %cst_27 = arith.constant 0.000000e+00 : f32
      %38 = vector.broadcast %cst_27 : f32 to vector<6x64xf32>
      %39 = arith.maximumf %37, %38 : vector<6x64xf32>
      %40 = arith.index_cast %arg9 : i32 to index
      %c0_28 = arith.constant 0 : index
      %c0_29 = arith.constant 0 : index
      %41 = vector.load %arg8[%40, %c0_28, %c0_29] : memref<6x6x64xf32, #tpu.memory_space<vmem>>, vector<1x6x64xf32>
      %42 = vector.shape_cast %41 : vector<1x6x64xf32> to vector<6x64xf32>
      %43 = vector.shape_cast %39 : vector<6x64xf32> to vector<1x6x64xf32>
      tpu.vector_store %arg8[%40, %c0_28, %c0_29], %43 {strides = array<i32>} : memref<6x6x64xf32, #tpu.memory_space<vmem>>, vector<1x6x64xf32>,
    }
    %c6_i32_7 = arith.constant 6 : i32
    %c0_i32_8 = arith.constant 0 : i32
    %c4_i32 = arith.constant 4 : i32
    %5 = arith.addi %c0_i32_8, %c4_i32 : i32
    %c1_i32_9 = arith.constant 1 : i32
    scf.for %arg9 = %c0_i32_8 to %5 step %c1_i32_9  : i32 {
      %19 = arith.index_cast %arg9 : i32 to index
      %c0_16 = arith.constant 0 : index
      %c0_17 = arith.constant 0 : index
      %20 = vector.load %arg8[%19, %c0_16, %c0_17] : memref<6x6x64xf32, #tpu.memory_space<vmem>>, vector<1x6x64xf32>
      %21 = vector.shape_cast %20 : vector<1x6x64xf32> to vector<6x64xf32>
      %c1_i32_18 = arith.constant 1 : i32
      %22 = arith.addi %arg9, %c1_i32_18 : i32
      %23 = arith.index_cast %22 : i32 to index
      %c0_19 = arith.constant 0 : index
      %c0_20 = arith.constant 0 : index
      %24 = vector.load %arg8[%23, %c0_19, %c0_20] : memref<6x6x64xf32, #tpu.memory_space<vmem>>, vector<1x6x64xf32>
      %25 = vector.shape_cast %24 : vector<1x6x64xf32> to vector<6x64xf32>
      %c2_i32_21 = arith.constant 2 : i32
      %26 = arith.addi %arg9, %c2_i32_21 : i32
      %27 = arith.index_cast %26 : i32 to index
      %c0_22 = arith.constant 0 : index
      %c0_23 = arith.constant 0 : index
      %28 = vector.load %arg8[%27, %c0_22, %c0_23] : memref<6x6x64xf32, #tpu.memory_space<vmem>>, vector<1x6x64xf32>
      %29 = vector.shape_cast %28 : vector<1x6x64xf32> to vector<6x64xf32>
      %30 = tpu.concatenate %21, %25, %29 in 1 : vector<6x64xf32>, vector<6x64xf32>, vector<6x64xf32> -> vector<6x192xf32>
      %31 = vector.extract_strided_slice %30 {offsets = [0, 0], sizes = [4, 192], strides = [1, 1]} : vector<6x192xf32> to vector<4x192xf32>
      %32 = vector.extract_strided_slice %30 {offsets = [1, 0], sizes = [4, 192], strides = [1, 1]} : vector<6x192xf32> to vector<4x192xf32>
      %33 = vector.extract_strided_slice %30 {offsets = [2, 0], sizes = [4, 192], strides = [1, 1]} : vector<6x192xf32> to vector<4x192xf32>
      %34 = tpu.concatenate %31, %32, %33 in 1 : vector<4x192xf32>, vector<4x192xf32>, vector<4x192xf32> -> vector<4x576xf32>
      %cst = arith.constant dense<0.000000e+00> : vector<4x64xf32>
      %35 = tpu.matmul %34, %2, %cst {dimension_numbers = #tpu.dot_dimension_numbers<[1], [0], [0], [1], [0, 0, 1, 1], [], []>} : vector<4x576xf32>, vector<576x64xf32>, vector<4x64xf32> -> vector<4x64xf32>
      %36 = vector.broadcast %3 : vector<1x64xf32> to vector<4x64xf32>
      %37 = arith.addf %35, %36 : vector<4x64xf32>
      %c0_24 = arith.constant 0 : index
      %38 = arith.index_cast %arg9 : i32 to index
      %c0_25 = arith.constant 0 : index
      %c0_26 = arith.constant 0 : index
      %39 = vector.load %arg6[%c0_24, %38, %c0_25, %c0_26] : memref<1x4x4x64xf32, #tpu.memory_space<vmem>>, vector<1x1x4x64xf32>
      %40 = vector.shape_cast %39 : vector<1x1x4x64xf32> to vector<4x64xf32>
      %41 = vector.shape_cast %37 : vector<4x64xf32> to vector<1x1x4x64xf32>
      tpu.vector_store %arg6[%c0_24, %38, %c0_25, %c0_26], %41 {strides = array<i32>} : memref<1x4x4x64xf32, #tpu.memory_space<vmem>>, vector<1x1x4x64xf32>,
    }
    %c4_i32_10 = arith.constant 4 : i32
    %6 = tpu.iota {dimensions = array<i32: 1>} : vector<2x4xi32>
    %7 = tpu.iota {dimensions = array<i32: 0>} : vector<2x4xi32>
    %c2_i32 = arith.constant 2 : i32
    %8 = vector.broadcast %c2_i32 : i32 to vector<2x4xi32>
    %9 = arith.muli %8, %7 : vector<2x4xi32>
    %10 = arith.cmpi eq, %6, %9 : vector<2x4xi32>
    %11 = arith.extui %10 : vector<2x4xi1> to vector<2x4xi32>
    %12 = arith.sitofp %11 : vector<2x4xi32> to vector<2x4xf32>
    %c1_i32_11 = arith.constant 1 : i32
    %13 = vector.broadcast %c1_i32_11 : i32 to vector<2x4xi32>
    %14 = arith.addi %9, %13 : vector<2x4xi32>
    %15 = arith.cmpi eq, %6, %14 : vector<2x4xi32>
    %16 = arith.extui %15 : vector<2x4xi1> to vector<2x4xi32>
    %17 = arith.sitofp %16 : vector<2x4xi32> to vector<2x4xf32>
    %c0_i32_12 = arith.constant 0 : i32
    %c2_i32_13 = arith.constant 2 : i32
    %18 = arith.addi %c0_i32_12, %c2_i32_13 : i32
    %c1_i32_14 = arith.constant 1 : i32
    scf.for %arg9 = %c0_i32_12 to %18 step %c1_i32_14  : i32 {
      %c2_i32_16 = arith.constant 2 : i32
      %19 = arith.muli %c2_i32_16, %arg9 : i32
      %c0_17 = arith.constant 0 : index
      %20 = arith.index_cast %19 : i32 to index
      %c0_18 = arith.constant 0 : index
      %c0_19 = arith.constant 0 : index
      %21 = vector.load %arg6[%c0_17, %20, %c0_18, %c0_19] : memref<1x4x4x64xf32, #tpu.memory_space<vmem>>, vector<1x1x4x64xf32>
      %22 = vector.shape_cast %21 : vector<1x1x4x64xf32> to vector<4x64xf32>
      %c2_i32_20 = arith.constant 2 : i32
      %23 = arith.muli %c2_i32_20, %arg9 : i32
      %c1_i32_21 = arith.constant 1 : i32
      %24 = arith.addi %23, %c1_i32_21 : i32
      %c0_22 = arith.constant 0 : index
      %25 = arith.index_cast %24 : i32 to index
      %c0_23 = arith.constant 0 : index
      %c0_24 = arith.constant 0 : index
      %26 = vector.load %arg6[%c0_22, %25, %c0_23, %c0_24] : memref<1x4x4x64xf32, #tpu.memory_space<vmem>>, vector<1x1x4x64xf32>
      %27 = vector.shape_cast %26 : vector<1x1x4x64xf32> to vector<4x64xf32>
      %28 = arith.maximumf %22, %27 : vector<4x64xf32>
      %cst = arith.constant dense<0.000000e+00> : vector<2x64xf32>
      %29 = tpu.matmul %12, %28, %cst {dimension_numbers = #tpu.dot_dimension_numbers<[1], [0], [0], [1], [0, 0, 1, 1], [], []>} : vector<2x4xf32>, vector<4x64xf32>, vector<2x64xf32> -> vector<2x64xf32>
      %cst_25 = arith.constant dense<0.000000e+00> : vector<2x64xf32>
      %30 = tpu.matmul %17, %28, %cst_25 {dimension_numbers = #tpu.dot_dimension_numbers<[1], [0], [0], [1], [0, 0, 1, 1], [], []>} : vector<2x4xf32>, vector<4x64xf32>, vector<2x64xf32> -> vector<2x64xf32>
      %31 = arith.maximumf %29, %30 : vector<2x64xf32>
      %c0_26 = arith.constant 0 : index
      %32 = arith.index_cast %arg9 : i32 to index
      %c0_27 = arith.constant 0 : index
      %c0_28 = arith.constant 0 : index
      %33 = vector.load %arg7[%c0_26, %32, %c0_27, %c0_28] : memref<1x2x2x64xf32, #tpu.memory_space<vmem>>, vector<1x1x2x64xf32>
      %34 = vector.shape_cast %33 : vector<1x1x2x64xf32> to vector<2x64xf32>
      %35 = vector.shape_cast %31 : vector<2x64xf32> to vector<1x1x2x64xf32>
      tpu.vector_store %arg7[%c0_26, %32, %c0_27, %c0_28], %35 {strides = array<i32>} : memref<1x2x2x64xf32, #tpu.memory_space<vmem>>, vector<1x1x2x64xf32>,
    }
    %c2_i32_15 = arith.constant 2 : i32
    return
  }
  func.func @transform_0(%arg0: i32) -> (i32, i32, i32, i32) {
    %c0_i32 = arith.constant 0 : i32
    %c0_i32_0 = arith.constant 0 : i32
    %c0_i32_1 = arith.constant 0 : i32
    %c0_i32_2 = arith.constant 0 : i32
    return %arg0, %c0_i32, %c0_i32_0, %c0_i32_1 : i32, i32, i32, i32
  }
  func.func @transform_1(%arg0: i32) -> (i32, i32) {
    %c0_i32 = arith.constant 0 : i32
    %c0_i32_0 = arith.constant 0 : i32
    %c0_i32_1 = arith.constant 0 : i32
    return %c0_i32, %c0_i32_0 : i32, i32
  }
  func.func @transform_2(%arg0: i32) -> (i32, i32) {
    %c0_i32 = arith.constant 0 : i32
    %c0_i32_0 = arith.constant 0 : i32
    %c0_i32_1 = arith.constant 0 : i32
    return %c0_i32, %c0_i32_0 : i32, i32
  }
  func.func @transform_3(%arg0: i32) -> (i32, i32) {
    %c0_i32 = arith.constant 0 : i32
    %c0_i32_0 = arith.constant 0 : i32
    %c0_i32_1 = arith.constant 0 : i32
    return %c0_i32, %c0_i32_0 : i32, i32
  }
  func.func @transform_4(%arg0: i32) -> (i32, i32) {
    %c0_i32 = arith.constant 0 : i32
    %c0_i32_0 = arith.constant 0 : i32
    %c0_i32_1 = arith.constant 0 : i32
    return %c0_i32, %c0_i32_0 : i32, i32
  }
  func.func @transform_5(%arg0: i32) -> (i32, i32, i32, i32) {
    %c0_i32 = arith.constant 0 : i32
    %c0_i32_0 = arith.constant 0 : i32
    %c0_i32_1 = arith.constant 0 : i32
    %c0_i32_2 = arith.constant 0 : i32
    return %arg0, %c0_i32, %c0_i32_0, %c0_i32_1 : i32, i32, i32, i32
  }
  func.func @transform_6(%arg0: i32) -> (i32, i32, i32, i32) {
    %c0_i32 = arith.constant 0 : i32
    %c0_i32_0 = arith.constant 0 : i32
    %c0_i32_1 = arith.constant 0 : i32
    %c0_i32_2 = arith.constant 0 : i32
    return %arg0, %c0_i32, %c0_i32_0, %c0_i32_1 : i32, i32, i32, i32
  }
}

</mosaic_0001>

<bundles_post_ra>
// kernel: unet_encoder_forward.4
= control target key start
LH: loop header
LB: loop body
LE: loop exit
PB: predicated region body
PF: predicated region fallthrough
CT: control target
= control target key end

     0   :  { %12 = vsyncpa [#allocation4], 0  ;;  %s1777_s0 = inlined_call_operand.vmem [shape: f32[2,20,20,16], index: 0, kind: input, shape index: {}]   ;;  %s1778_s1 = inlined_call_operand.vmem [shape: f32[144,32], index: 1, kind: input, shape index: {}]   ;;  %s1779_s2 = inlined_call_operand.vmem [shape: f32[1,32], index: 2, kind: input, shape index: {}]   ;;  %s1780_s3 = inlined_call_operand.vmem [shape: f32[288,32], index: 3, kind: input, shape index: {}]   ;;  %s1781_s4 = inlined_call_operand.vmem [shape: f32[1,32], index: 4, kind: input, shape index: {}]   ;;  %s1782_s5 = inlined_call_operand.hbm [shape: f32[2,16,16,32], index: 5, kind: output, shape index: {0}]   ;;  %s1783_s6 = inlined_call_operand.vmem [shape: f32[2,8,8,32], index: 6, kind: output, shape index: {1}]  }
   0x1   :  { %14 = vsyncpa [#allocation4 + $0x1], 0  ;;  %s1198_s21 = smov 0   ;;  %s1200_s22 = smov 0  }
   0x2   :  { %s1202_s23 = smov 0   ;;  %s1204_s24 = smov 0  }
   0x3 LB: > { %s1219_s25 = sadd.s32 4294967295, %s1139_s24   ;;  %s887_s26 = sadd.s32 4294967294, %s1139_s24   ;;  %s1139_s24 = sphi %s1204_s24, %s1819_s24   ;;  %s1135_s23 = sphi %s1202_s23, %s1818_s23   ;;  %s1131_s22 = sphi %s1200_s22, %s1817_s22   ;;  %s1127_s21 = sphi %s1198_s21, %s1816_s21  }
   0x4   : > { %s1223_s27 = sadd.s32 1, %s1139_s24   ;;  %s137_s28 = sadd.s32 1, %s1135_s23 }
   0x5   : > { %s134_s29 = ssub.s32 %s1139_s24, %s1223_s27  ;;  %p147_p0 = scmp.ne.s32.totalorder %s1135_s23, %s1131_s22 }
   0x6   : > { %p135_p1 = scmp.eq.s32.totalorder %s134_s29, 0  ;;  %p148_p2 = scmp.eq.s32.totalorder %s1219_s25, 1 }
   0x7   : > { %p153_p3 = scmp.ne.s32.totalorder %s1131_s22, %s1127_s21  ;;  %p154_p4 = scmp.eq.s32.totalorder %s887_s26, 1 }
   0x8   : > { %s1234_s30 = scalar_select %p135_p1, %s1135_s23, %s137_s28  }
   0x9   : > { %p1236_p5 = por %p148_p2, %p147_p0  ;;  %p1240_p6 = por %p154_p4, %p153_p3 }
   0xa   : > { %p890_p7 = scmp.ge.s32.totalorder %s1139_s24, 1  ;;  %p218_p8 = scmp.lt.s32.totalorder %s1139_s24, 3 }
   0xc   : > { %p219_p9 = pnand %p890_p7, %p218_p8 }
   0xe   : > { %222 = sbr.rel (%p219_p9) target bundleno = 973 (0x3cd), region = 40 }
  0x13   : > { %s243_s9 = sand.u32 1, %s1131_s22   ;;  %p253_p10 = scmp.lt.s32.totalorder %s1219_s25, 1  ;;  %v1251_v0 = vld [vmem:[%s1778_s1] sm:$0xff]  ;;  %v1256_v1 = vld [vmem:[%s1778_s1 + $0x8] sm:$0xff]  ;;  %v1261_v2 = vld [vmem:[%s1778_s1 + $0x10] sm:$0xff] }
  0x14   : > { %1796 = vst [vmem:[#allocation6_spill] sm:$0xff] %v1251_v0  ;;  %s1265_s16 = sshll.u32 %s243_s9, 8  ;;  %v1270_v3 = vld [vmem:[%s1778_s1 + $0x18] sm:$0xff]  ;;  %v1275_v4 = vld [vmem:[%s1778_s1 + $0x20] sm:$0xff]  ;;  %v1280_v5 = vld [vmem:[%s1778_s1 + $0x28] sm:$0xff]  ;;  %s1546_s20 = smov 0  }
  0x15   : > { %1797 = vst [vmem:[#allocation7_spill] sm:$0xff] %v1256_v1  ;;  %v1285_v6 = vld [vmem:[%s1778_s1 + $0x30] sm:$0xff]  ;;  %v1290_v7 = vld [vmem:[%s1778_s1 + $0x38] sm:$0xff]  ;;  %v1295_v8 = vld [vmem:[%s1778_s1 + $0x40] sm:$0xff]  ;;  %s254_s15 = scalar_select %p253_p10, %s1219_s25, 1 }
  0x16   : > { %1798 = vst [vmem:[#allocation8_spill] sm:$0xff] %v1261_v2  ;;  %v1301_v9 = vld [vmem:[%s1778_s1 + $0x48] sm:$0xff]  ;;  %v1306_v10 = vld [vmem:[%s1778_s1 + $0x50] sm:$0xff]  ;;  %v1311_v11 = vld [vmem:[%s1778_s1 + $0x58] sm:$0xff]  ;;  %s1544_s19 = scalar_lea.vmem [#allocation3], %s1265_s16 }
  0x17   : > { %1799 = vst [vmem:[#allocation9_spill] sm:$0xff] %v1270_v3  ;;  %v1316_v12 = vld [vmem:[%s1778_s1 + $0x60] sm:$0xff]  ;;  %v1321_v13 = vld [vmem:[%s1778_s1 + $0x68] sm:$0xff]  ;;  %v1326_v14 = vld [vmem:[%s1778_s1 + $0x70] sm:$0xff]  ;;  %s981_s17 = smul.u32 480, %s254_s15  ;;  %s929_s18 = sshll.u32 %s254_s15, 6 }
  0x18   : > { %1800 = vst [vmem:[#allocation10_spill] sm:$0xff] %v1275_v4  ;;  %v1331_v15 = vld [vmem:[%s1778_s1 + $0x78] sm:$0xff]  ;;  %v1336_v16 = vld [vmem:[%s1778_s1 + $0x80] sm:$0xff]  ;;  %v1341_v17 = vld [vmem:[%s1778_s1 + $0x88] sm:$0xff]  ;;  %s1346_s13 = scalar_lea.vmem %s1783_s6, %s929_s18 }
  0x19   : > { %1801 = vst [vmem:[#allocation11_spill] sm:$0xff] %v1280_v5  ;;  %v1351_v18 = vld [vmem:[%s1779_s2] sm:$0x1]  ;;  %v1361_v20 = vld [vmem:[%s1780_s3 + $0x8] sm:$0xff]  ;;  %s1366_s18 = scalar_lea.vmem %s1777_s0, %s981_s17  ;;  %v1371_v21 = vld [vmem:[%s1780_s3 + $0x10] sm:$0xff] }
  0x1a   : > { %1802 = vst [vmem:[#allocation12_spill] sm:$0xff] %v1285_v6  ;;  %v1356_v19 = vld [vmem:[%s1780_s3] sm:$0xff]  ;;  %v1376_v22 = vld [vmem:[%s1780_s3 + $0x18] sm:$0xff]  ;;  %v1386_v24 = vld [vmem:[%s1780_s3 + $0x28] sm:$0xff] }
  0x1b   : > { %1803 = vst [vmem:[#allocation13_spill] sm:$0xff] %v1290_v7  ;;  %v1381_v23 = vld [vmem:[%s1780_s3 + $0x20] sm:$0xff]  ;;  %v1391_v25 = vld [vmem:[%s1780_s3 + $0x30] sm:$0xff]  ;;  %v1396_v26 = vld [vmem:[%s1780_s3 + $0x38] sm:$0xff] }
  0x1c   : > { %1804 = vst [vmem:[#allocation14_spill] sm:$0xff] %v1295_v8  ;;  %v1401_v27 = vld [vmem:[%s1780_s3 + $0x40] sm:$0xff]  ;;  %v1406_v28 = vld [vmem:[%s1780_s3 + $0x48] sm:$0xff]  ;;  %v1411_v29 = vld [vmem:[%s1780_s3 + $0x50] sm:$0xff] }
  0x1d   : > { %1805 = vst [vmem:[#allocation15_spill] sm:$0xff] %v1301_v9  ;;  %v1416_v30 = vld [vmem:[%s1780_s3 + $0x58] sm:$0xff]  ;;  %v1421_v31 = vld [vmem:[%s1780_s3 + $0x60] sm:$0xff]  ;;  %v1426_v32 = vld [vmem:[%s1780_s3 + $0x68] sm:$0xff] }
  0x1e   : > { %v1431_v33 = vld [vmem:[%s1780_s3 + $0x70] sm:$0xff]  ;;  %v1436_v34 = vld [vmem:[%s1780_s3 + $0x78] sm:$0xff]  ;;  %v1441_v35 = vld [vmem:[%s1780_s3 + $0x80] sm:$0xff] }
  0x1f   : > { %v1446_v36 = vld [vmem:[%s1780_s3 + $0x88] sm:$0xff]  ;;  %v1451_v37 = vld [vmem:[%s1780_s3 + $0x90] sm:$0xff]  ;;  %v1456_v38 = vld [vmem:[%s1780_s3 + $0x98] sm:$0xff] }
  0x20   : > { %v1461_v39 = vld [vmem:[%s1780_s3 + $0xa0] sm:$0xff]  ;;  %v1466_v40 = vld [vmem:[%s1780_s3 + $0xa8] sm:$0xff]  ;;  %v1471_v41 = vld [vmem:[%s1780_s3 + $0xb0] sm:$0xff] }
  0x21   : > { %v1476_v42 = vld [vmem:[%s1780_s3 + $0xb8] sm:$0xff]  ;;  %v1481_v43 = vld [vmem:[%s1780_s3 + $0xc0] sm:$0xff]  ;;  %v1486_v44 = vld [vmem:[%s1780_s3 + $0xc8] sm:$0xff] }
  0x22   : > { %v1491_v45 = vld [vmem:[%s1780_s3 + $0xd0] sm:$0xff]  ;;  %v1496_v46 = vld [vmem:[%s1780_s3 + $0xd8] sm:$0xff]  ;;  %v1501_v47 = vld [vmem:[%s1780_s3 + $0xe0] sm:$0xff] }
  0x23   : > { %v1506_v48 = vld [vmem:[%s1780_s3 + $0xe8] sm:$0xff]  ;;  %v1511_v49 = vld [vmem:[%s1780_s3 + $0xf0] sm:$0xff]  ;;  %v1516_v50 = vld [vmem:[%s1780_s3 + $0xf8] sm:$0xff] }
  0x24   : > { %v1521_v51 = vld [vmem:[%s1780_s3 + $0x100] sm:$0xff]  ;;  %v1526_v52 = vld [vmem:[%s1780_s3 + $0x108] sm:$0xff]  ;;  %v1531_v53 = vld [vmem:[%s1780_s3 + $0x110] sm:$0xff] }
  0x25   : > { %v1536_v54 = vld [vmem:[%s1780_s3 + $0x118] sm:$0xff]  ;;  %v1541_v55 = vld [vmem:[%s1781_s4] sm:$0x1] }
  0x26 LB: >> { %v1806_v9 = vld [vmem:[#allocation15_spill] sm:$0xff]  ;;  %v1807_v8 = vld [vmem:[#allocation14_spill] sm:$0xff]  ;;  %v1808_v7 = vld [vmem:[#allocation13_spill] sm:$0xff]  ;;  %933 = vmatpush.msra.mxu2 %v1331_v15  ;;  %934 = vmatpush.msra.mxu3 %v1331_v15  ;;  %s325_s16 = smul.u32 24, %s1143_s20  ;;  %s1153_s28 = smov 16   ;;  %vm366_vm0 = vcmask 130048   ;;  %s1143_s20 = sphi %s1546_s20, %s324_s20  }
  0x27   : >> { %v1809_v6 = vld [vmem:[#allocation12_spill] sm:$0xff]  ;;  %v1810_v0 = vld [vmem:[#allocation6_spill] sm:$0xff]  ;;  %v1811_v5 = vld [vmem:[#allocation11_spill] sm:$0xff]  ;;  %424 = vmatpush.msra.mxu0 %v1331_v15  ;;  %464 = vmatpush.msra.mxu1 %v1341_v17  ;;  %s1154_s17 = smov 32   ;;  %vm370_vm1 = vcmask 261120   ;;  %vm392_vm2 = vcmask 1045504  }
  0x28   : >> { %v1812_v4 = vld [vmem:[#allocation10_spill] sm:$0xff]  ;;  %v1813_v1 = vld [vmem:[#allocation7_spill] sm:$0xff]  ;;  %v1814_v3 = vld [vmem:[#allocation9_spill] sm:$0xff]  ;;  %935 = vmatpush.msra.mxu2 %v1326_v14  ;;  %936 = vmatpush.msra.mxu3 %v1326_v14  ;;  %s1563_s26 = scalar_lea.vmem %s1366_s18, %s325_s16  ;;  %vm377_vm3 = vcmask 1046528   ;;  %s1155_s29 = smov 96   ;;  %vm407_vm4 = vcmask 392192  }
  0x29   : >> { %v1815_v2 = vld [vmem:[#allocation8_spill] sm:$0xff]  ;;  %425 = vmatpush.msra.mxu0 %v1326_v14  ;;  %465 = vmatpush.msra.mxu1 %v1336_v16  ;;  %v895_v56 = vld [vmem:[%s1563_s26 + $0x18] sm:$0xff]  ;;  %v898_v57 = vld [vmem:[%s1563_s26 + $0x30] sm:$0xff]  ;;  %s1156_s10 = smov 48   ;;  %vm411_vm5 = vcmask 785408   ;;  %s479_s11 = scalar_lea.vmem [#allocation2], %s325_s16 }
  0x2a   : >> { %937 = vmatpush.msra.mxu2 %v1321_v13  ;;  %938 = vmatpush.msra.mxu3 %v1321_v13  ;;  %v897_v58 = vld [vmem:[%s1563_s26 + $0x28] sm:$0xf]  ;;  %v896_v59 = vld [vmem:[%s1563_s26 + $0x20] sm:$0xff]  ;;  %v899_v60 = vld [vmem:[%s1563_s26 + $0x38] sm:$0xff]  ;;  %vm482_vm6 = vcmask 254976   ;;  %s324_s20 = sadd.s32 1, %s1143_s20  }
  0x2b   : >> { %426 = vmatpush.msra.mxu0 %v1321_v13  ;;  %345 = vrot.lane.b32.xlu0 %v895_v56, %s1153_s28  ;;  %v900_v61 = vld [vmem:[%s1563_s26 + $0x40] sm:$0xf]  ;;  %p321_p11 = scmp.ge.s32.totalorder %s324_s20, 18  }
  0x2c   : >> { %357 = vrot.lane.b32.xlu1 %v898_v57, %s1154_s17  ;;  %349 = vrot.lane.b32.xlu2 %v897_v58, %s1153_s28  ;;  %v329_v57 = vld [vmem:[%s1563_s26 + $0x10] sm:$0xf]  ;;  %v327_v58 = vld [vmem:[%s1563_s26] sm:$0xff]  ;;  %s1640_s12 = smov (%p321_p11), 0  }
  0x2d   : >> { %939 = vmatpush.msra.mxu2 %v1316_v12  ;;  %940 = vmatpush.msra.mxu3 %v1316_v12 }
  0x2e   : >> { %427 = vmatpush.msra.mxu0 %v1316_v12 }
  0x2f   : >> { %941 = vmatpush.msra.mxu2 %v1311_v11  ;;  %942 = vmatpush.msra.mxu3 %v1311_v11 }
  0x30   : >> { %428 = vmatpush.msra.mxu0 %v1311_v11 }
  0x31   : >> { %943 = vmatpush.msra.mxu2 %v1306_v10  ;;  %944 = vmatpush.msra.mxu3 %v1306_v10 }
  0x32   : >> { %429 = vmatpush.msra.mxu0 %v1306_v10 }
  0x33   : >> { %945 = vmatpush.msra.mxu2 %v1806_v9  ;;  %347 = vrot.lane.b32.xlu0 %v896_v59, %s1153_s28 }
  0x34   : >> { %359 = vrot.lane.b32.xlu1 %v899_v60, %s1154_s17  ;;  %361 = vrot.lane.b32.xlu2 %v900_v61, %s1154_s17 }
  0x35   : >> { %947 = vmatpush.msra.mxu2 %v1807_v8  ;;  %946 = vmatpush.msra.mxu3 %v1806_v9 }
  0x36   : >> { %430 = vmatpush.msra.mxu0 %v1806_v9 }
  0x37   : >> { %949 = vmatpush.msra.mxu2 %v1808_v7  ;;  %948 = vmatpush.msra.mxu3 %v1807_v8 }
  0x38   : >> { %431 = vmatpush.msra.mxu0 %v1807_v8 }
  0x39   : >> { %951 = vmatpush.msra.mxu2 %v1809_v6  ;;  %950 = vmatpush.msra.mxu3 %v1808_v7 }
  0x3a   : >> { %432 = vmatpush.msra.mxu0 %v1808_v7 }
  0x3b   : >> { %953 = vmatpush.msra.mxu2 %v1811_v5  ;;  %952 = vmatpush.msra.mxu3 %v1809_v6 }
  0x3c   : >> { %433 = vmatpush.msra.mxu0 %v1809_v6 }
  0x3d   : >> { %955 = vmatpush.msra.mxu2 %v1812_v4  ;;  %954 = vmatpush.msra.mxu3 %v1811_v5 }
  0x3e   : >> { %434 = vmatpush.msra.mxu0 %v1811_v5 }
  0x3f   : >> { %957 = vmatpush.msra.mxu2 %v1814_v3  ;;  %956 = vmatpush.msra.mxu3 %v1812_v4 }
  0x40   : >> { %435 = vmatpush.msra.mxu0 %v1812_v4 }
  0x41   : >> { %959 = vmatpush.msra.mxu2 %v1815_v2  ;;  %958 = vmatpush.msra.mxu3 %v1814_v3 }
  0x42   : >> { %436 = vmatpush.msra.mxu0 %v1814_v3 }
  0x43   : >> { %961 = vmatpush.msra.mxu2 %v1813_v1  ;;  %960 = vmatpush.msra.mxu3 %v1815_v2 }
  0x44   : >> { %437 = vmatpush.msra.mxu0 %v1815_v2  ;;  %v328_v2 = vld [vmem:[%s1563_s26 + $0x8] sm:$0xff] }
  0x45   : >> { %963 = vmatpush.msra.mxu2 %v1810_v0  ;;  %962 = vmatpush.msra.mxu3 %v1813_v1 }
  0x46   : >> { %438 = vmatpush.msra.mxu0 %v1813_v1 }
  0x47   : >> { %964 = vmatpush.msra.mxu3 %v1810_v0 }
  0x48   : >> { %439 = vmatpush.msra.mxu0 %v1810_v0 }
  0x86   : >> { %v350_v62 = vpop.permute.xlu2 %349 }
  0x87   : >> { %v369_v59 = vsel %vm366_vm0, %v329_v57, %v350_v62 }
  0x8e   : >> { %v362_v60 = vpop.permute.xlu2 %361 }
  0x8f   : >> { %v373_v3 = vsel %vm370_vm1, %v369_v59, %v362_v60 }
  0x90   : >> { %v381_v6 = vrot.slane %v373_v3, 1  ;;  %v396_v62 = vrot.slane %v373_v3, 2 }
  0x9d   : >> { %v346_v63 = vpop.permute.xlu0 %345 }
  0x9e   : >> { %v358_v56 = vpop.permute.xlu1 %357  ;;  %v367_v61 = vsel %vm366_vm0, %v327_v58, %v346_v63 }
  0x9f   : >> { %v371_v1 = vsel %vm370_vm1, %v367_v61, %v358_v56 }
  0xa0   : >> { %v393_v8 = vrot.slane %v371_v1, 2 }
  0xa5   : >> { %v348_v4 = vpop.permute.xlu0 %347 }
  0xa6   : >> { %v360_v5 = vpop.permute.xlu1 %359  ;;  %v368_v0 = vsel %vm366_vm0, %v328_v2, %v348_v4  ;;  %v378_v2 = vrot.slane %v371_v1, 1 }
  0xa7   : >> { %v372_v7 = vsel %vm370_vm1, %v368_v0, %v360_v5 }
  0xa8   : >> { %v379_v57 = vrot.slane %v372_v7, 1  ;;  %v394_v9 = vrot.slane %v372_v7, 2 }
  0xaa   : >> { %v397_v63 = vsel %vm392_vm2, %v394_v9, %v396_v62  ;;  %v395_v58 = vsel %vm392_vm2, %v393_v8, %v394_v9  ;;  %v382_v59 = vsel %vm377_vm3, %v379_v57, %v381_v6  ;;  %v380_v0 = vsel %vm377_vm3, %v378_v2, %v379_v57 }
  0xab   : >> { %400 = vrot.lane.b32.xlu2 %v397_v63, %s1155_s29  ;;  %398 = vrot.lane.b32.xlu0 %v395_v58, %s1155_s29  ;;  %v1055_v56 = vpack.i.bf16 %v381_v6, %v382_v59 }
  0xad   : >> { %1056 = vrot.lane.b32.xlu1 %v1055_v56, %s1156_s10 }
  0xb3   : >> { %402 = vrot.lane.b32.xlu0 %v396_v62, %s1155_s29 }
  0xb5   : >> { %383 = vrot.lane.b32.xlu1 %v380_v0, %s1156_s10  ;;  %v416_v0 = vperm.slane %v1351_v18, 0 }
 0x105   : >> { %v401_v9 = vpop.permute.xlu2 %400 }
 0x11d   : >> { %v399_v4 = vpop.permute.xlu0 %398 }
 0x11e   : >> { %901 = vmatmul.msk.f32.vlgmr.msra.gmra.mxu1 %vm366_vm0, %v399_v4 }
 0x11f   : >> { %v1057_v5 = vpop.permute.xlu1 %1056 }
 0x120   : >> { %v1058_v60 = vunpack.i.l.bf16 %v1057_v5  ;;  %v1059_v8 = vunpack.i.h.bf16 %v1057_v5 }
 0x122   : >> { %v409_v61 = vsel %vm407_vm4, %v372_v7, %v1058_v60  ;;  %v410_v58 = vsel %vm407_vm4, %v373_v3, %v1059_v8 }
 0x123   : >> { %v413_v63 = vsel %vm411_vm5, %v409_v61, %v401_v9 }
 0x124   : >> { %443 = vmatmul.f32.vlgmr.msra.gmra.mxu2 %v413_v63 }
 0x125   : >> { %v403_v6 = vpop.permute.xlu0 %402 }
 0x126   : >> { %902 = vmatmul.msk.f32.gmra.mxu1 %vm366_vm0, %v401_v9  ;;  %v414_v62 = vsel %vm411_vm5, %v410_v58, %v403_v6 }
 0x127   : >> { %446 = vmatmul.f32.vlgmr.msra.gmra.mxu3 %v414_v62  ;;  %v384_v57 = vpop.permute.xlu1 %383 }
 0x128   : >> { %v408_v59 = vsel %vm407_vm4, %v371_v1, %v384_v57 }
 0x129   : >> { %v412_v56 = vsel %vm411_vm5, %v408_v59, %v399_v4 }
 0x12a   : >> { %440 = vmatmul.f32.vlgmr.msra.gmra.mxu0 %v412_v56 }
 0x12e   : >> { %903 = vmatmul.msk.f32.gmra.mxu1 %vm366_vm0, %v403_v6 }
 0x19b   : >> { %v467_v2 = vpop.f32.mrf.mxu1 }
 0x1a3   : >> { %v470_v7 = vpop.f32.mrf.mxu1 }
 0x1a7   : >> { %v441_v5 = vpop.f32.mrf.mxu0  ;;  %v444_v60 = vpop.f32.mrf.mxu2 }
 0x1a8   : >> { %v442_v3 = vadd.f32 %v441_v5, %v416_v0  ;;  %v445_v8 = vadd.f32 %v444_v60, %v416_v0 }
 0x1aa   : >> { %v468_v9 = vadd.f32 %v467_v2, %v442_v3  ;;  %v471_v61 = vadd.f32 %v470_v7, %v445_v8  ;;  %v447_v63 = vpop.f32.mrf.mxu3 }
 0x1ab   : >> { %v448_v58 = vadd.f32 %v447_v63, %v416_v0  ;;  %v473_v62 = vpop.f32.mrf.mxu1 }
 0x1ac   : >> { %v476_v1 = vmax.f32 %v468_v9, 0.0  ;;  %v477_v57 = vmax.f32 %v471_v61, 0.0 }
 0x1ad   : >> { %v474_v4 = vadd.f32 %v473_v62, %v448_v58  ;;  %323 = sbr.rel (!%p321_p11) target bundleno = 38 (0x26), region = 119 }
 0x1ae   : >> { %480 = vst.msk [vmem:[%s479_s11] sm:$0xff] %vm370_vm1, %v476_v1 }
 0x1af   : >> { %481 = vst.msk [vmem:[%s479_s11 + $0x8] sm:$0xff] %vm370_vm1, %v477_v57  ;;  %v478_v6 = vmax.f32 %v474_v4, 0.0 }
 0x1b1   : >> { %483 = vst.msk [vmem:[%s479_s11 + $0x10] sm:$0x3] %vm482_vm6, %v478_v6 }
 0x1b2 LB: >> { %578 = vmatpush.msra.mxu0 %v1436_v34  ;;  %965 = vmatpush.msra.mxu3 %v1436_v34  ;;  %s490_s15 = smul.u32 24, %s1147_s12  ;;  %s1157_s14 = smov 32   ;;  %vm535_vm7 = vcmask 523264   ;;  %s1147_s12 = sphi %s1640_s12, %s489_s12  }
 0x1b3   : >> { %601 = vmatpush.msra.mxu1 %v1516_v50  ;;  %636 = vmatpush.msra.mxu2 %v1536_v54  ;;  %s1158_s20 = smov 64   ;;  %s1159_s16 = smov 96  }
 0x1b4   : >> { %579 = vmatpush.msra.mxu0 %v1431_v33  ;;  %966 = vmatpush.msra.mxu3 %v1431_v33  ;;  %s1656_s18 = scalar_lea.vmem [#allocation2], %s490_s15  ;;  %s912_s26 = sshll.u32 %s1147_s12, 4 }
 0x1b5   : >> { %602 = vmatpush.msra.mxu1 %v1511_v49  ;;  %637 = vmatpush.msra.mxu2 %v1531_v53  ;;  %s648_s28 = scalar_lea.vmem %s1544_s19, %s912_s26 [#allocation3]  ;;  %s489_s12 = sadd.s32 1, %s1147_s12  }
 0x1b6   : >> { %580 = vmatpush.msra.mxu0 %v1426_v32  ;;  %967 = vmatpush.msra.mxu3 %v1426_v32  ;;  %p486_p12 = scmp.ge.s32.totalorder %s489_s12, 16  }
 0x1b7   : >> { %603 = vmatpush.msra.mxu1 %v1506_v48  ;;  %638 = vmatpush.msra.mxu2 %v1526_v52  ;;  %s1149_s17 = smov (%p486_p12), 0  }
 0x1b8   : >> { %v904_v10 = vld [vmem:[%s1656_s18 + $0x18] sm:$0xff]  ;;  %v907_v11 = vld [vmem:[%s1656_s18 + $0x30] sm:$0xff]  ;;  %v906_v12 = vld [vmem:[%s1656_s18 + $0x28] sm:$0x3]  ;;  %581 = vmatpush.msra.mxu0 %v1421_v31  ;;  %968 = vmatpush.msra.mxu3 %v1421_v31 }
 0x1b9   : >> { %510 = vrot.lane.b32.xlu0 %v904_v10, %s1157_s14  ;;  %522 = vrot.lane.b32.xlu1 %v907_v11, %s1158_s20  ;;  %v905_v13 = vld [vmem:[%s1656_s18 + $0x20] sm:$0xff]  ;;  %v908_v14 = vld [vmem:[%s1656_s18 + $0x38] sm:$0xff] }
 0x1ba   : >> { %514 = vrot.lane.b32.xlu2 %v906_v12, %s1157_s14  ;;  %604 = vmatpush.msra.mxu1 %v1501_v47  ;;  %v909_v15 = vld [vmem:[%s1656_s18 + $0x40] sm:$0x3]  ;;  %v494_v59 = vld [vmem:[%s1656_s18 + $0x10] sm:$0x3]  ;;  %v493_v5 = vld [vmem:[%s1656_s18 + $0x8] sm:$0xff] }
 0x1bb   : >> { %582 = vmatpush.msra.mxu0 %v1416_v30  ;;  %639 = vmatpush.msra.mxu2 %v1521_v51  ;;  %v492_v56 = vld [vmem:[%s1656_s18] sm:$0xff] }
 0x1bc   : >> { %969 = vmatpush.msra.mxu3 %v1416_v30  ;;  %605 = vmatpush.msra.mxu1 %v1496_v46 }
 0x1bd   : >> { %583 = vmatpush.msra.mxu0 %v1411_v29 }
 0x1be   : >> { %970 = vmatpush.msra.mxu3 %v1411_v29  ;;  %606 = vmatpush.msra.mxu1 %v1491_v45 }
 0x1bf   : >> { %584 = vmatpush.msra.mxu0 %v1406_v28 }
 0x1c0   : >> { %971 = vmatpush.msra.mxu3 %v1406_v28  ;;  %607 = vmatpush.msra.mxu1 %v1486_v44 }
 0x1c1   : >> { %512 = vrot.lane.b32.xlu0 %v905_v13, %s1157_s14  ;;  %524 = vrot.lane.b32.xlu1 %v908_v14, %s1158_s20 }
 0x1c2   : >> { %526 = vrot.lane.b32.xlu2 %v909_v15, %s1158_s20  ;;  %585 = vmatpush.msra.mxu0 %v1401_v27 }
 0x1c3   : >> { %972 = vmatpush.msra.mxu3 %v1401_v27  ;;  %608 = vmatpush.msra.mxu1 %v1481_v43 }
 0x1c4   : >> { %586 = vmatpush.msra.mxu0 %v1396_v26 }
 0x1c5   : >> { %973 = vmatpush.msra.mxu3 %v1396_v26  ;;  %609 = vmatpush.msra.mxu1 %v1476_v42 }
 0x1c6   : >> { %587 = vmatpush.msra.mxu0 %v1391_v25 }
 0x1c7   : >> { %974 = vmatpush.msra.mxu3 %v1391_v25  ;;  %610 = vmatpush.msra.mxu1 %v1471_v41 }
 0x1c8   : >> { %588 = vmatpush.msra.mxu0 %v1386_v24 }
 0x1c9   : >> { %975 = vmatpush.msra.mxu3 %v1386_v24  ;;  %611 = vmatpush.msra.mxu1 %v1466_v40 }
 0x1ca   : >> { %589 = vmatpush.msra.mxu0 %v1381_v23 }
 0x1cb   : >> { %976 = vmatpush.msra.mxu3 %v1381_v23  ;;  %612 = vmatpush.msra.mxu1 %v1461_v39 }
 0x1cc   : >> { %590 = vmatpush.msra.mxu0 %v1376_v22 }
 0x1cd   : >> { %977 = vmatpush.msra.mxu3 %v1376_v22  ;;  %613 = vmatpush.msra.mxu1 %v1456_v38 }
 0x1ce   : >> { %591 = vmatpush.msra.mxu0 %v1371_v21 }
 0x1cf   : >> { %978 = vmatpush.msra.mxu3 %v1371_v21  ;;  %614 = vmatpush.msra.mxu1 %v1451_v37 }
 0x1d0   : >> { %592 = vmatpush.msra.mxu0 %v1361_v20 }
 0x1d1   : >> { %979 = vmatpush.msra.mxu3 %v1361_v20  ;;  %615 = vmatpush.msra.mxu1 %v1446_v36 }
 0x1d2   : >> { %593 = vmatpush.msra.mxu0 %v1356_v19 }
 0x1d3   : >> { %980 = vmatpush.msra.mxu3 %v1356_v19  ;;  %616 = vmatpush.msra.mxu1 %v1441_v35 }
 0x214   : >> { %v515_v16 = vpop.permute.xlu2 %514 }
 0x215   : >> { %v534_v2 = vsel %vm370_vm1, %v494_v59, %v515_v16 }
 0x21c   : >> { %v527_v7 = vpop.permute.xlu2 %526 }
 0x21d   : >> { %v538_v60 = vsel %vm535_vm7, %v534_v2, %v527_v7 }
 0x21e   : >> { %v546_v63 = vrot.slane %v538_v60, 1  ;;  %v558_v58 = vrot.slane %v538_v60, 2 }
 0x22b   : >> { %v511_v17 = vpop.permute.xlu0 %510  ;;  %v523_v18 = vpop.permute.xlu1 %522 }
 0x22c   : >> { %v532_v0 = vsel %vm370_vm1, %v492_v56, %v511_v17 }
 0x22d   : >> { %v536_v3 = vsel %vm535_vm7, %v532_v0, %v523_v18 }
 0x22e   : >> { %v543_v1 = vrot.slane %v536_v3, 1  ;;  %v555_v6 = vrot.slane %v536_v3, 2 }
 0x233   : >> { %v513_v8 = vpop.permute.xlu0 %512  ;;  %v525_v9 = vpop.permute.xlu1 %524 }
 0x234   : >> { %v533_v61 = vsel %vm370_vm1, %v493_v5, %v513_v8  ;;  %v572_v5 = vperm.slane %v1541_v55, 0 }
 0x235   : >> { %v537_v62 = vsel %vm535_vm7, %v533_v61, %v525_v9 }
 0x236   : >> { %v544_v57 = vrot.slane %v537_v62, 1  ;;  %v556_v4 = vrot.slane %v537_v62, 2 }
 0x238   : >> { %v559_v10 = vsel %vm392_vm2, %v556_v4, %v558_v58  ;;  %v557_v11 = vsel %vm392_vm2, %v555_v6, %v556_v4  ;;  %v545_v12 = vsel %vm377_vm3, %v543_v1, %v544_v57  ;;  %v547_v13 = vsel %vm377_vm3, %v544_v57, %v546_v63 }
 0x239   : >> { %562 = vrot.lane.b32.xlu2 %v559_v10, %s1158_s20  ;;  %560 = vrot.lane.b32.xlu0 %v557_v11, %s1158_s20  ;;  %v1060_v14 = vpack.i.bf16 %v547_v13, %v545_v12  ;;  %v651_v10 = vlaneseq (%p486_p12) }
 0x23b   : >> { %1061 = vrot.lane.b32.xlu1 %v1060_v14, %s1159_s16  ;;  %v652_v11 = vand.u32 (%p486_p12), 127, %v651_v10  ;;  %v654_v12 = vshrl.u32 (%p486_p12), %v651_v10, 7 }
 0x23d   : > { %v655_v13 = vmul.u32 (%p486_p12), 2, %v654_v12 }
 0x23f   : > { %vm656_vm8 = vcmp.eq.s32.totalorder (%p486_p12), %v652_v11, %v655_v13  ;;  %v659_v14 = vadd.s32 (%p486_p12), 1, %v655_v13 }
 0x241   : > { %vm660_vm9 = vcmp.eq.s32.totalorder (%p486_p12), %v652_v11, %v659_v14 }
 0x293   : >> { %v563_v7 = vpop.permute.xlu2 %562 }
 0x2ab   : >> { %v561_v15 = vpop.permute.xlu0 %560 }
 0x2ac   : >> { %910 = vmatmul.msk.f32.vlgmr.msra.gmra.mxu2 %vm370_vm1, %v561_v15 }
 0x2ad   : >> { %v1062_v16 = vpop.permute.xlu1 %1061 }
 0x2ae   : >> { %v1064_v17 = vunpack.i.h.bf16 %v1062_v16  ;;  %v1063_v18 = vunpack.i.l.bf16 %v1062_v16 }
 0x2b0   : >> { %v567_v59 = vsel %vm411_vm5, %v536_v3, %v1063_v18  ;;  %v568_v56 = vsel %vm411_vm5, %v537_v62, %v1064_v17  ;;  %v569_v2 = vsel %vm535_vm7, %v1063_v18, %v561_v15  ;;  %v570_v0 = vsel %vm535_vm7, %v1064_v17, %v563_v7 }
 0x2b1   : >> { %594 = vmatmul.f32.vlgmr.msra.gmra.mxu0 %v567_v59  ;;  %597 = vmatmul.f32.vlgmr.msra.gmra.mxu3 %v568_v56  ;;  %v1160_v15 = vmov (%p486_p12), 0.0  }
 0x2b2   : >> { %617 = vmatmul.f32.vlgmr.msra.gmra.mxu1 %v569_v2  ;;  %v913_v16 = vsel (%p486_p12), %vm656_vm8, 1.0, %v1160_v15  ;;  %v914_v17 = vsel (%p486_p12), %vm660_vm9, 1.0, %v1160_v15 }
 0x2b4   : >> { %911 = vmatmul.msk.f32.gmra.mxu2 %vm370_vm1, %v563_v7 }
 0x2ba   : >> { %620 = vmatmul.f32.gmra.mxu1 %v570_v0 }
 0x32e   : >> { %v595_v60 = vpop.f32.mrf.mxu0 }
 0x32f   : >> { %v596_v8 = vadd.f32 %v595_v60, %v572_v5  ;;  %v618_v9 = vpop.f32.mrf.mxu1  ;;  %v641_v3 = vpop.f32.mrf.mxu2 }
 0x331   : >> { %v619_v61 = vadd.f32 %v618_v9, %v596_v8 }
 0x333   : >> { %v642_v63 = vadd.f32 %v641_v3, %v619_v61 }
 0x334   : >> { %v598_v58 = vpop.f32.mrf.mxu3 }
 0x335   : >> { %649 = vst.msk [vmem:[%s648_s28] sm:$0xff] %vm370_vm1, %v642_v63  ;;  %v599_v62 = vadd.f32 %v598_v58, %v572_v5 }
 0x337   : >> { %v621_v1 = vpop.f32.mrf.mxu1  ;;  %v644_v57 = vpop.f32.mrf.mxu2 }
 0x338   : >> { %v622_v4 = vadd.f32 %v621_v1, %v599_v62  ;;  %488 = sbr.rel (!%p486_p12) target bundleno = 434 (0x1b2), region = 130 }
 0x33a   : >> { %v645_v6 = vadd.f32 %v644_v57, %v622_v4 }
 0x33c   : >> { %650 = vst.msk [vmem:[%s648_s28 + $0x8] sm:$0xff] %vm370_vm1, %v645_v6 }
 0x33d LB: >> { %s930_s29 = sshll.u32 %s1151_s17, 5  ;;  %s923_s11 = sshll.u32 %s1151_s17, 3  ;;  %s1151_s17 = sphi %s1149_s17, %s668_s17  }
 0x33e   : >> { %s671_s10 = scalar_lea.vmem %s1544_s19, %s930_s29 [#allocation3]  ;;  %s730_s12 = scalar_lea.vmem %s1346_s13, %s923_s11 }
 0x33f   : >> { %s668_s17 = sadd.s32 1, %s1151_s17  }
 0x340   : >> { %p665_p13 = scmp.ge.s32.totalorder %s668_s17, 8  }
 0x341   : > { %s932_s15 = sshll.u32 (%p665_p13), %s1219_s25, 8  ;;  %s751_s16 = sshll.u32 (%p665_p13), %s1544_s19, 4  ;;  %s752_s16 = int_to_ptr.vmem [resolvable:$true] %s751_s16 }
 0x342   : > { %s750_s20 = scalar_lea.hbm (%p665_p13), %s1782_s5, %s932_s15  ;;  %s734_s28 = scalar_lea.sflag (%p665_p13), [#allocation4], %s243_s9 }
 0x343   : >> { %v673_v18 = vld [vmem:[%s671_s10 + $0x8] sm:$0xff]  ;;  %v920_v59 = vld [vmem:[%s671_s10 + $0x18] sm:$0xff]  ;;  %v672_v19 = vld [vmem:[%s671_s10] sm:$0xff]  ;;  %s753_s26 = sshll.u32 (%p665_p13), %s750_s20, 4  ;;  %s1085_s25 = scalar_lea.hbm (%p665_p13), %s1782_s5, 512  ;;  %s754_s26 = int_to_ptr.hbm [resolvable:$true] %s753_s26 }
 0x344   : >> { %v680_v20 = vmax.f32 %v673_v18, %v920_v59  ;;  %v919_v21 = vld [vmem:[%s671_s10 + $0x10] sm:$0xff]  ;;  %s1079_s29 = sshra.s32 (%p665_p13), %s754_s26, 4  ;;  %s1080_s29 = int_to_ptr.hbm [resolvable:$true] %s1079_s29 }
 0x345   : >> { %v679_v22 = vmax.f32 %v672_v19, %v919_v21  ;;  %s1081_s10 = scalar_lea.hbm (%p665_p13), %s1080_s29, 256  ;;  %p1086_p3 = scmp.lt.s32.totalorder (%p665_p13), %s1080_s29, %s1782_s5 }
 0x346   : >> { %699 = vmatpush.msra.mxu0 %v680_v20  ;;  %722 = vmatpush.msra.mxu1 %v680_v20  ;;  %p1082_p0 = scmp.ne.s32.totalorder (%p665_p13), %s1080_s29, %s1081_s10  ;;  %p1087_p4 = scmp.lt.s32.totalorder (%p665_p13), %s1085_s25, %s1081_s10 }
 0x348   : >> { %700 = vmatpush.msra.mxu0 %v679_v22  ;;  %723 = vmatpush.msra.mxu1 %v679_v22  ;;  %p1083_p1 = pnand (%p665_p13), %p1082_p0, %p1236_p5  ;;  %p1088_p7 = por (%p665_p13), %p1087_p4, %p1086_p3 }
 0x349   : >> { %921 = vmatmul.msk.f32.vlgmr.msra.gmra.mxu0 %vm366_vm0, %v913_v16  ;;  %922 = vmatmul.msk.f32.vlgmr.msra.gmra.mxu1 %vm366_vm0, %v914_v17 }
 0x34a   : > { %p1084_p2 = pneg (%p665_p13), %p1083_p1 }
 0x34c   : > { %p1089_p8 = pnand (%p665_p13), %p1088_p7, %p1084_p2 }
 0x3c5   : > { %667 = sbr.rel (!%p665_p13) target bundleno = 829 (0x33d), region = 141 }
 0x3c6   : >> { %v702_v23 = vpop.f32.mrf.mxu0  ;;  %v725_v24 = vpop.f32.mrf.mxu1 }
 0x3c7   : >> { %v728_v25 = vmax.f32 %v702_v23, %v725_v24 }
 0x3c9   : >> { %732 = vst.msk [vmem:[%s730_s12] sm:$0xff] %vm370_vm1, %v728_v25 }
 0x3ca   : > { %1092 = shalt.err (!%p1089_p8)
}
 0x3cb   : > { %s1161_s9 = smov 128   ;;  %s1162_s19 = smov 8  }
 0x3cc   : > { %982 = dma.vmem_to_hbm [thread:$0]  (%p1236_p5), %s752_s16, 4096, %s754_s26, %s734_s28, %s1161_s9, %s1161_s9, %s1162_s19  }
 0x3cd PF: > { %p988_p9 = scmp.ge.s32.totalorder %s1139_s24, 2  ;;  %s771_s15 = sand.u32 1, %s1127_s21  }
 0x3ce   : > { %s772_s18 = scalar_lea.sflag [#allocation4], %s771_s15 }
 0x3cf   : > { %p985_p10 = pnand %p988_p9, %p1240_p6 }
 0x3d1   : > { %p986_p11 = pneg %p985_p10 }
 0x3d3   : > { %1122 = dma.done.wait (%p986_p11), %s772_s18, 4096  }
 0x3d4   : > { %1124 = vsyncadd (%p986_p11), %s772_s18, 4294963200  ;;  %p17_p12 = scmp.ge.s32.totalorder %s1223_s27, 4   ;;  %s1816_s21 = smov %s1131_s22 }
 0x3d5   : > { %s1817_s22 = smov %s1135_s23  ;;  %s1818_s23 = smov %s1234_s30 }
 0x3d6   : > { %s1819_s24 = smov %s1223_s27  ;;  %19 = sbr.rel (!%p17_p12) target bundleno = 3 (0x3), region = 152 }
 0x3db   :  { %786 = vsyncpa [#allocation4], 1 }
 0x3dc   :  { %788 = vsyncpa [#allocation4 + $0x1], 1 }

// kernel: unet_encoder_forward.3
= control target key start
LH: loop header
LB: loop body
LE: loop exit
PB: predicated region body
PF: predicated region fallthrough
CT: control target
= control target key end

     0   :  { %s1309_s21 = smov 0   ;;  %s1766_s0 = inlined_call_operand.vmem [shape: f32[2,44,44,3], index: 0, kind: input, shape index: {}]   ;;  %s1767_s1 = inlined_call_operand.vmem [shape: f32[27,16], index: 1, kind: input, shape index: {}]   ;;  %s1768_s2 = inlined_call_operand.vmem [shape: f32[1,16], index: 2, kind: input, shape index: {}]   ;;  %s1769_s3 = inlined_call_operand.vmem [shape: f32[144,16], index: 3, kind: input, shape index: {}]   ;;  %s1770_s4 = inlined_call_operand.vmem [shape: f32[1,16], index: 4, kind: input, shape index: {}]   ;;  %s1771_s5 = inlined_call_operand.vmem [shape: f32[2,40,40,16], index: 5, kind: output, shape index: {0}]   ;;  %s1772_s6 = inlined_call_operand.vmem [shape: f32[2,20,20,16], index: 6, kind: output, shape index: {1}]  }
   0x1 LB: > { %s1058_s22 = sadd.s32 4294967295, %s1251_s21   ;;  %p1062_p0 = scmp.ge.s32.totalorder %s1251_s21, 1  ;;  %s1251_s21 = sphi %s1309_s21, %s17_s21  }
   0x2   : > { %p215_p1 = scmp.lt.s32.totalorder %s1251_s21, 3 }
   0x4   : > { %p216_p2 = pnand %p1062_p0, %p215_p1 }
   0x5   : > { %p250_p3 = scmp.lt.s32.totalorder (!%p216_p2), %s1058_s22, 1  ;;  %s1452_s14 = smov (!%p216_p2), 0  }
   0x6   : > { %219 = sbr.rel (%p216_p2) target bundleno = 996 (0x3e4), region = 40 }
   0xb   : > { %v1320_v0 = vld [vmem:[%s1767_s1] sm:$0xff]  ;;  %v1325_v1 = vld [vmem:[%s1767_s1 + $0x8] sm:$0xff]  ;;  %v1330_v2 = vld [vmem:[%s1767_s1 + $0x10] sm:$0xff]  ;;  %s1774_s22 = smov (!%p250_p3, %s1058_s22), 1 }
   0xc   : > { %v1335_v3 = vld [vmem:[%s1767_s1 + $0x18] sm:$0x7]  ;;  %v1340_v4 = vld [vmem:[%s1768_s2] sm:$0x1]  ;;  %v1350_v6 = vld [vmem:[%s1769_s3 + $0x8] sm:$0xff]  ;;  %s1179_s25 = smul.u32 2112, %s1774_s22 }
   0xd   : > { %v1345_v5 = vld [vmem:[%s1769_s3] sm:$0xff]  ;;  %v1355_v7 = vld [vmem:[%s1769_s3 + $0x10] sm:$0xff]  ;;  %v1360_v8 = vld [vmem:[%s1769_s3 + $0x18] sm:$0xff]  ;;  %s1180_s8 = smul.u32 1600, %s1774_s22 }
   0xe   : > { %v1365_v9 = vld [vmem:[%s1769_s3 + $0x20] sm:$0xff]  ;;  %v1370_v10 = vld [vmem:[%s1769_s3 + $0x28] sm:$0xff]  ;;  %v1375_v11 = vld [vmem:[%s1769_s3 + $0x30] sm:$0xff]  ;;  %s1410_s17 = scalar_lea.vmem %s1766_s0, %s1179_s25  ;;  %s1181_s18 = smul.u32 480, %s1774_s22 }
   0xf   : > { %v1380_v12 = vld [vmem:[%s1769_s3 + $0x38] sm:$0xff]  ;;  %v1385_v13 = vld [vmem:[%s1769_s3 + $0x40] sm:$0xff]  ;;  %v1390_v14 = vld [vmem:[%s1769_s3 + $0x48] sm:$0xff]  ;;  %s1430_s25 = scalar_lea.vmem %s1771_s5, %s1180_s8 }
  0x10   : > { %v1395_v15 = vld [vmem:[%s1769_s3 + $0x50] sm:$0xff]  ;;  %v1400_v16 = vld [vmem:[%s1769_s3 + $0x58] sm:$0xff]  ;;  %v1405_v17 = vld [vmem:[%s1769_s3 + $0x60] sm:$0xff]  ;;  %s1450_s8 = scalar_lea.vmem %s1772_s6, %s1181_s18 }
  0x11   : > { %v1415_v18 = vld [vmem:[%s1769_s3 + $0x68] sm:$0xff]  ;;  %v1420_v19 = vld [vmem:[%s1769_s3 + $0x70] sm:$0xff]  ;;  %v1425_v20 = vld [vmem:[%s1769_s3 + $0x78] sm:$0xff] }
  0x12   : > { %v1435_v21 = vld [vmem:[%s1769_s3 + $0x80] sm:$0xff]  ;;  %v1440_v22 = vld [vmem:[%s1769_s3 + $0x88] sm:$0xff] }
  0x13   : > { %v1445_v23 = vld [vmem:[%s1770_s4] sm:$0x1] }
  0x14 LB: >> { %s295_s15 = smul.u32 48, %s1255_s14  ;;  %s1265_s18 = smov 6   ;;  %vm369_vm0 = vcmask 23552   ;;  %vm376_vm1 = vcmask 48128   ;;  %vm389_vm2 = vcmask 1046528   ;;  %vm419_vm3 = vcmask 1045504   ;;  %s1255_s14 = sphi %s1452_s14, %s294_s14  }
  0x15   : >> { %s1266_s19 = smov 3   ;;  %s1267_s20 = smov 18   ;;  %vm485_vm4 = vcmask 1042432   ;;  %vm449_vm5 = vcmask 72704   ;;  %vm466_vm6 = vcmask 220160   ;;  %vm456_vm7 = vcmask 146432  }
  0x16   : >> { %s1461_s16 = scalar_lea.vmem %s1410_s17, %s295_s15  ;;  %s1268_s23 = smov 9   ;;  %1127 = vmatpush.msk.msra.mxu3 %vm485_vm4, %v1335_v3  ;;  %1125 = vmatpush.msk.msra.mxu1 %vm485_vm4, %v1335_v3  ;;  %vm531_vm8 = vcmask 130048   ;;  %vm537_vm9 = vcmask 123904  }
  0x17   : >> { %v1076_v24 = vld [vmem:[%s1461_s16 + $0x80] sm:$0xff]  ;;  %v1070_v25 = vld [vmem:[%s1461_s16 + $0x50] sm:$0xff]  ;;  %v1067_v26 = vld [vmem:[%s1461_s16 + $0x38] sm:$0xff]  ;;  %1126 = vmatpush.msk.msra.mxu2 %vm485_vm4, %v1335_v3  ;;  %1078 = vmatpush.msk.msra.mxu0 %vm485_vm4, %v1335_v3  ;;  %s530_s24 = scalar_lea.vmem [#allocation2], %s295_s15  ;;  %s294_s14 = sadd.s32 1, %s1255_s14  }
  0x18   : >> { %359 = vrot.lane.b32.xlu1 %v1076_v24, %s1265_s18  ;;  %335 = vrot.lane.b32.xlu0 %v1070_v25, %s1266_s19  ;;  %v1077_v27 = vld [vmem:[%s1461_s16 + $0x88] sm:$0xf]  ;;  %v1071_v28 = vld [vmem:[%s1461_s16 + $0x58] sm:$0xf]  ;;  %p291_p4 = scmp.ge.s32.totalorder %s294_s14, 42  }
  0x19   : >> { %329 = vrot.lane.b32.xlu2 %v1067_v26, %s1266_s19  ;;  %v1068_v29 = vld [vmem:[%s1461_s16 + $0x40] sm:$0xff]  ;;  %v1074_v30 = vld [vmem:[%s1461_s16 + $0x70] sm:$0xff]  ;;  %v1073_v31 = vld [vmem:[%s1461_s16 + $0x68] sm:$0xff]  ;;  %1130 = vmatpush.msra.mxu3 %v1330_v2  ;;  %s1580_s26 = smov (%p291_p4), 0  }
  0x1a   : >> { %v1069_v32 = vld [vmem:[%s1461_s16 + $0x48] sm:$0xff]  ;;  %v1075_v33 = vld [vmem:[%s1461_s16 + $0x78] sm:$0xff]  ;;  %v1066_v34 = vld [vmem:[%s1461_s16 + $0x30] sm:$0xff]  ;;  %1128 = vmatpush.msra.mxu1 %v1330_v2  ;;  %1129 = vmatpush.msra.mxu2 %v1330_v2 }
  0x1b   : >> { %v1072_v35 = vld [vmem:[%s1461_s16 + $0x60] sm:$0xff]  ;;  %v302_v42 = vld [vmem:[%s1461_s16 + $0x28] sm:$0xf]  ;;  %v299_v48 = vld [vmem:[%s1461_s16 + $0x10] sm:$0xff]  ;;  %502 = vmatpush.msra.mxu0 %v1330_v2  ;;  %1133 = vmatpush.msra.mxu3 %v1325_v1 }
  0x1c   : >> { %v301_v39 = vld [vmem:[%s1461_s16 + $0x20] sm:$0xff]  ;;  %v298_v52 = vld [vmem:[%s1461_s16 + $0x8] sm:$0xff]  ;;  %v300_v26 = vld [vmem:[%s1461_s16 + $0x18] sm:$0xff]  ;;  %1131 = vmatpush.msra.mxu1 %v1325_v1  ;;  %1132 = vmatpush.msra.mxu2 %v1325_v1 }
  0x1d   : >> { %503 = vmatpush.msra.mxu0 %v1325_v1  ;;  %1136 = vmatpush.msra.mxu3 %v1320_v0 }
  0x1e   : >> { %1134 = vmatpush.msra.mxu1 %v1320_v0  ;;  %1135 = vmatpush.msra.mxu2 %v1320_v0 }
  0x1f   : >> { %504 = vmatpush.msra.mxu0 %v1320_v0 }
  0x20   : >> { %361 = vrot.lane.b32.xlu1 %v1077_v27, %s1265_s18  ;;  %337 = vrot.lane.b32.xlu0 %v1071_v28, %s1266_s19 }
  0x21   : >> { %331 = vrot.lane.b32.xlu2 %v1068_v29, %s1266_s19 }
  0x28   : >> { %355 = vrot.lane.b32.xlu1 %v1074_v30, %s1265_s18  ;;  %353 = vrot.lane.b32.xlu0 %v1073_v31, %s1265_s18  ;;  %v297_v31 = vld [vmem:[%s1461_s16] sm:$0xff] }
  0x29   : >> { %333 = vrot.lane.b32.xlu2 %v1069_v32, %s1266_s19 }
  0x30   : >> { %357 = vrot.lane.b32.xlu0 %v1075_v33, %s1265_s18  ;;  %327 = vrot.lane.b32.xlu1 %v1066_v34, %s1266_s19 }
  0x31   : >> { %351 = vrot.lane.b32.xlu2 %v1072_v35, %s1265_s18 }
  0x73   : >> { %v330_v36 = vpop.permute.xlu2 %329 }
  0x74   : >> { %v371_v56 = vsel %vm369_vm0, %v298_v52, %v330_v36 }
  0x7b   : >> { %v332_v40 = vpop.permute.xlu2 %331 }
  0x7c   : >> { %v372_v55 = vsel %vm369_vm0, %v299_v48, %v332_v40 }
  0x83   : >> { %v334_v54 = vpop.permute.xlu2 %333 }
  0x84   : >> { %v373_v30 = vsel %vm369_vm0, %v300_v26, %v334_v54 }
  0x8a   : >> { %v360_v37 = vpop.permute.xlu1 %359  ;;  %v336_v38 = vpop.permute.xlu0 %335 }
  0x8b   : >> { %v374_v41 = vsel %vm369_vm0, %v301_v39, %v336_v38  ;;  %v352_v32 = vpop.permute.xlu2 %351 }
  0x8c   : >> { %v1479_v43 = vsel %vm376_vm1, %v374_v41, %v360_v37 }
  0x8d   : >> { %v397_v51 = vrot.slane %v1479_v43, 1  ;;  %v427_v61 = vrot.slane %v1479_v43, 2 }
  0x92   : >> { %v362_v44 = vpop.permute.xlu1 %361  ;;  %v338_v45 = vpop.permute.xlu0 %337 }
  0x93   : >> { %v375_v46 = vsel %vm369_vm0, %v302_v42, %v338_v45 }
  0x94   : >> { %v1483_v47 = vsel %vm376_vm1, %v375_v46, %v362_v44 }
  0x95   : >> { %v429_v49 = vrot.slane %v1483_v47, 2  ;;  %v399_v50 = vrot.slane %v1483_v47, 1 }
  0x97   : >> { %441 = vrot.lane.b32.xlu1 %v429_v49, %s1267_s20  ;;  %411 = vrot.lane.b32.xlu2 %v399_v50, %s1268_s23  ;;  %v400_v53 = vsel %vm389_vm2, %v397_v51, %v399_v50  ;;  %v430_v27 = vsel %vm419_vm3, %v427_v61, %v429_v49 }
  0x98   : >> { %409 = vrot.lane.b32.xlu0 %v400_v53, %s1268_s23 }
  0x9a   : >> { %v356_v57 = vpop.permute.xlu1 %355  ;;  %v354_v58 = vpop.permute.xlu0 %353 }
  0x9b   : >> { %v1497_v59 = vsel %vm376_vm1, %v372_v55, %v356_v57  ;;  %v1500_v60 = vsel %vm376_vm1, %v371_v56, %v354_v58 }
  0x9c   : >> { %v393_v62 = vrot.slane %v1497_v59, 1  ;;  %v423_v63 = vrot.slane %v1497_v59, 2  ;;  %v391_v24 = vrot.slane %v1500_v60, 1  ;;  %v421_v25 = vrot.slane %v1500_v60, 2 }
  0x9e   : >> { %v394_v28 = vsel %vm389_vm2, %v391_v24, %v393_v62  ;;  %v424_v29 = vsel %vm419_vm3, %v421_v25, %v423_v63 }
  0x9f   : >> { %439 = vrot.lane.b32.xlu1 %v430_v27, %s1267_s20  ;;  %403 = vrot.lane.b32.xlu2 %v394_v28, %s1268_s23 }
  0xa0   : >> { %433 = vrot.lane.b32.xlu0 %v424_v29, %s1267_s20 }
  0xa2   : >> { %v358_v33 = vpop.permute.xlu0 %357  ;;  %v328_v34 = vpop.permute.xlu1 %327 }
  0xa3   : >> { %v380_v35 = vsel %vm376_vm1, %v373_v30, %v358_v33  ;;  %v370_v36 = vsel %vm369_vm0, %v297_v31, %v328_v34  ;;  %v464_v33 = vperm.slane %v1340_v4, 0 }
  0xa4   : >> { %v395_v37 = vrot.slane %v380_v35, 1  ;;  %v425_v38 = vrot.slane %v380_v35, 2  ;;  %v377_v39 = vsel %vm376_vm1, %v370_v36, %v352_v32 }
  0xa5   : >> { %v390_v40 = vrot.slane %v377_v39, 1  ;;  %v420_v45 = vrot.slane %v377_v39, 2 }
  0xa6   : >> { %v398_v41 = vsel %vm389_vm2, %v395_v37, %v397_v51  ;;  %v428_v42 = vsel %vm419_vm3, %v425_v38, %v427_v61  ;;  %v396_v48 = vsel %vm389_vm2, %v393_v62, %v395_v37  ;;  %v426_v49 = vsel %vm419_vm3, %v423_v63, %v425_v38 }
  0xa7   : >> { %407 = vrot.lane.b32.xlu1 %v398_v41, %s1268_s23  ;;  %v392_v44 = vsel %vm389_vm2, %v390_v40, %v391_v24  ;;  %v422_v46 = vsel %vm419_vm3, %v420_v45, %v421_v25 }
  0xa8   : >> { %437 = vrot.lane.b32.xlu0 %v428_v42, %s1267_s20  ;;  %401 = vrot.lane.b32.xlu2 %v392_v44, %s1268_s23 }
  0xaf   : >> { %431 = vrot.lane.b32.xlu1 %v422_v46, %s1267_s20 }
  0xb0   : >> { %405 = vrot.lane.b32.xlu0 %v396_v48, %s1268_s23  ;;  %435 = vrot.lane.b32.xlu2 %v426_v49, %s1267_s20 }
  0xf1   : >> { %v412_v50 = vpop.permute.xlu2 %411 }
  0xf2   : >> { %v455_v62 = vsel %vm449_vm5, %v1483_v47, %v412_v50 }
  0xf9   : >> { %v404_v53 = vpop.permute.xlu2 %403 }
  0xfa   : >> { %v451_v56 = vsel %vm449_vm5, %v1500_v60, %v404_v53 }
 0x102   : >> { %v402_v63 = vpop.permute.xlu2 %401 }
 0x103   : >> { %v450_v27 = vsel %vm449_vm5, %v377_v39, %v402_v63 }
 0x109   : >> { %v442_v51 = vpop.permute.xlu1 %441 }
 0x10a   : >> { %v410_v52 = vpop.permute.xlu0 %409  ;;  %v462_v26 = vsel %vm456_vm7, %v455_v62, %v442_v51  ;;  %v436_v30 = vpop.permute.xlu2 %435 }
 0x10b   : >> { %v454_v54 = vsel %vm449_vm5, %v1479_v43, %v410_v52 }
 0x111   : >> { %v440_v55 = vpop.permute.xlu1 %439 }
 0x112   : >> { %v434_v57 = vpop.permute.xlu0 %433  ;;  %v461_v58 = vsel %vm456_vm7, %v454_v54, %v440_v55 }
 0x113   : >> { %1083 = vmatmul.msk.f32.vlgmr.msra.gmra.mxu3 %vm466_vm6, %v461_v58  ;;  %v458_v61 = vsel %vm456_vm7, %v451_v56, %v434_v57 }
 0x114   : >> { %1080 = vmatmul.msk.f32.vlgmr.msra.gmra.mxu1 %vm466_vm6, %v458_v61 }
 0x119   : >> { %v408_v24 = vpop.permute.xlu1 %407 }
 0x11a   : >> { %v453_v43 = vsel %vm449_vm5, %v380_v35, %v408_v24  ;;  %v438_v25 = vpop.permute.xlu0 %437 }
 0x11b   : >> { %1084 = vmatmul.msk.f32.gmra.mxu3 %vm466_vm6, %v462_v26  ;;  %v460_v60 = vsel %vm456_vm7, %v453_v43, %v438_v25 }
 0x11c   : >> { %1082 = vmatmul.msk.f32.vlgmr.msra.gmra.mxu2 %vm466_vm6, %v460_v60 }
 0x121   : >> { %v432_v28 = vpop.permute.xlu1 %431 }
 0x122   : >> { %v406_v29 = vpop.permute.xlu0 %405  ;;  %v457_v47 = vsel %vm456_vm7, %v450_v27, %v432_v28 }
 0x123   : >> { %v452_v31 = vsel %vm449_vm5, %v1497_v59, %v406_v29  ;;  %1079 = vmatmul.msk.f32.vlgmr.msra.gmra.mxu0 %vm466_vm6, %v457_v47 }
 0x124   : >> { %v459_v32 = vsel %vm456_vm7, %v452_v31, %v436_v30 }
 0x125   : >> { %1081 = vmatmul.msk.f32.gmra.mxu1 %vm466_vm6, %v459_v32 }
 0x191   : >> { %v509_v34 = vpop.f32.mrf.mxu1 }
 0x192   : >> { %v510_v35 = vadd.f32 %v509_v34, %v464_v33 }
 0x194   : >> { %v525_v36 = vmax.f32 %v510_v35, 0.0 }
 0x196   : >> { %533 = vst.msk [vmem:[%s530_s24 + $0x8] sm:$0xff] %vm531_vm8, %v525_v36  ;;  %v518_v37 = vpop.f32.mrf.mxu3 }
 0x197   : >> { %v519_v38 = vadd.f32 %v518_v37, %v464_v33 }
 0x199   : >> { %v528_v39 = vmax.f32 %v519_v38, 0.0 }
 0x19b   : >> { %536 = vst.msk [vmem:[%s530_s24 + $0x20] sm:$0xff] %vm531_vm8, %v528_v39 }
 0x19e   : >> { %v521_v59 = vpop.f32.mrf.mxu3 }
 0x19f   : >> { %v522_v40 = vadd.f32 %v521_v59, %v464_v33  ;;  %v515_v41 = vpop.f32.mrf.mxu2 }
 0x1a0   : >> { %v516_v42 = vadd.f32 %v515_v41, %v464_v33  ;;  %v506_v44 = vpop.f32.mrf.mxu0 }
 0x1a1   : >> { %v529_v45 = vmax.f32 %v522_v40, 0.0  ;;  %v507_v46 = vadd.f32 %v506_v44, %v464_v33 }
 0x1a2   : >> { %v527_v48 = vmax.f32 %v516_v42, 0.0  ;;  %v512_v49 = vpop.f32.mrf.mxu1 }
 0x1a3   : >> { %538 = vst.msk [vmem:[%s530_s24 + $0x28] sm:$0x3] %vm537_vm9, %v529_v45  ;;  %v524_v50 = vmax.f32 %v507_v46, 0.0  ;;  %v513_v51 = vadd.f32 %v512_v49, %v464_v33  ;;  %293 = sbr.rel (!%p291_p4) target bundleno = 20 (0x14), region = 114 }
 0x1a4   : >> { %535 = vst.msk [vmem:[%s530_s24 + $0x18] sm:$0xff] %vm531_vm8, %v527_v48 }
 0x1a5   : >> { %532 = vst.msk [vmem:[%s530_s24] sm:$0xff] %vm531_vm8, %v524_v50  ;;  %v526_v52 = vmax.f32 %v513_v51, 0.0 }
 0x1a7   : >> { %534 = vst.msk [vmem:[%s530_s24 + $0x10] sm:$0xff] %vm531_vm8, %v526_v52 }
 0x1a8 LB: >> { %1137 = vmatpush.msra.mxu2 %v1425_v20  ;;  %1138 = vmatpush.msra.mxu3 %v1425_v20  ;;  %s545_s27 = smul.u32 48, %s1259_s26  ;;  %s1269_s28 = smov 32   ;;  %vm626_vm10 = vcmask 261120   ;;  %vm693_vm11 = vcmask 392192   ;;  %vm699_vm12 = vcmask 785408   ;;  %s1259_s26 = sphi %s1580_s26, %s544_s26  }
 0x1a9   : >> { %718 = vmatpush.msra.mxu0 %v1425_v20  ;;  %764 = vmatpush.msra.mxu1 %v1440_v22  ;;  %s1270_s29 = smov 16   ;;  %s1271_s22 = smov 96  }
 0x1aa   : >> { %1139 = vmatpush.msra.mxu2 %v1420_v19  ;;  %1140 = vmatpush.msra.mxu3 %v1420_v19  ;;  %s1596_s17 = scalar_lea.vmem [#allocation2], %s545_s27  ;;  %s1272_s30 = smov 48  }
 0x1ab   : >> { %719 = vmatpush.msra.mxu0 %v1420_v19  ;;  %765 = vmatpush.msra.mxu1 %v1435_v21  ;;  %s782_s7 = smul.u32 40, %s1259_s26  ;;  %s544_s26 = sadd.s32 1, %s1259_s26  }
 0x1ac   : >> { %1141 = vmatpush.msra.mxu2 %v1415_v18  ;;  %1142 = vmatpush.msra.mxu3 %v1415_v18  ;;  %p541_p5 = scmp.ge.s32.totalorder %s544_s26, 40  }
 0x1ad   : >> { %720 = vmatpush.msra.mxu0 %v1415_v18  ;;  %s783_s9 = scalar_lea.vmem %s1430_s25, %s782_s7  ;;  %s1743_s10 = smov (%p541_p5), 0  }
 0x1ae   : >> { %v1091_v0 = vld [vmem:[%s1596_s17 + $0x60] sm:$0xff]  ;;  %v1085_v1 = vld [vmem:[%s1596_s17 + $0x30] sm:$0xff]  ;;  %1143 = vmatpush.msra.mxu2 %v1405_v17  ;;  %1144 = vmatpush.msra.mxu3 %v1405_v17  ;;  %v1092_v3 = vld [vmem:[%s1596_s17 + $0x68] sm:$0xff] }
 0x1af   : >> { %601 = vrot.lane.b32.xlu1 %v1091_v0, %s1269_s28  ;;  %577 = vrot.lane.b32.xlu0 %v1085_v1, %s1270_s29  ;;  %v1087_v2 = vld [vmem:[%s1596_s17 + $0x40] sm:$0xff]  ;;  %v1086_v4 = vld [vmem:[%s1596_s17 + $0x38] sm:$0xff] }
 0x1b0   : >> { %721 = vmatpush.msra.mxu0 %v1405_v17  ;;  %581 = vrot.lane.b32.xlu2 %v1087_v2, %s1270_s29  ;;  %v1093_v53 = vld [vmem:[%s1596_s17 + $0x70] sm:$0xff]  ;;  %v1088_v55 = vld [vmem:[%s1596_s17 + $0x48] sm:$0xff]  ;;  %v1094_v56 = vld [vmem:[%s1596_s17 + $0x78] sm:$0xff] }
 0x1b1   : >> { %1145 = vmatpush.msra.mxu2 %v1400_v16  ;;  %1146 = vmatpush.msra.mxu3 %v1400_v16  ;;  %v1089_v54 = vld [vmem:[%s1596_s17 + $0x50] sm:$0xff]  ;;  %v1090_v57 = vld [vmem:[%s1596_s17 + $0x58] sm:$0x3]  ;;  %v1095_v58 = vld [vmem:[%s1596_s17 + $0x80] sm:$0xff] }
 0x1b2   : >> { %722 = vmatpush.msra.mxu0 %v1400_v16  ;;  %v1096_v61 = vld [vmem:[%s1596_s17 + $0x88] sm:$0x3]  ;;  %v549_v43 = vld [vmem:[%s1596_s17 + $0x10] sm:$0xff]  ;;  %v547_v25 = vld [vmem:[%s1596_s17] sm:$0xff] }
 0x1b3   : >> { %1147 = vmatpush.msra.mxu2 %v1395_v15  ;;  %1148 = vmatpush.msra.mxu3 %v1395_v15  ;;  %v548_v28 = vld [vmem:[%s1596_s17 + $0x8] sm:$0xff]  ;;  %v550_v59 = vld [vmem:[%s1596_s17 + $0x18] sm:$0xff]  ;;  %v551_v45 = vld [vmem:[%s1596_s17 + $0x20] sm:$0xff] }
 0x1b4   : >> { %723 = vmatpush.msra.mxu0 %v1395_v15  ;;  %v552_v50 = vld [vmem:[%s1596_s17 + $0x28] sm:$0x3] }
 0x1b5   : >> { %1149 = vmatpush.msra.mxu2 %v1390_v14  ;;  %1150 = vmatpush.msra.mxu3 %v1390_v14 }
 0x1b6   : >> { %724 = vmatpush.msra.mxu0 %v1390_v14 }
 0x1b7   : >> { %603 = vrot.lane.b32.xlu1 %v1092_v3, %s1269_s28  ;;  %579 = vrot.lane.b32.xlu0 %v1086_v4, %s1270_s29 }
 0x1b8   : >> { %1151 = vmatpush.msra.mxu2 %v1385_v13  ;;  %605 = vrot.lane.b32.xlu2 %v1093_v53, %s1269_s28 }
 0x1b9   : >> { %1152 = vmatpush.msra.mxu3 %v1385_v13  ;;  %725 = vmatpush.msra.mxu0 %v1385_v13 }
 0x1ba   : >> { %1153 = vmatpush.msra.mxu2 %v1380_v12 }
 0x1bb   : >> { %1154 = vmatpush.msra.mxu3 %v1380_v12  ;;  %726 = vmatpush.msra.mxu0 %v1380_v12 }
 0x1bc   : >> { %1155 = vmatpush.msra.mxu2 %v1375_v11 }
 0x1bd   : >> { %1156 = vmatpush.msra.mxu3 %v1375_v11  ;;  %727 = vmatpush.msra.mxu0 %v1375_v11 }
 0x1be   : >> { %1157 = vmatpush.msra.mxu2 %v1370_v10 }
 0x1bf   : >> { %585 = vrot.lane.b32.xlu1 %v1089_v54, %s1270_s29  ;;  %583 = vrot.lane.b32.xlu0 %v1088_v55, %s1270_s29 }
 0x1c0   : >> { %1159 = vmatpush.msra.mxu2 %v1365_v9  ;;  %607 = vrot.lane.b32.xlu2 %v1094_v56, %s1269_s28 }
 0x1c1   : >> { %1158 = vmatpush.msra.mxu3 %v1370_v10  ;;  %728 = vmatpush.msra.mxu0 %v1370_v10 }
 0x1c2   : >> { %1161 = vmatpush.msra.mxu2 %v1360_v8 }
 0x1c3   : >> { %1160 = vmatpush.msra.mxu3 %v1365_v9  ;;  %729 = vmatpush.msra.mxu0 %v1365_v9 }
 0x1c4   : >> { %1163 = vmatpush.msra.mxu2 %v1355_v7 }
 0x1c5   : >> { %1162 = vmatpush.msra.mxu3 %v1360_v8  ;;  %730 = vmatpush.msra.mxu0 %v1360_v8 }
 0x1c6   : >> { %1165 = vmatpush.msra.mxu2 %v1350_v6 }
 0x1c7   : >> { %587 = vrot.lane.b32.xlu1 %v1090_v57, %s1270_s29  ;;  %609 = vrot.lane.b32.xlu0 %v1095_v58, %s1269_s28 }
 0x1c8   : >> { %1167 = vmatpush.msra.mxu2 %v1345_v5  ;;  %611 = vrot.lane.b32.xlu2 %v1096_v61, %s1269_s28 }
 0x1c9   : >> { %1164 = vmatpush.msra.mxu3 %v1355_v7  ;;  %731 = vmatpush.msra.mxu0 %v1355_v7 }
 0x1cb   : >> { %1166 = vmatpush.msra.mxu3 %v1350_v6  ;;  %732 = vmatpush.msra.mxu0 %v1350_v6 }
 0x1cd   : >> { %1168 = vmatpush.msra.mxu3 %v1345_v5  ;;  %733 = vmatpush.msra.mxu0 %v1345_v5 }
 0x20a   : >> { %v582_v62 = vpop.permute.xlu2 %581 }
 0x20b   : >> { %v622_v26 = vsel %vm531_vm8, %v549_v43, %v582_v62 }
 0x212   : >> { %v606_v60 = vpop.permute.xlu2 %605 }
 0x213   : >> { %v1668_v29 = vsel %vm626_vm10, %v622_v26, %v606_v60 }
 0x214   : >> { %v670_v33 = vrot.slane %v1668_v29, 2  ;;  %v643_v52 = vrot.slane %v1668_v29, 1 }
 0x21a   : >> { %v608_v39 = vpop.permute.xlu2 %607 }
 0x221   : >> { %v602_v63 = vpop.permute.xlu1 %601  ;;  %v578_v24 = vpop.permute.xlu0 %577 }
 0x222   : >> { %v620_v27 = vsel %vm531_vm8, %v547_v25, %v578_v24  ;;  %v612_v51 = vpop.permute.xlu2 %611 }
 0x223   : >> { %v1671_v47 = vsel %vm626_vm10, %v620_v27, %v602_v63 }
 0x224   : >> { %v667_v36 = vrot.slane %v1671_v47, 2  ;;  %v640_v57 = vrot.slane %v1671_v47, 1 }
 0x229   : >> { %v604_v30 = vpop.permute.xlu1 %603  ;;  %v580_v31 = vpop.permute.xlu0 %579 }
 0x22a   : >> { %v621_v32 = vsel %vm531_vm8, %v548_v28, %v580_v31 }
 0x22b   : >> { %v628_v34 = vsel %vm626_vm10, %v621_v32, %v604_v30 }
 0x22c   : >> { %v668_v35 = vrot.slane %v628_v34, 2  ;;  %v641_v2 = vrot.slane %v628_v34, 1 }
 0x22e   : >> { %v671_v37 = vsel %vm419_vm3, %v668_v35, %v670_v33  ;;  %v669_v38 = vsel %vm419_vm3, %v667_v36, %v668_v35  ;;  %v644_v61 = vsel %vm389_vm2, %v641_v2, %v643_v52  ;;  %v642_v63 = vsel %vm389_vm2, %v640_v57, %v641_v2 }
 0x22f   : >> { %680 = vrot.lane.b32.xlu1 %v671_v37, %s1271_s22  ;;  %678 = vrot.lane.b32.xlu0 %v669_v38, %s1271_s22 }
 0x231   : >> { %v586_v40 = vpop.permute.xlu1 %585  ;;  %v584_v41 = vpop.permute.xlu0 %583 }
 0x232   : >> { %v623_v42 = vsel %vm531_vm8, %v550_v59, %v584_v41  ;;  %v624_v49 = vsel %vm531_vm8, %v551_v45, %v586_v40 }
 0x233   : >> { %v630_v44 = vsel %vm626_vm10, %v623_v42, %v608_v39 }
 0x234   : >> { %v672_v46 = vrot.slane %v630_v44, 2  ;;  %v645_v53 = vrot.slane %v630_v44, 1 }
 0x236   : >> { %v673_v48 = vsel %vm419_vm3, %v670_v33, %v672_v46  ;;  %v646_v27 = vsel %vm389_vm2, %v643_v52, %v645_v53 }
 0x237   : >> { %682 = vrot.lane.b32.xlu1 %v673_v48, %s1271_s22 }
 0x239   : >> { %v588_v0 = vpop.permute.xlu1 %587  ;;  %v610_v1 = vpop.permute.xlu0 %609 }
 0x23a   : >> { %v625_v3 = vsel %vm531_vm8, %v552_v50, %v588_v0  ;;  %v631_v4 = vsel %vm626_vm10, %v624_v49, %v610_v1 }
 0x23b   : >> { %v647_v54 = vrot.slane %v631_v4, 1  ;;  %v674_v55 = vrot.slane %v631_v4, 2  ;;  %v632_v56 = vsel %vm626_vm10, %v625_v3, %v612_v51 }
 0x23c   : >> { %v649_v43 = vrot.slane %v632_v56, 1  ;;  %v676_v25 = vrot.slane %v632_v56, 2 }
 0x23d   : >> { %v675_v58 = vsel %vm419_vm3, %v672_v46, %v674_v55  ;;  %v648_v62 = vsel %vm389_vm2, %v645_v53, %v647_v54 }
 0x23e   : >> { %684 = vrot.lane.b32.xlu0 %v675_v58, %s1271_s22  ;;  %v1223_v24 = vpack.i.bf16 %v648_v62, %v644_v61  ;;  %v650_v26 = vsel %vm389_vm2, %v647_v54, %v649_v43  ;;  %v677_v60 = vsel %vm419_vm3, %v674_v55, %v676_v25 }
 0x23f   : >> { %651 = vrot.lane.b32.xlu1 %v642_v63, %s1272_s30  ;;  %v1228_v28 = vpack.i.bf16 %v650_v26, %v646_v27  ;;  %v789_v27 = vlaneseq (%p541_p5) }
 0x240   : >> { %1224 = vrot.lane.b32.xlu2 %v1223_v24, %s1272_s30 }
 0x246   : >> { %686 = vrot.lane.b32.xlu0 %v677_v60, %s1271_s22 }
 0x248   : >> { %1229 = vrot.lane.b32.xlu2 %v1228_v28, %s1272_s30  ;;  %v790_v28 = vand.u32 (%p541_p5), 127, %v789_v27 }
 0x29a   : >> { %v1225_v30 = vpop.permute.xlu2 %1224 }
 0x29b   : >> { %v1226_v31 = vunpack.i.l.bf16 %v1225_v30  ;;  %v1227_v41 = vunpack.i.h.bf16 %v1225_v30  ;;  %v792_v30 = vshrl.u32 (%p541_p5), %v789_v27, 7 }
 0x29d   : >> { %v695_v35 = vsel %vm693_vm11, %v628_v34, %v1226_v31  ;;  %v697_v34 = vsel %vm693_vm11, %v630_v44, %v1227_v41  ;;  %v793_v31 = vadd.s32 (%p541_p5), 8, %v792_v30 }
 0x2a1   : >> { %v681_v32 = vpop.permute.xlu1 %680  ;;  %v679_v33 = vpop.permute.xlu0 %678 }
 0x2a2   : >> { %v1230_v36 = vpop.permute.xlu2 %1229  ;;  %1097 = vmatmul.msk.f32.vlgmr.msra.gmra.mxu1 %vm531_vm8, %v679_v33  ;;  %v701_v37 = vsel %vm699_vm12, %v695_v35, %v681_v32  ;;  %v796_v35 = vmul.u32 (%p541_p5), 2, %v793_v31 }
 0x2a3   : >> { %737 = vmatmul.f32.vlgmr.msra.gmra.mxu2 %v701_v37  ;;  %v1231_v38 = vunpack.i.l.bf16 %v1230_v36  ;;  %v1232_v49 = vunpack.i.h.bf16 %v1230_v36 }
 0x2a4   : > { %vm799_vm14 = vcmp.eq.s32.totalorder (%p541_p5), %v790_v28, %v796_v35 }
 0x2a5   : >> { %v696_v59 = vsel %vm693_vm11, %v1668_v29, %v1231_v38  ;;  %v698_v51 = vsel %vm693_vm11, %v631_v4, %v1232_v49  ;;  %v1273_v38 = vmov (%p541_p5), 0.0  }
 0x2a6   : > { %v1733_v41 = vsel (%p541_p5), %vm799_vm14, 1.0, %v1273_v38 }
 0x2a9   : >> { %v683_v39 = vpop.permute.xlu1 %682 }
 0x2aa   : >> { %1098 = vmatmul.msk.f32.gmra.mxu1 %vm531_vm8, %v681_v32  ;;  %v702_v40 = vsel %vm699_vm12, %v696_v59, %v683_v39  ;;  %v794_v32 = vadd.s32 (%p541_p5), 16, %v792_v30  ;;  %v808_v59 = vadd.s32 (%p541_p5), 1, %v796_v35 }
 0x2ab   : >> { %740 = vmatmul.f32.gmra.mxu2 %v702_v40 }
 0x2ac   : > { %v797_v36 = vmul.u32 (%p541_p5), 2, %v794_v32  ;;  %vm811_vm1 = vcmp.eq.s32.totalorder (%p541_p5), %v790_v28, %v808_v59 }
 0x2ad   : > { %v1739_v6 = vsel (%p541_p5), %vm811_vm1, 1.0, %v1273_v38 }
 0x2ae   : > { %vm800_vm15 = vcmp.eq.s32.totalorder (%p541_p5), %v790_v28, %v797_v36  ;;  %v809_v40 = vadd.s32 (%p541_p5), 1, %v797_v36 }
 0x2b0   : >> { %v685_v42 = vpop.permute.xlu0 %684  ;;  %vm812_vm2 = vcmp.eq.s32.totalorder (%p541_p5), %v790_v28, %v809_v40 }
 0x2b1   : >> { %v652_v45 = vpop.permute.xlu1 %651  ;;  %v703_v46 = vsel %vm699_vm12, %v697_v34, %v685_v42  ;;  %v1741_v7 = vsel (%p541_p5), %vm812_vm2, 1.0, %v1273_v38 }
 0x2b2   : >> { %v694_v48 = vsel %vm693_vm11, %v1671_v47, %v652_v45  ;;  %743 = vmatmul.f32.vlgmr.msra.gmra.mxu3 %v703_v46  ;;  %1099 = vmatmul.msk.f32.gmra.mxu1 %vm531_vm8, %v683_v39  ;;  %v706_v47 = vperm.slane %v1445_v23, 0 }
 0x2b3   : >> { %v700_v29 = vsel %vm699_vm12, %v694_v48, %v679_v33  ;;  %v795_v33 = vmul.u32 (%p541_p5), 2, %v792_v30 }
 0x2b4   : >> { %734 = vmatmul.f32.vlgmr.msra.gmra.mxu0 %v700_v29 }
 0x2b5   : > { %vm798_vm13 = vcmp.eq.s32.totalorder (%p541_p5), %v790_v28, %v795_v33  ;;  %v807_v37 = vadd.s32 (%p541_p5), 1, %v795_v33 }
 0x2b6   : > { %v1731_v39 = vsel (%p541_p5), %vm798_vm13, 1.0, %v1273_v38 }
 0x2b7   : > { %vm810_vm0 = vcmp.eq.s32.totalorder (%p541_p5), %v790_v28, %v807_v37 }
 0x2b8   : >> { %v687_v50 = vpop.permute.xlu0 %686  ;;  %v1737_v5 = vsel (%p541_p5), %vm810_vm0, 1.0, %v1273_v38 }
 0x2b9   : >> { %v704_v44 = vsel %vm699_vm12, %v698_v51, %v687_v50 }
 0x2ba   : >> { %746 = vmatmul.f32.gmra.mxu3 %v704_v44  ;;  %1100 = vmatmul.msk.f32.gmra.mxu1 %vm531_vm8, %v685_v42  ;;  %v1735_v42 = vsel (%p541_p5), %vm800_vm15, 1.0, %v1273_v38 }
 0x2c2   : >> { %1101 = vmatmul.msk.f32.gmra.mxu1 %vm531_vm8, %v687_v50 }
 0x31f   : >> { %v767_v52 = vpop.f32.mrf.mxu1 }
 0x326   : >> { %v738_v0 = vpop.f32.mrf.mxu2 }
 0x327   : >> { %v739_v1 = vadd.f32 %v738_v0, %v706_v47  ;;  %v770_v2 = vpop.f32.mrf.mxu1 }
 0x329   : >> { %v771_v3 = vadd.f32 %v770_v2, %v739_v1 }
 0x32b   : >> { %785 = vst.msk [vmem:[%s783_s9 + $0x8] sm:$0xff] %vm531_vm8, %v771_v3 }
 0x32e   : >> { %v741_v53 = vpop.f32.mrf.mxu2 }
 0x32f   : >> { %v742_v4 = vadd.f32 %v741_v53, %v706_v47  ;;  %v773_v54 = vpop.f32.mrf.mxu1 }
 0x331   : >> { %v774_v55 = vadd.f32 %v773_v54, %v742_v4  ;;  %v735_v56 = vpop.f32.mrf.mxu0 }
 0x332   : >> { %v736_v57 = vadd.f32 %v735_v56, %v706_v47 }
 0x333   : >> { %786 = vst.msk [vmem:[%s783_s9 + $0x10] sm:$0xff] %vm531_vm8, %v774_v55 }
 0x334   : >> { %v768_v58 = vadd.f32 %v767_v52, %v736_v57 }
 0x335   : >> { %v744_v61 = vpop.f32.mrf.mxu3 }
 0x336   : >> { %784 = vst.msk [vmem:[%s783_s9] sm:$0xff] %vm531_vm8, %v768_v58  ;;  %v745_v62 = vadd.f32 %v744_v61, %v706_v47 }
 0x337   : >> { %v776_v63 = vpop.f32.mrf.mxu1 }
 0x338   : >> { %v777_v24 = vadd.f32 %v776_v63, %v745_v62 }
 0x33a   : >> { %787 = vst.msk [vmem:[%s783_s9 + $0x18] sm:$0xff] %vm531_vm8, %v777_v24 }
 0x33d   : >> { %v747_v43 = vpop.f32.mrf.mxu3 }
 0x33e   : >> { %v748_v25 = vadd.f32 %v747_v43, %v706_v47  ;;  %543 = sbr.rel (!%p541_p5) target bundleno = 424 (0x1a8), region = 125 }
 0x33f   : >> { %v779_v26 = vpop.f32.mrf.mxu1 }
 0x340   : >> { %v780_v60 = vadd.f32 %v779_v26, %v748_v25 }
 0x342   : >> { %788 = vst.msk [vmem:[%s783_s9 + $0x20] sm:$0xff] %vm531_vm8, %v780_v60 }
 0x343 LB: >> { %s1109_s11 = smul.u32 80, %s1263_s10  ;;  %vm846_vm3 = vcmask 326656   ;;  %vm925_vm4 = vcmask 125952   ;;  %s1263_s10 = sphi %s1743_s10, %s824_s10  }
 0x344   : >> { %s920_s13 = smul.u32 24, %s1263_s10  ;;  %s824_s10 = sadd.s32 1, %s1263_s10  }
 0x345   : >> { %s827_s12 = scalar_lea.vmem %s1430_s25, %s1109_s11  ;;  %p821_p6 = scmp.ge.s32.totalorder %s824_s10, 20  }
 0x346   : >> { %s921_s14 = scalar_lea.vmem %s1450_s8, %s920_s13 }
 0x349   : >> { %v832_v8 = vld [vmem:[%s827_s12 + $0x20] sm:$0xff]  ;;  %v1116_v9 = vld [vmem:[%s827_s12 + $0x48] sm:$0xff]  ;;  %v831_v10 = vld [vmem:[%s827_s12 + $0x18] sm:$0xff] }
 0x34a   : >> { %v845_v11 = vmax.f32 %v832_v8, %v1116_v9  ;;  %v1115_v12 = vld [vmem:[%s827_s12 + $0x40] sm:$0xff]  ;;  %v830_v13 = vld [vmem:[%s827_s12 + $0x10] sm:$0xff]  ;;  %v1114_v14 = vld [vmem:[%s827_s12 + $0x38] sm:$0xff] }
 0x34b   : >> { %v844_v15 = vmax.f32 %v831_v10, %v1115_v12  ;;  %v829_v16 = vld [vmem:[%s827_s12 + $0x8] sm:$0xff]  ;;  %v1113_v17 = vld [vmem:[%s827_s12 + $0x30] sm:$0xff]  ;;  %v843_v18 = vmax.f32 %v830_v13, %v1114_v14  ;;  %v828_v19 = vld [vmem:[%s827_s12] sm:$0xff] }
 0x34c   : >> { %1169 = vmatpush.msra.mxu2 %v845_v11  ;;  %1174 = vmatpush.msra.mxu3 %v845_v11  ;;  %v1112_v20 = vld [vmem:[%s827_s12 + $0x28] sm:$0xff]  ;;  %v842_v21 = vmax.f32 %v829_v16, %v1113_v17 }
 0x34d   : >> { %867 = vmatpush.msra.mxu0 %v845_v11  ;;  %902 = vmatpush.msra.mxu1 %v845_v11  ;;  %v841_v22 = vmax.f32 %v828_v19, %v1112_v20 }
 0x34e   : >> { %1170 = vmatpush.msra.mxu2 %v844_v15  ;;  %1175 = vmatpush.msra.mxu3 %v844_v15 }
 0x34f   : >> { %868 = vmatpush.msra.mxu0 %v844_v15  ;;  %903 = vmatpush.msra.mxu1 %v844_v15 }
 0x350   : >> { %1171 = vmatpush.msra.mxu2 %v843_v18  ;;  %1176 = vmatpush.msra.mxu3 %v843_v18 }
 0x351   : >> { %869 = vmatpush.msra.mxu0 %v843_v18  ;;  %904 = vmatpush.msra.mxu1 %v843_v18 }
 0x352   : >> { %1172 = vmatpush.msra.mxu2 %v842_v21  ;;  %1177 = vmatpush.msra.mxu3 %v842_v21 }
 0x353   : >> { %870 = vmatpush.msra.mxu0 %v842_v21  ;;  %905 = vmatpush.msra.mxu1 %v842_v21 }
 0x354   : >> { %1173 = vmatpush.msra.mxu2 %v841_v22  ;;  %1178 = vmatpush.msra.mxu3 %v841_v22 }
 0x355   : >> { %1118 = vmatmul.msk.f32.vlgmr.msra.gmra.mxu2 %vm846_vm3, %v1733_v41  ;;  %1121 = vmatmul.msk.f32.vlgmr.msra.gmra.mxu3 %vm846_vm3, %v1739_v6 }
 0x356   : >> { %871 = vmatpush.msra.mxu0 %v841_v22  ;;  %906 = vmatpush.msra.mxu1 %v841_v22 }
 0x357   : >> { %1117 = vmatmul.msk.f32.vlgmr.msra.gmra.mxu0 %vm846_vm3, %v1731_v39  ;;  %1120 = vmatmul.msk.f32.vlgmr.msra.gmra.mxu1 %vm846_vm3, %v1737_v5 }
 0x35d   : >> { %1119 = vmatmul.msk.f32.gmra.mxu2 %vm846_vm3, %v1735_v42  ;;  %1122 = vmatmul.msk.f32.gmra.mxu3 %vm846_vm3, %v1741_v7 }
 0x3d4   : >> { %v873_v23 = vpop.f32.mrf.mxu0  ;;  %v908_v34 = vpop.f32.mrf.mxu1 }
 0x3d5   : >> { %v917_v45 = vmax.f32 %v873_v23, %v908_v34 }
 0x3d7   : >> { %923 = vst.msk [vmem:[%s921_s14] sm:$0xff] %vm531_vm8, %v917_v45 }
 0x3d8   : >> { %v876_v46 = vpop.f32.mrf.mxu2  ;;  %v911_v48 = vpop.f32.mrf.mxu3 }
 0x3d9   : >> { %v918_v29 = vmax.f32 %v876_v46, %v911_v48 }
 0x3db   : >> { %924 = vst.msk [vmem:[%s921_s14 + $0x8] sm:$0xff] %vm531_vm8, %v918_v29 }
 0x3df   : > { %823 = sbr.rel (!%p821_p6) target bundleno = 835 (0x343), region = 136 }
 0x3e0   : >> { %v879_v49 = vpop.f32.mrf.mxu2  ;;  %v914_v50 = vpop.f32.mrf.mxu3 }
 0x3e1   : >> { %v919_v51 = vmax.f32 %v879_v49, %v914_v50 }
 0x3e3   : >> { %926 = vst.msk [vmem:[%s921_s14 + $0x10] sm:$0xf] %vm925_vm4, %v919_v51 }
 0x3e4 PF: > { %s17_s21 = sadd.s32 1, %s1251_s21  }
 0x3e5   : > { %p14_p7 = scmp.ge.s32.totalorder %s17_s21, 4  }
 0x3e7   :  { %16 = sbr.rel (!%p14_p7) target bundleno = 1 (0x1), region = 147 }

// kernel: unet_encoder_forward.5
= control target key start
LH: loop header
LB: loop body
LE: loop exit
PB: predicated region body
PF: predicated region fallthrough
CT: control target
= control target key end

     0   :  { %s1999_s0 = inlined_call_operand.vmem [shape: f32[2,8,8,32], index: 0, kind: input, shape index: {}]   ;;  %s2000_s1 = inlined_call_operand.vmem [shape: f32[288,64], index: 1, kind: input, shape index: {}]   ;;  %s2001_s2 = inlined_call_operand.vmem [shape: f32[1,64], index: 2, kind: input, shape index: {}]   ;;  %s2002_s3 = inlined_call_operand.vmem [shape: f32[576,64], index: 3, kind: input, shape index: {}]   ;;  %s2003_s4 = inlined_call_operand.vmem [shape: f32[1,64], index: 4, kind: input, shape index: {}]   ;;  %s2004_s5 = inlined_call_operand.hbm [shape: f32[2,4,4,64], index: 5, kind: output, shape index: {0}]   ;;  %s2005_s6 = inlined_call_operand.hbm [shape: f32[2,2,2,64], index: 6, kind: output, shape index: {1}]  }
   0x1   :  { %2006 = sst [smem:[#allocation68_spill]] %s1999_s0 }
   0x2   :  { %2007 = sst [smem:[#allocation69_spill]] %s2000_s1 }
   0x3   :  { %2008 = sst [smem:[#allocation70_spill]] %s2001_s2 }
   0x4   :  { %12 = vsyncpa [#allocation4], 0 }
   0x5   :  { %14 = vsyncpa [#allocation4 + $0x1], 0 }
   0x6   :  { %15 = vsyncpa [#allocation6], 0 }
   0x7   :  { %17 = vsyncpa [#allocation6 + $0x1], 0  ;;  %s1177_s21 = smov 0   ;;  %s1179_s22 = smov 0  }
   0x8   :  { %s1181_s23 = smov 0   ;;  %s1183_s24 = smov 0  }
   0x9 LB: > { %s1198_s25 = sadd.s32 4294967295, %s1119_s24   ;;  %s886_s26 = sadd.s32 4294967294, %s1119_s24   ;;  %s1119_s24 = sphi %s1183_s24, %s2135_s24   ;;  %s1115_s23 = sphi %s1181_s23, %s2134_s23   ;;  %s1111_s22 = sphi %s1179_s22, %s2133_s22   ;;  %s1107_s21 = sphi %s1177_s21, %s2132_s21  }
   0xa   : > { %s1202_s27 = sadd.s32 1, %s1119_s24   ;;  %s140_s28 = sadd.s32 1, %s1115_s23 }
   0xb   : > { %s137_s29 = ssub.s32 %s1119_s24, %s1202_s27  ;;  %p150_p0 = scmp.ne.s32.totalorder %s1115_s23, %s1111_s22 }
   0xc   : > { %p138_p1 = scmp.eq.s32.totalorder %s137_s29, 0  ;;  %p151_p2 = scmp.eq.s32.totalorder %s1198_s25, 1 }
   0xd   : > { %p156_p3 = scmp.ne.s32.totalorder %s1111_s22, %s1107_s21  ;;  %p157_p4 = scmp.eq.s32.totalorder %s886_s26, 1 }
   0xe   : > { %s1213_s30 = scalar_select %p138_p1, %s1115_s23, %s140_s28  }
   0xf   : > { %p1215_p5 = por %p151_p2, %p150_p0  ;;  %p1219_p6 = por %p157_p4, %p156_p3 }
  0x10   : > { %p889_p7 = scmp.ge.s32.totalorder %s1119_s24, 1  ;;  %p221_p8 = scmp.lt.s32.totalorder %s1119_s24, 3 }
  0x12   : > { %p222_p9 = pnand %p889_p7, %p221_p8 }
  0x14   : > { %225 = sbr.rel (%p222_p9) target bundleno = 1021 (0x3fd), region = 40 }
  0x19   : > { %s1226_s9 = sand.u32 1, %s1111_s22   ;;  %p256_p10 = scmp.lt.s32.totalorder %s1198_s25, 1  ;;  %v1425_v37 = vld [vmem:[%s2002_s3] sm:$0xff]  ;;  %v1430_v38 = vld [vmem:[%s2002_s3 + $0x8] sm:$0xff]  ;;  %v1435_v39 = vld [vmem:[%s2002_s3 + $0x10] sm:$0xff] }
  0x1a   : > { %s2011_s1 = sld [smem:[#allocation69_spill]]  ;;  %s890_s16 = sshll.u32 %s1226_s9, 4  ;;  %2026 = vst [vmem:[#allocation21_spill] sm:$0xff] %v1425_v37  ;;  %v1440_v40 = vld [vmem:[%s2002_s3 + $0x18] sm:$0xff]  ;;  %v1445_v41 = vld [vmem:[%s2002_s3 + $0x20] sm:$0xff]  ;;  %v1450_v42 = vld [vmem:[%s2002_s3 + $0x28] sm:$0xff] }
  0x1b   : > { %s891_s17 = sshll.u32 %s1226_s9, 2  ;;  %s2024_s0 = sld [smem:[#allocation68_spill]]  ;;  %2027 = vst [vmem:[#allocation22_spill] sm:$0xff] %v1430_v38  ;;  %v1455_v43 = vld [vmem:[%s2002_s3 + $0x30] sm:$0xff]  ;;  %v1460_v44 = vld [vmem:[%s2002_s3 + $0x38] sm:$0xff]  ;;  %v1465_v45 = vld [vmem:[%s2002_s3 + $0x40] sm:$0xff] }
  0x1c   : > { %s257_s18 = scalar_select %p256_p10, %s1198_s25, 1  ;;  %2028 = vst [vmem:[#allocation23_spill] sm:$0xff] %v1435_v39  ;;  %v1470_v46 = vld [vmem:[%s2002_s3 + $0x48] sm:$0xff]  ;;  %v1475_v47 = vld [vmem:[%s2002_s3 + $0x50] sm:$0xff]  ;;  %v1480_v48 = vld [vmem:[%s2002_s3 + $0x58] sm:$0xff] }
  0x1d   : > { %s2025_s2 = sld [smem:[#allocation70_spill]]  ;;  %2029 = vst [vmem:[#allocation24_spill] sm:$0xff] %v1440_v40  ;;  %v1485_v49 = vld [vmem:[%s2002_s3 + $0x60] sm:$0xff]  ;;  %v1490_v50 = vld [vmem:[%s2002_s3 + $0x68] sm:$0xff]  ;;  %v1495_v51 = vld [vmem:[%s2002_s3 + $0x70] sm:$0xff]  ;;  %s1793_s13 = scalar_lea.vmem [#allocation5], %s891_s17 }
  0x1e   : > { %s926_s20 = sshll.u32 %s257_s18, 6  ;;  %2030 = vst [vmem:[#allocation25_spill] sm:$0xff] %v1445_v41  ;;  %v1500_v52 = vld [vmem:[%s2002_s3 + $0x78] sm:$0xff]  ;;  %v1505_v53 = vld [vmem:[%s2002_s3 + $0x80] sm:$0xff]  ;;  %v1510_v54 = vld [vmem:[%s2002_s3 + $0x88] sm:$0xff]  ;;  %s1795_s14 = smov 0  }
  0x1f   : > { %2031 = vst [vmem:[#allocation26_spill] sm:$0xff] %v1450_v42  ;;  %v1515_v55 = vld [vmem:[%s2002_s3 + $0x90] sm:$0xff]  ;;  %v1520_v56 = vld [vmem:[%s2002_s3 + $0x98] sm:$0xff]  ;;  %v1525_v57 = vld [vmem:[%s2002_s3 + $0xa0] sm:$0xff] }
  0x20   : > { %v1232_v0 = vld [vmem:[%s2011_s1] sm:$0xff]  ;;  %v1237_v1 = vld [vmem:[%s2011_s1 + $0x8] sm:$0xff]  ;;  %v1242_v2 = vld [vmem:[%s2011_s1 + $0x10] sm:$0xff]  ;;  %2032 = vst [vmem:[#allocation27_spill] sm:$0xff] %v1455_v43 }
  0x21   : > { %2012 = vst [vmem:[#allocation9_spill] sm:$0xff] %v1232_v0  ;;  %v1249_v3 = vld [vmem:[%s2011_s1 + $0x18] sm:$0xff]  ;;  %v1254_v4 = vld [vmem:[%s2011_s1 + $0x20] sm:$0xff]  ;;  %v1259_v5 = vld [vmem:[%s2011_s1 + $0x28] sm:$0xff]  ;;  %s1325_s15 = scalar_lea.vmem %s2024_s0, %s926_s20  ;;  %s1789_s20 = scalar_lea.vmem [#allocation3], %s890_s16 }
  0x22   : > { %2013 = vst [vmem:[#allocation10_spill] sm:$0xff] %v1237_v1  ;;  %v1264_v6 = vld [vmem:[%s2011_s1 + $0x30] sm:$0xff]  ;;  %v1269_v7 = vld [vmem:[%s2011_s1 + $0x38] sm:$0xff]  ;;  %v1274_v8 = vld [vmem:[%s2011_s1 + $0x40] sm:$0xff] }
  0x23   : > { %2014 = vst [vmem:[#allocation11_spill] sm:$0xff] %v1242_v2  ;;  %v1280_v9 = vld [vmem:[%s2011_s1 + $0x48] sm:$0xff]  ;;  %v1285_v10 = vld [vmem:[%s2011_s1 + $0x50] sm:$0xff]  ;;  %v1290_v11 = vld [vmem:[%s2011_s1 + $0x58] sm:$0xff] }
  0x24   : > { %2015 = vst [vmem:[#allocation12_spill] sm:$0xff] %v1249_v3  ;;  %v1295_v12 = vld [vmem:[%s2011_s1 + $0x60] sm:$0xff]  ;;  %v1300_v13 = vld [vmem:[%s2011_s1 + $0x68] sm:$0xff]  ;;  %v1305_v14 = vld [vmem:[%s2011_s1 + $0x70] sm:$0xff] }
  0x25   : > { %2016 = vst [vmem:[#allocation13_spill] sm:$0xff] %v1254_v4  ;;  %v1310_v15 = vld [vmem:[%s2011_s1 + $0x78] sm:$0xff]  ;;  %v1315_v16 = vld [vmem:[%s2011_s1 + $0x80] sm:$0xff]  ;;  %v1320_v17 = vld [vmem:[%s2011_s1 + $0x88] sm:$0xff] }
  0x26   : > { %2017 = vst [vmem:[#allocation14_spill] sm:$0xff] %v1259_v5  ;;  %v1330_v18 = vld [vmem:[%s2011_s1 + $0x90] sm:$0xff]  ;;  %v1335_v19 = vld [vmem:[%s2011_s1 + $0x98] sm:$0xff]  ;;  %v1340_v20 = vld [vmem:[%s2011_s1 + $0xa0] sm:$0xff] }
  0x27   : > { %2018 = vst [vmem:[#allocation15_spill] sm:$0xff] %v1264_v6  ;;  %v1345_v21 = vld [vmem:[%s2011_s1 + $0xa8] sm:$0xff]  ;;  %v1350_v22 = vld [vmem:[%s2011_s1 + $0xb0] sm:$0xff]  ;;  %v1355_v23 = vld [vmem:[%s2011_s1 + $0xb8] sm:$0xff] }
  0x28   : > { %2019 = vst [vmem:[#allocation16_spill] sm:$0xff] %v1269_v7  ;;  %v1360_v24 = vld [vmem:[%s2011_s1 + $0xc0] sm:$0xff]  ;;  %v1365_v25 = vld [vmem:[%s2011_s1 + $0xc8] sm:$0xff]  ;;  %v1370_v26 = vld [vmem:[%s2011_s1 + $0xd0] sm:$0xff] }
  0x29   : > { %2020 = vst [vmem:[#allocation17_spill] sm:$0xff] %v1274_v8  ;;  %v1375_v27 = vld [vmem:[%s2011_s1 + $0xd8] sm:$0xff]  ;;  %v1380_v28 = vld [vmem:[%s2011_s1 + $0xe0] sm:$0xff]  ;;  %v1385_v29 = vld [vmem:[%s2011_s1 + $0xe8] sm:$0xff] }
  0x2a   : > { %2021 = vst [vmem:[#allocation18_spill] sm:$0xff] %v1280_v9  ;;  %v1390_v30 = vld [vmem:[%s2011_s1 + $0xf0] sm:$0xff]  ;;  %v1395_v31 = vld [vmem:[%s2011_s1 + $0xf8] sm:$0xff]  ;;  %v1400_v32 = vld [vmem:[%s2011_s1 + $0x100] sm:$0xff] }
  0x2b   : > { %2022 = vst [vmem:[#allocation19_spill] sm:$0xff] %v1285_v10  ;;  %v1405_v33 = vld [vmem:[%s2011_s1 + $0x108] sm:$0xff]  ;;  %v1410_v34 = vld [vmem:[%s2011_s1 + $0x110] sm:$0xff]  ;;  %v1415_v35 = vld [vmem:[%s2011_s1 + $0x118] sm:$0xff] }
  0x2c   : > { %2023 = vst [vmem:[#allocation20_spill] sm:$0xff] %v1305_v14  ;;  %v1420_v36 = vld [vmem:[%s2025_s2] sm:$0x1]  ;;  %v1530_v58 = vld [vmem:[%s2002_s3 + $0xa8] sm:$0xff]  ;;  %v1535_v59 = vld [vmem:[%s2002_s3 + $0xb0] sm:$0xff] }
  0x2d   : > { %2033 = vst [vmem:[#allocation28_spill] sm:$0xff] %v1460_v44  ;;  %v1540_v60 = vld [vmem:[%s2002_s3 + $0xb8] sm:$0xff]  ;;  %v1545_v61 = vld [vmem:[%s2002_s3 + $0xc0] sm:$0xff]  ;;  %v1550_v62 = vld [vmem:[%s2002_s3 + $0xc8] sm:$0xff] }
  0x2e   : > { %2034 = vst [vmem:[#allocation29_spill] sm:$0xff] %v1465_v45  ;;  %v1555_v63 = vld [vmem:[%s2002_s3 + $0xd0] sm:$0xff]  ;;  %v1565_v37 = vld [vmem:[%s2002_s3 + $0xe0] sm:$0xff]  ;;  %v1650_v42 = vld [vmem:[%s2002_s3 + $0x168] sm:$0xff] }
  0x2f   : > { %2035 = vst [vmem:[#allocation30_spill] sm:$0xff] %v1470_v46  ;;  %v1575_v38 = vld [vmem:[%s2002_s3 + $0xf0] sm:$0xff]  ;;  %v1585_v39 = vld [vmem:[%s2002_s3 + $0x100] sm:$0xff]  ;;  %v1680_v44 = vld [vmem:[%s2002_s3 + $0x198] sm:$0xff] }
  0x30   : > { %2036 = vst [vmem:[#allocation31_spill] sm:$0xff] %v1505_v53  ;;  %v1560_v53 = vld [vmem:[%s2002_s3 + $0xd8] sm:$0xff]  ;;  %v1595_v40 = vld [vmem:[%s2002_s3 + $0x110] sm:$0xff]  ;;  %v1605_v41 = vld [vmem:[%s2002_s3 + $0x120] sm:$0xff] }
  0x31   : > { %2037 = vst [vmem:[#allocation32_spill] sm:$0xff] %v1510_v54  ;;  %v1570_v54 = vld [vmem:[%s2002_s3 + $0xe8] sm:$0xff]  ;;  %v1665_v43 = vld [vmem:[%s2002_s3 + $0x180] sm:$0xff]  ;;  %v1740_v45 = vld [vmem:[%s2002_s3 + $0x1f8] sm:$0xff] }
  0x32   : > { %2038 = vst [vmem:[#allocation33_spill] sm:$0xff] %v1515_v55  ;;  %v1580_v55 = vld [vmem:[%s2002_s3 + $0xf8] sm:$0xff] }
  0x33   : > { %2039 = vst [vmem:[#allocation34_spill] sm:$0xff] %v1520_v56  ;;  %v1590_v56 = vld [vmem:[%s2002_s3 + $0x108] sm:$0xff]  ;;  %v1760_v46 = vld [vmem:[%s2002_s3 + $0x218] sm:$0xff] }
  0x34   : > { %2040 = vst [vmem:[#allocation35_spill] sm:$0xff] %v1525_v57  ;;  %v1600_v57 = vld [vmem:[%s2002_s3 + $0x118] sm:$0xff] }
  0x35   : > { %2041 = vst [vmem:[#allocation36_spill] sm:$0xff] %v1530_v58  ;;  %v1640_v58 = vld [vmem:[%s2002_s3 + $0x158] sm:$0xff] }
  0x36   : > { %2042 = vst [vmem:[#allocation37_spill] sm:$0xff] %v1535_v59  ;;  %v1655_v59 = vld [vmem:[%s2002_s3 + $0x170] sm:$0xff] }
  0x37   : > { %2043 = vst [vmem:[#allocation38_spill] sm:$0xff] %v1540_v60  ;;  %v1670_v60 = vld [vmem:[%s2002_s3 + $0x188] sm:$0xff] }
  0x38   : > { %2044 = vst [vmem:[#allocation39_spill] sm:$0xff] %v1545_v61  ;;  %v1685_v61 = vld [vmem:[%s2002_s3 + $0x1a0] sm:$0xff] }
  0x39   : > { %2045 = vst [vmem:[#allocation40_spill] sm:$0xff] %v1550_v62  ;;  %v1745_v62 = vld [vmem:[%s2002_s3 + $0x200] sm:$0xff] }
  0x3a   : > { %2046 = vst [vmem:[#allocation41_spill] sm:$0xff] %v1555_v63  ;;  %v1765_v63 = vld [vmem:[%s2002_s3 + $0x220] sm:$0xff] }
  0x3b   : > { %2047 = vst [vmem:[#allocation42_spill] sm:$0xff] %v1585_v39  ;;  %v1610_v39 = vld [vmem:[%s2002_s3 + $0x128] sm:$0xff] }
  0x3c   : > { %2048 = vst [vmem:[#allocation43_spill] sm:$0xff] %v1590_v56  ;;  %v1615_v56 = vld [vmem:[%s2002_s3 + $0x130] sm:$0xff] }
  0x3d   : > { %2049 = vst [vmem:[#allocation44_spill] sm:$0xff] %v1595_v40  ;;  %v1620_v40 = vld [vmem:[%s2002_s3 + $0x138] sm:$0xff] }
  0x3e   : > { %2050 = vst [vmem:[#allocation45_spill] sm:$0xff] %v1600_v57  ;;  %v1625_v57 = vld [vmem:[%s2002_s3 + $0x140] sm:$0xff] }
  0x3f   : > { %2051 = vst [vmem:[#allocation46_spill] sm:$0xff] %v1605_v41  ;;  %v1630_v41 = vld [vmem:[%s2002_s3 + $0x148] sm:$0xff] }
  0x40   : > { %2052 = vst [vmem:[#allocation47_spill] sm:$0xff] %v1610_v39  ;;  %v1635_v39 = vld [vmem:[%s2002_s3 + $0x150] sm:$0xff] }
  0x41   : > { %2053 = vst [vmem:[#allocation48_spill] sm:$0xff] %v1615_v56  ;;  %v1645_v56 = vld [vmem:[%s2002_s3 + $0x160] sm:$0xff] }
  0x42   : > { %2054 = vst [vmem:[#allocation49_spill] sm:$0xff] %v1620_v40  ;;  %v1660_v40 = vld [vmem:[%s2002_s3 + $0x178] sm:$0xff] }
  0x43   : > { %2055 = vst [vmem:[#allocation50_spill] sm:$0xff] %v1625_v57  ;;  %v1675_v57 = vld [vmem:[%s2002_s3 + $0x190] sm:$0xff] }
  0x44   : > { %2056 = vst [vmem:[#allocation51_spill] sm:$0xff] %v1630_v41  ;;  %v1730_v41 = vld [vmem:[%s2002_s3 + $0x1e8] sm:$0xff] }
  0x45   : > { %2057 = vst [vmem:[#allocation52_spill] sm:$0xff] %v1635_v39  ;;  %v1750_v39 = vld [vmem:[%s2002_s3 + $0x208] sm:$0xff] }
  0x46   : > { %2058 = vst [vmem:[#allocation53_spill] sm:$0xff] %v1665_v43  ;;  %v1690_v43 = vld [vmem:[%s2002_s3 + $0x1a8] sm:$0xff] }
  0x47   : > { %2059 = vst [vmem:[#allocation54_spill] sm:$0xff] %v1670_v60  ;;  %v1695_v60 = vld [vmem:[%s2002_s3 + $0x1b0] sm:$0xff] }
  0x48   : > { %2060 = vst [vmem:[#allocation55_spill] sm:$0xff] %v1675_v57  ;;  %v1700_v57 = vld [vmem:[%s2002_s3 + $0x1b8] sm:$0xff] }
  0x49   : > { %2061 = vst [vmem:[#allocation56_spill] sm:$0xff] %v1680_v44  ;;  %v1705_v44 = vld [vmem:[%s2002_s3 + $0x1c0] sm:$0xff] }
  0x4a   : > { %2062 = vst [vmem:[#allocation57_spill] sm:$0xff] %v1685_v61  ;;  %v1710_v61 = vld [vmem:[%s2002_s3 + $0x1c8] sm:$0xff] }
  0x4b   : > { %2063 = vst [vmem:[#allocation58_spill] sm:$0xff] %v1690_v43  ;;  %v1715_v43 = vld [vmem:[%s2002_s3 + $0x1d0] sm:$0xff] }
  0x4c   : > { %2064 = vst [vmem:[#allocation59_spill] sm:$0xff] %v1695_v60  ;;  %v1720_v60 = vld [vmem:[%s2002_s3 + $0x1d8] sm:$0xff] }
  0x4d   : > { %2065 = vst [vmem:[#allocation60_spill] sm:$0xff] %v1700_v57  ;;  %v1725_v57 = vld [vmem:[%s2002_s3 + $0x1e0] sm:$0xff] }
  0x4e   : > { %2066 = vst [vmem:[#allocation61_spill] sm:$0xff] %v1705_v44  ;;  %v1735_v44 = vld [vmem:[%s2002_s3 + $0x1f0] sm:$0xff] }
  0x4f   : > { %2067 = vst [vmem:[#allocation62_spill] sm:$0xff] %v1710_v61  ;;  %v1755_v61 = vld [vmem:[%s2002_s3 + $0x210] sm:$0xff] }
  0x50   : > { %2068 = vst [vmem:[#allocation63_spill] sm:$0xff] %v1745_v62  ;;  %v1770_v62 = vld [vmem:[%s2002_s3 + $0x228] sm:$0xff] }
  0x51   : > { %2069 = vst [vmem:[#allocation64_spill] sm:$0xff] %v1750_v39  ;;  %v1775_v39 = vld [vmem:[%s2002_s3 + $0x230] sm:$0xff] }
  0x52   : > { %2070 = vst [vmem:[#allocation65_spill] sm:$0xff] %v1755_v61  ;;  %v1780_v61 = vld [vmem:[%s2002_s3 + $0x238] sm:$0xff] }
  0x53   : > { %2071 = vst [vmem:[#allocation66_spill] sm:$0xff] %v1760_v46  ;;  %v1785_v46 = vld [vmem:[%s2003_s4] sm:$0x1] }
  0x54   : > { %2072 = vst [vmem:[#allocation67_spill] sm:$0xff] %v1785_v46 }
  0x55 LB: >> { %417 = vmatpush.msra.mxu0 %v1310_v15  ;;  %437 = vmatpush.msra.mxu1 %v1395_v31  ;;  %s894_s16 = sshll.u32 %s1123_s14, 3  ;;  %v2073_v14 = vld [vmem:[#allocation20_spill] sm:$0xff]  ;;  %s1133_s18 = smov 32   ;;  %v2074_v10 = vld [vmem:[#allocation19_spill] sm:$0xff]  ;;  %v2075_v9 = vld [vmem:[#allocation18_spill] sm:$0xff]  ;;  %vm396_vm0 = vcmask 261120   ;;  %s1123_s14 = sphi %s1795_s14, %s376_s14  }
  0x56   : >> { %469 = vmatpush.msra.mxu2 %v1415_v35  ;;  %s1809_s17 = scalar_lea.vmem %s1325_s15, %s894_s16  ;;  %s1134_s19 = smov 64   ;;  %v2076_v8 = vld [vmem:[#allocation17_spill] sm:$0xff]  ;;  %v2077_v7 = vld [vmem:[#allocation16_spill] sm:$0xff]  ;;  %v2078_v6 = vld [vmem:[#allocation15_spill] sm:$0xff]  ;;  %vm398_vm1 = vcmask 523264   ;;  %vm409_vm2 = vcmask 785408  }
  0x57   : >> { %418 = vmatpush.msra.mxu0 %v2073_v14  ;;  %438 = vmatpush.msra.mxu1 %v1390_v30  ;;  %v896_v46 = vld [vmem:[%s1809_s17 + $0x8] sm:$0xff]  ;;  %v898_v14 = vld [vmem:[%s1809_s17 + $0x10] sm:$0xff]  ;;  %v2079_v5 = vld [vmem:[#allocation14_spill] sm:$0xff]  ;;  %s1135_s26 = smov 96   ;;  %vm479_vm3 = vcmask 521216   ;;  %s478_s28 = scalar_lea.vmem [#allocation2], %s894_s16 }
  0x58   : >> { %470 = vmatpush.msra.mxu2 %v1410_v34  ;;  %389 = vrot.lane.b32.xlu0 %v896_v46, %s1133_s18  ;;  %v2080_v4 = vld [vmem:[#allocation13_spill] sm:$0xff]  ;;  %v2081_v3 = vld [vmem:[#allocation12_spill] sm:$0xff]  ;;  %v2082_v2 = vld [vmem:[#allocation11_spill] sm:$0xff]  ;;  %s376_s14 = sadd.s32 1, %s1123_s14  }
  0x59   : >> { %419 = vmatpush.msra.mxu0 %v1300_v13  ;;  %439 = vmatpush.msra.mxu1 %v1385_v29  ;;  %v2083_v1 = vld [vmem:[#allocation10_spill] sm:$0xff]  ;;  %v2084_v0 = vld [vmem:[#allocation9_spill] sm:$0xff]  ;;  %p373_p11 = scmp.ge.s32.totalorder %s376_s14, 6  }
  0x5a   : >> { %471 = vmatpush.msra.mxu2 %v1405_v33  ;;  %v379_v46 = vld [vmem:[%s1809_s17] sm:$0xff]  ;;  %s1853_s29 = smov (%p373_p11), 0  }
  0x5b   : >> { %420 = vmatpush.msra.mxu0 %v1295_v12  ;;  %440 = vmatpush.msra.mxu1 %v1380_v28 }
  0x5c   : >> { %472 = vmatpush.msra.mxu2 %v1400_v32 }
  0x5d   : >> { %421 = vmatpush.msra.mxu0 %v1290_v11  ;;  %441 = vmatpush.msra.mxu1 %v1375_v27 }
  0x5f   : >> { %422 = vmatpush.msra.mxu0 %v2074_v10  ;;  %442 = vmatpush.msra.mxu1 %v1370_v26 }
  0x60   : >> { %393 = vrot.lane.b32.xlu0 %v898_v14, %s1134_s19 }
  0x61   : >> { %423 = vmatpush.msra.mxu0 %v2075_v9  ;;  %443 = vmatpush.msra.mxu1 %v1365_v25 }
  0x63   : >> { %424 = vmatpush.msra.mxu0 %v2076_v8  ;;  %444 = vmatpush.msra.mxu1 %v1360_v24 }
  0x65   : >> { %425 = vmatpush.msra.mxu0 %v2077_v7  ;;  %445 = vmatpush.msra.mxu1 %v1355_v23 }
  0x67   : >> { %426 = vmatpush.msra.mxu0 %v2078_v6  ;;  %446 = vmatpush.msra.mxu1 %v1350_v22 }
  0x69   : >> { %427 = vmatpush.msra.mxu0 %v2079_v5  ;;  %447 = vmatpush.msra.mxu1 %v1345_v21 }
  0x6b   : >> { %428 = vmatpush.msra.mxu0 %v2080_v4  ;;  %448 = vmatpush.msra.mxu1 %v1340_v20 }
  0x6d   : >> { %429 = vmatpush.msra.mxu0 %v2081_v3  ;;  %449 = vmatpush.msra.mxu1 %v1335_v19 }
  0x6f   : >> { %430 = vmatpush.msra.mxu0 %v2082_v2  ;;  %450 = vmatpush.msra.mxu1 %v1330_v18 }
  0x71   : >> { %431 = vmatpush.msra.mxu0 %v2083_v1  ;;  %451 = vmatpush.msra.mxu1 %v1320_v17 }
  0x73   : >> { %432 = vmatpush.msra.mxu0 %v2084_v0  ;;  %452 = vmatpush.msra.mxu1 %v1315_v16 }
  0xca   : >> { %v390_v14 = vpop.permute.xlu0 %389 }
  0xcb   : >> { %v397_v4 = vsel %vm396_vm0, %v379_v46, %v390_v14  ;;  %v413_v14 = vperm.slane %v1420_v36, 0 }
  0xd2   : >> { %v394_v3 = vpop.permute.xlu0 %393 }
  0xd3   : >> { %v399_v5 = vsel %vm398_vm1, %v397_v4, %v394_v3 }
  0xd4   : >> { %v405_v6 = vrot.slane %v399_v5, 2  ;;  %v401_v2 = vrot.slane %v399_v5, 1 }
  0xd6   : >> { %406 = vrot.lane.b32.xlu1 %v405_v6, %s1134_s19 }
  0xde   : >> { %402 = vrot.lane.b32.xlu1 %v401_v2, %s1135_s26 }
 0x148   : >> { %v407_v1 = vpop.permute.xlu1 %406 }
 0x149   : >> { %899 = vmatmul.msk.f32.vlgmr.msra.gmra.mxu2 %vm396_vm0, %v407_v1 }
 0x150   : >> { %v403_v0 = vpop.permute.xlu1 %402 }
 0x151   : >> { %v410_v7 = vsel %vm409_vm2, %v399_v5, %v403_v0  ;;  %v411_v8 = vsel %vm398_vm1, %v403_v0, %v407_v1 }
 0x152   : >> { %433 = vmatmul.f32.vlgmr.msra.gmra.mxu0 %v410_v7  ;;  %453 = vmatmul.f32.vlgmr.msra.gmra.mxu1 %v411_v8 }
 0x1cc   : >> { %v474_v6 = vpop.f32.mrf.mxu2 }
 0x1cf   : >> { %v434_v46 = vpop.f32.mrf.mxu0  ;;  %v454_v3 = vpop.f32.mrf.mxu1 }
 0x1d0   : >> { %v435_v9 = vadd.f32 %v434_v46, %v413_v14 }
 0x1d2   : >> { %v455_v4 = vadd.f32 %v454_v3, %v435_v9 }
 0x1d4   : >> { %v475_v10 = vadd.f32 %v474_v6, %v455_v4  ;;  %375 = sbr.rel (!%p373_p11) target bundleno = 85 (0x55), region = 124 }
 0x1d6   : >> { %v477_v2 = vmax.f32 %v475_v10, 0.0 }
 0x1d8   : >> { %480 = vst.msk [vmem:[%s478_s28] sm:$0x3f] %vm479_vm3, %v477_v2 }
 0x1d9 LB: >> { %524 = vmatpush.msra.mxu0 %v1500_v52  ;;  %584 = vmatpush.msra.mxu3 %v1740_v45  ;;  %s900_s10 = sshll.u32 %s1127_s29, 3  ;;  %s1136_s11 = smov 64   ;;  %v2085_v1 = vld [vmem:[#allocation41_spill] sm:$0xff]  ;;  %v2086_v5 = vld [vmem:[#allocation30_spill] sm:$0xff]  ;;  %v2088_v8 = vld [vmem:[#allocation52_spill] sm:$0xff]  ;;  %vm626_vm4 = vcmask 519168   ;;  %s1127_s29 = sphi %s1853_s29, %s486_s29  }
 0x1da   : >> { %544 = vmatpush.msra.mxu1 %v1580_v55  ;;  %564 = vmatpush.msra.mxu2 %v1660_v40  ;;  %s1867_s15 = scalar_lea.vmem [#allocation2], %s900_s10  ;;  %v2087_v7 = vld [vmem:[#allocation62_spill] sm:$0xff]  ;;  %v2089_v9 = vld [vmem:[#allocation40_spill] sm:$0xff]  ;;  %v2090_v10 = vld [vmem:[#allocation29_spill] sm:$0xff]  ;;  %s906_s12 = sshll.u32 %s1127_s29, 2 }
 0x1db   : >> { %525 = vmatpush.msra.mxu0 %v1495_v51  ;;  %585 = vmatpush.msra.mxu3 %v1735_v44  ;;  %v2091_v11 = vld [vmem:[#allocation61_spill] sm:$0xff]  ;;  %v2092_v12 = vld [vmem:[#allocation51_spill] sm:$0xff]  ;;  %v2094_v15 = vld [vmem:[#allocation28_spill] sm:$0xff]  ;;  %s625_s14 = scalar_lea.vmem %s1789_s20, %s906_s12 [#allocation3]  ;;  %s486_s29 = sadd.s32 1, %s1127_s29  }
 0x1dc   : >> { %545 = vmatpush.msra.mxu1 %v1575_v38  ;;  %565 = vmatpush.msra.mxu2 %v1655_v59  ;;  %v2093_v13 = vld [vmem:[#allocation39_spill] sm:$0xff]  ;;  %v2095_v16 = vld [vmem:[#allocation60_spill] sm:$0xff]  ;;  %v2096_v17 = vld [vmem:[#allocation50_spill] sm:$0xff]  ;;  %p483_p12 = scmp.ge.s32.totalorder %s486_s29, 4  }
 0x1dd   : >> { %526 = vmatpush.msra.mxu0 %v1490_v50  ;;  %586 = vmatpush.msra.mxu3 %v1730_v41  ;;  %v2097_v18 = vld [vmem:[#allocation38_spill] sm:$0xff]  ;;  %v2098_v19 = vld [vmem:[#allocation27_spill] sm:$0xff]  ;;  %v2100_v21 = vld [vmem:[#allocation49_spill] sm:$0xff]  ;;  %s1129_s16 = smov (%p483_p12), 0  }
 0x1de   : >> { %546 = vmatpush.msra.mxu1 %v1570_v54  ;;  %566 = vmatpush.msra.mxu2 %v1650_v42  ;;  %v2099_v20 = vld [vmem:[#allocation59_spill] sm:$0xff]  ;;  %v2101_v22 = vld [vmem:[#allocation37_spill] sm:$0xff]  ;;  %v2102_v23 = vld [vmem:[#allocation26_spill] sm:$0xff] }
 0x1df   : >> { %v902_v0 = vld [vmem:[%s1867_s15 + $0x8] sm:$0x3f]  ;;  %527 = vmatpush.msra.mxu0 %v1485_v49  ;;  %587 = vmatpush.msra.mxu3 %v1725_v57  ;;  %v2103_v24 = vld [vmem:[#allocation58_spill] sm:$0xff]  ;;  %v2104_v25 = vld [vmem:[#allocation48_spill] sm:$0xff] }
 0x1e0   : >> { %499 = vrot.lane.b32.xlu0 %v902_v0, %s1136_s11  ;;  %547 = vmatpush.msra.mxu1 %v1565_v37  ;;  %v2105_v26 = vld [vmem:[#allocation36_spill] sm:$0xff]  ;;  %v2106_v27 = vld [vmem:[#allocation25_spill] sm:$0xff]  ;;  %v2108_v29 = vld [vmem:[#allocation47_spill] sm:$0xff] }
 0x1e1   : >> { %528 = vmatpush.msra.mxu0 %v1480_v48  ;;  %588 = vmatpush.msra.mxu3 %v1720_v60  ;;  %v2107_v28 = vld [vmem:[#allocation57_spill] sm:$0xff]  ;;  %v2109_v30 = vld [vmem:[#allocation35_spill] sm:$0xff]  ;;  %v2110_v31 = vld [vmem:[#allocation24_spill] sm:$0xff] }
 0x1e2   : >> { %567 = vmatpush.msra.mxu2 %v1645_v56  ;;  %548 = vmatpush.msra.mxu1 %v1560_v53  ;;  %v2111_v32 = vld [vmem:[#allocation56_spill] sm:$0xff]  ;;  %v2112_v33 = vld [vmem:[#allocation46_spill] sm:$0xff]  ;;  %v2114_v35 = vld [vmem:[#allocation23_spill] sm:$0xff] }
 0x1e3   : >> { %529 = vmatpush.msra.mxu0 %v1475_v47  ;;  %589 = vmatpush.msra.mxu3 %v1715_v43  ;;  %v2113_v34 = vld [vmem:[#allocation34_spill] sm:$0xff]  ;;  %v2115_v36 = vld [vmem:[#allocation55_spill] sm:$0xff]  ;;  %v2116_v14 = vld [vmem:[#allocation45_spill] sm:$0xff] }
 0x1e4   : >> { %568 = vmatpush.msra.mxu2 %v1640_v58  ;;  %549 = vmatpush.msra.mxu1 %v2085_v1  ;;  %v2117_v46 = vld [vmem:[#allocation33_spill] sm:$0xff]  ;;  %v2118_v3 = vld [vmem:[#allocation22_spill] sm:$0xff]  ;;  %v2120_v6 = vld [vmem:[#allocation44_spill] sm:$0xff] }
 0x1e5   : >> { %530 = vmatpush.msra.mxu0 %v2086_v5  ;;  %590 = vmatpush.msra.mxu3 %v2087_v7  ;;  %v2119_v4 = vld [vmem:[#allocation54_spill] sm:$0xff]  ;;  %v2121_v2 = vld [vmem:[#allocation32_spill] sm:$0xff]  ;;  %v2122_v0 = vld [vmem:[#allocation21_spill] sm:$0xff] }
 0x1e6   : >> { %569 = vmatpush.msra.mxu2 %v2088_v8  ;;  %550 = vmatpush.msra.mxu1 %v2089_v9  ;;  %v2123_v1 = vld [vmem:[#allocation53_spill] sm:$0xff]  ;;  %v2124_v5 = vld [vmem:[#allocation43_spill] sm:$0xff]  ;;  %v2126_v8 = vld [vmem:[#allocation42_spill] sm:$0xff] }
 0x1e7   : >> { %531 = vmatpush.msra.mxu0 %v2090_v10  ;;  %591 = vmatpush.msra.mxu3 %v2091_v11  ;;  %v2125_v7 = vld [vmem:[#allocation31_spill] sm:$0xff]  ;;  %v2127_v9 = vld [vmem:[#allocation66_spill] sm:$0xff]  ;;  %v2128_v10 = vld [vmem:[#allocation65_spill] sm:$0xff] }
 0x1e8   : >> { %570 = vmatpush.msra.mxu2 %v2092_v12  ;;  %551 = vmatpush.msra.mxu1 %v2093_v13  ;;  %v2129_v11 = vld [vmem:[#allocation64_spill] sm:$0xff]  ;;  %v2130_v12 = vld [vmem:[#allocation63_spill] sm:$0xff] }
 0x1e9   : >> { %532 = vmatpush.msra.mxu0 %v2094_v15  ;;  %592 = vmatpush.msra.mxu3 %v2095_v16  ;;  %v904_v13 = vld [vmem:[%s1867_s15 + $0x10] sm:$0x3f]  ;;  %v489_v15 = vld [vmem:[%s1867_s15] sm:$0x3f] }
 0x1ea   : >> { %571 = vmatpush.msra.mxu2 %v2096_v17  ;;  %552 = vmatpush.msra.mxu1 %v2097_v18  ;;  %v507_v17 = vrot.slane %v904_v13, 1 }
 0x1eb   : >> { %533 = vmatpush.msra.mxu0 %v2098_v19  ;;  %593 = vmatpush.msra.mxu3 %v2099_v20 }
 0x1ec   : >> { %572 = vmatpush.msra.mxu2 %v2100_v21  ;;  %553 = vmatpush.msra.mxu1 %v2101_v22  ;;  %v516_v22 = vrot.slane %v904_v13, 2 }
 0x1ed   : >> { %534 = vmatpush.msra.mxu0 %v2102_v23  ;;  %594 = vmatpush.msra.mxu3 %v2103_v24 }
 0x1ee   : >> { %573 = vmatpush.msra.mxu2 %v2104_v25  ;;  %554 = vmatpush.msra.mxu1 %v2105_v26 }
 0x1ef   : >> { %535 = vmatpush.msra.mxu0 %v2106_v27  ;;  %595 = vmatpush.msra.mxu3 %v2107_v28  ;;  %v2131_v28 = vld [vmem:[#allocation67_spill] sm:$0xff] }
 0x1f0   : >> { %574 = vmatpush.msra.mxu2 %v2108_v29  ;;  %555 = vmatpush.msra.mxu1 %v2109_v30  ;;  %v520_v29 = vperm.slane %v2131_v28, 0 }
 0x1f1   : >> { %536 = vmatpush.msra.mxu0 %v2110_v31  ;;  %596 = vmatpush.msra.mxu3 %v2111_v32 }
 0x1f2   : >> { %575 = vmatpush.msra.mxu2 %v2112_v33  ;;  %556 = vmatpush.msra.mxu1 %v2113_v34 }
 0x1f3   : >> { %537 = vmatpush.msra.mxu0 %v2114_v35  ;;  %597 = vmatpush.msra.mxu3 %v2115_v36 }
 0x1f4   : >> { %576 = vmatpush.msra.mxu2 %v2116_v14  ;;  %557 = vmatpush.msra.mxu1 %v2117_v46 }
 0x1f5   : >> { %538 = vmatpush.msra.mxu0 %v2118_v3  ;;  %598 = vmatpush.msra.mxu3 %v2119_v4  ;;  %v628_v4 = vlaneseq (%p483_p12) }
 0x1f6   : >> { %577 = vmatpush.msra.mxu2 %v2120_v6  ;;  %558 = vmatpush.msra.mxu1 %v2121_v2 }
 0x1f7   : >> { %539 = vmatpush.msra.mxu0 %v2122_v0  ;;  %599 = vmatpush.msra.mxu3 %v2123_v1  ;;  %v629_v6 = vand.u32 (%p483_p12), 127, %v628_v4  ;;  %v631_v2 = vshrl.u32 (%p483_p12), %v628_v4, 7 }
 0x1f8   : >> { %578 = vmatpush.msra.mxu2 %v2124_v5  ;;  %559 = vmatpush.msra.mxu1 %v2125_v7  ;;  %v1137_v5 = vmov (%p483_p12), 0.0  }
 0x1f9   : >> { %612 = vmatpush.msrb.mxu0 %v1780_v61  ;;  %v632_v0 = vmul.u32 (%p483_p12), 2, %v631_v2 }
 0x1fa   : >> { %579 = vmatpush.msra.mxu2 %v2126_v8 }
 0x1fb   : >> { %613 = vmatpush.msrb.mxu0 %v1775_v39  ;;  %vm633_vm5 = vcmp.eq.s32.totalorder (%p483_p12), %v629_v6, %v632_v0  ;;  %v636_v1 = vadd.s32 (%p483_p12), 1, %v632_v0 }
 0x1fc   : > { %v907_v7 = vsel (%p483_p12), %vm633_vm5, 1.0, %v1137_v5 }
 0x1fd   : >> { %614 = vmatpush.msrb.mxu0 %v1770_v62  ;;  %vm637_vm6 = vcmp.eq.s32.totalorder (%p483_p12), %v629_v6, %v636_v1 }
 0x1fe   : > { %v908_v8 = vsel (%p483_p12), %vm637_vm6, 1.0, %v1137_v5 }
 0x1ff   : >> { %615 = vmatpush.msrb.mxu0 %v1765_v63 }
 0x201   : >> { %616 = vmatpush.msrb.mxu0 %v2127_v9 }
 0x203   : >> { %617 = vmatpush.msrb.mxu0 %v2128_v10 }
 0x205   : >> { %618 = vmatpush.msrb.mxu0 %v2129_v11 }
 0x207   : >> { %619 = vmatpush.msrb.mxu0 %v2130_v12 }
 0x252   : >> { %v500_v16 = vpop.permute.xlu0 %499 }
 0x253   : >> { %v503_v18 = vsel %vm398_vm1, %v489_v15, %v500_v16 }
 0x254   : >> { %v506_v19 = vrot.slane %v503_v18, 1  ;;  %540 = vmatmul.f32.vlgmr.msra.gmra.mxu0 %v503_v18  ;;  %v515_v20 = vrot.slane %v503_v18, 2 }
 0x256   : >> { %600 = vmatmul.f32.vlgmr.msra.gmra.mxu3 %v515_v20  ;;  %v1008_v21 = vpack.i.bf16 %v507_v17, %v506_v19 }
 0x258   : >> { %1009 = vrot.lane.b32.xlu0 %v1008_v21, %s1136_s11 }
 0x25c   : >> { %905 = vmatmul.msk.f32.vlgmr.msrb.gmra.mxu0 %vm398_vm1, %v516_v22 }
 0x2ca   : >> { %v1010_v23 = vpop.permute.xlu0 %1009 }
 0x2cb   : >> { %v1012_v24 = vunpack.i.h.bf16 %v1010_v23  ;;  %v1011_v25 = vunpack.i.l.bf16 %v1010_v23 }
 0x2cd   : >> { %v518_v26 = vsel %vm398_vm1, %v904_v13, %v1011_v25  ;;  %v512_v27 = vsel %vm398_vm1, %v1011_v25, %v1012_v24 }
 0x2ce   : >> { %560 = vmatmul.f32.vlgmr.msra.gmra.mxu1 %v518_v26  ;;  %580 = vmatmul.f32.vlgmr.msra.gmra.mxu2 %v512_v27 }
 0x2d1   : >> { %v541_v30 = vpop.f32.mrf.mxu0 }
 0x2d2   : >> { %v542_v32 = vadd.f32 %v541_v30, %v520_v29 }
 0x2d9   : >> { %v601_v36 = vpop.f32.mrf.mxu3  ;;  %v621_v14 = vpop.f32.mrf.mxu0 }
 0x34b   : >> { %v561_v31 = vpop.f32.mrf.mxu1 }
 0x34c   : >> { %v562_v33 = vadd.f32 %v561_v31, %v542_v32 }
 0x351   : >> { %v581_v34 = vpop.f32.mrf.mxu2 }
 0x352   : >> { %v582_v35 = vadd.f32 %v581_v34, %v562_v33 }
 0x354   : >> { %v602_v46 = vadd.f32 %v601_v36, %v582_v35  ;;  %485 = sbr.rel (!%p483_p12) target bundleno = 473 (0x1d9), region = 135 }
 0x356   : >> { %v622_v3 = vadd.f32 %v621_v14, %v602_v46 }
 0x358   : >> { %627 = vst.msk [vmem:[%s625_s14] sm:$0xf] %vm626_vm4, %v622_v3 }
 0x359 LB: >> { %s927_s17 = sshll.u32 %s1131_s16, 3  ;;  %vm659_vm7 = vcmask 1043456   ;;  %vm655_vm8 = vcmask 31744   ;;  %s909_s19 = sshll.u32 %s1131_s16, 1  ;;  %vm708_vm9 = vcmask 517120   ;;  %s1131_s16 = sphi %s1129_s16, %s645_s16  }
 0x35a   : >> { %s648_s18 = scalar_lea.vmem %s1789_s20, %s927_s17 [#allocation3]  ;;  %s707_s26 = scalar_lea.vmem %s1793_s13, %s909_s19 [#allocation5] }
 0x35b   : >> { %s645_s16 = sadd.s32 1, %s1131_s16  }
 0x35c   : >> { %p642_p13 = scmp.ge.s32.totalorder %s645_s16, 2  }
 0x35d   : > { %s929_s28 = sshll.u32 (%p642_p13), %s1198_s25, 4  ;;  %s728_s11 = sshll.u32 (%p642_p13), %s1789_s20, 4  ;;  %s729_s11 = int_to_ptr.vmem [resolvable:$true] %s728_s11 }
 0x35e   : > { %s727_s15 = scalar_lea.hbm (%p642_p13), %s2004_s5, %s929_s28  ;;  %s711_s14 = scalar_lea.sflag (%p642_p13), [#allocation4], %s1226_s9 }
 0x35f   : >> { %v649_v9 = vld [vmem:[%s648_s18] sm:$0xf]  ;;  %v913_v10 = vld [vmem:[%s648_s18 + $0x4] sm:$0xf]  ;;  %s730_s12 = sshll.u32 (%p642_p13), %s727_s15, 4  ;;  %s731_s12 = int_to_ptr.hbm [resolvable:$true] %s730_s12 }
 0x360   : >> { %v654_v37 = vmax.f32 %v649_v9, %v913_v10  ;;  %s1027_s17 = sshra.s32 (%p642_p13), %s731_s12, 4  ;;  %s1028_s17 = int_to_ptr.hbm [resolvable:$true] %s1027_s17 }
 0x361   : > { %s1029_s18 = scalar_lea.hbm (%p642_p13), %s1028_s17, 16  ;;  %p1034_p3 = scmp.lt.s32.totalorder (%p642_p13), %s1028_s17, %s2004_s5 }
 0x362   : >> { %914 = vmatpush.msk.msra.mxu0 %vm659_vm7, %v654_v37  ;;  %916 = vmatpush.msk.msra.mxu1 %vm659_vm7, %v654_v37  ;;  %p1030_p0 = scmp.ne.s32.totalorder (%p642_p13), %s1028_s17, %s1029_s18 }
 0x363   : >> { %915 = vmatmul.msk.f32.vlgmr.msra.gmra.mxu0 %vm655_vm8, %v907_v7  ;;  %917 = vmatmul.msk.f32.vlgmr.msra.gmra.mxu1 %vm655_vm8, %v908_v8 }
 0x364   : > { %p1031_p1 = pnand (%p642_p13), %p1030_p0, %p1215_p5 }
 0x366   : > { %p1032_p2 = pneg (%p642_p13), %p1031_p1 }
 0x3df   : > { %644 = sbr.rel (!%p642_p13) target bundleno = 857 (0x359), region = 146 }
 0x3e0   : >> { %v680_v38 = vpop.f32.mrf.mxu0  ;;  %v703_v39 = vpop.f32.mrf.mxu1 }
 0x3e1   : >> { %v706_v40 = vmax.f32 %v680_v38, %v703_v39 }
 0x3e3   : >> { %709 = vst.msk [vmem:[%s707_s26] sm:$0x3] %vm708_vm9, %v706_v40  ;;  %s1033_s26 = scalar_lea.hbm (%p642_p13), %s2004_s5, 32 }
 0x3e4   : > { %p1035_p4 = scmp.lt.s32.totalorder %s1033_s26, %s1029_s18 }
 0x3e6   : > { %p1036_p7 = por %p1035_p4, %p1034_p3 }
 0x3e8   : > { %p1037_p8 = pnand %p1036_p7, %p1032_p2 }
 0x3ea   : > { %1040 = shalt.err (!%p1037_p8)
}
 0x3eb   : > { %s1138_s20 = smov 64   ;;  %s1139_s28 = smov 4  }
 0x3ec   : > { %931 = dma.vmem_to_hbm [thread:$0]  (%p1215_p5), %s729_s11, 256, %s731_s12, %s711_s14, %s1138_s20, %s1138_s20, %s1139_s28  }
 0x3ed   : > { %s930_s29 = sshll.u32 %s1198_s25, 2  ;;  %s745_s10 = sshll.u32 %s1793_s13, 4  ;;  %s746_s10 = int_to_ptr.vmem [resolvable:$true] %s745_s10 }
 0x3ee   : > { %s744_s0 = scalar_lea.hbm %s2005_s6, %s930_s29  ;;  %s716_s17 = scalar_lea.sflag [#allocation6], %s1226_s9 }
 0x3ef   : > { %s747_s1 = sshll.u32 %s744_s0, 4  ;;  %s1061_s25 = scalar_lea.hbm %s2005_s6, 8  ;;  %s748_s1 = int_to_ptr.hbm [resolvable:$true] %s747_s1 }
 0x3f0   : > { %s1055_s18 = sshra.s32 %s748_s1, 4  ;;  %s1056_s18 = int_to_ptr.hbm [resolvable:$true] %s1055_s18 }
 0x3f1   : > { %s1057_s19 = scalar_lea.hbm %s1056_s18, 4  ;;  %p1062_p12 = scmp.lt.s32.totalorder %s1056_s18, %s2005_s6 }
 0x3f2   : > { %p1058_p9 = scmp.ne.s32.totalorder %s1056_s18, %s1057_s19  ;;  %p1063_p13 = scmp.lt.s32.totalorder %s1061_s25, %s1057_s19 }
 0x3f4   : > { %p1059_p10 = pnand %p1058_p9, %p1215_p5  ;;  %p1064_p0 = por %p1063_p13, %p1062_p12 }
 0x3f6   : > { %p1060_p11 = pneg %p1059_p10 }
 0x3f8   : > { %p1065_p1 = pnand %p1064_p0, %p1060_p11 }
 0x3fa   : > { %1068 = shalt.err (!%p1065_p1)
}
 0x3fb   : > { %s1140_s9 = smov 32   ;;  %s1141_s12 = smov 2  }
 0x3fc   : > { %932 = dma.vmem_to_hbm [thread:$0]  (%p1215_p5), %s746_s10, 64, %s748_s1, %s716_s17, %s1140_s9, %s1140_s9, %s1141_s12  }
 0x3fd PF: > { %p942_p2 = scmp.ge.s32.totalorder %s1119_s24, 2  ;;  %s762_s2 = sand.u32 1, %s1107_s21  }
 0x3fe   : > { %s763_s14 = scalar_lea.sflag [#allocation4], %s762_s2 }
 0x3ff   : > { %p936_p3 = pnand %p942_p2, %p1219_p6 }
 0x401   : > { %p937_p4 = pneg %p936_p3 }
 0x403   : > { %1098 = dma.done.wait (%p937_p4), %s763_s14, 256  }
 0x404   : > { %1100 = vsyncadd (%p937_p4), %s763_s14, 4294967040  ;;  %s773_s20 = scalar_lea.sflag [#allocation6], %s762_s2 }
 0x405   : > { %1102 = dma.done.wait (%p937_p4), %s773_s20, 64  }
 0x406   : > { %1104 = vsyncadd (%p937_p4), %s773_s20, 4294967232  ;;  %p20_p5 = scmp.ge.s32.totalorder %s1202_s27, 4   ;;  %s2132_s21 = smov %s1111_s22 }
 0x407   : > { %s2133_s22 = smov %s1115_s23  ;;  %s2134_s23 = smov %s1213_s30 }
 0x408   : > { %s2135_s24 = smov %s1202_s27  ;;  %22 = sbr.rel (!%p20_p5) target bundleno = 9 (0x9), region = 157 }
 0x40d   :  { %779 = vsyncpa [#allocation4], 1 }
 0x40e   :  { %781 = vsyncpa [#allocation4 + $0x1], 1 }
 0x40f   :  { %782 = vsyncpa [#allocation6], 1 }
 0x410   :  { %784 = vsyncpa [#allocation6 + $0x1], 1 }

</bundles_post_ra>
